<compile_context>
chip_gen: v7x
topology: tpu7x:2x2x1
jax: 0.10.0
libtpu: 0.0.40
codegen_flags: <defaults>
</compile_context>

<pallas_src>
import functools

import jax
import jax.numpy as jnp
from jax.experimental import pallas as pl
from jax.experimental.pallas import tpu as pltpu


def _leaky(v):
    # leaky_relu(v, 0.1) without a select: max(v, 0.1*v).
    return jnp.maximum(v, 0.1 * v)


def resblock_kernel(x_top_ref, x_mid_ref, x_bot_ref,
                    w1_ref, b1_ref, w2_ref, b2_ref, o_ref, *, w_valid):
    # x_top_ref : (1, 1, Wp, C)  f32   row r0-1 (clamped; zeroed at image top)
    # x_mid_ref : (1, R, Wp, C)  f32   rows [r0, r0+R)
    # x_bot_ref : (1, 1, Wp, C)  f32   row r0+R (clamped; zeroed at image bottom)
    # w1_ref    : (C, Cmid)      bf16  BN1 scale folded
    # b1_ref    : (1, Cmid)      f32
    # w2_ref    : (3, 3*Cmid, C) bf16  BN2 scale folded, grouped by kw
    # b2_ref    : (1, C)         f32
    # o_ref     : (1, R, Wp, C)  f32
    _, R, Wp, C = x_mid_ref.shape
    Cmid = w1_ref.shape[1]
    rows_mid = R * Wp
    rows_tot = (R + 2) * Wp

    rb = pl.program_id(1)
    n_rb = pl.num_programs(1)

    w1 = w1_ref[...]
    b1 = b1_ref[...]

    def conv1(x2d):
        h = jnp.dot(x2d.astype(jnp.bfloat16), w1,
                    preferred_element_type=jnp.float32)
        return _leaky(h + b1)

    x_mid2d = x_mid_ref[0].reshape(rows_mid, C)     # Wp % 8 == 0 -> free reshape

    # ---- 1x1 conv (+BN bias +leaky).  The two halo rows are recomputed
    # (cheap, 2/(R+2) of 1/9 of the flops) and zeroed at the image borders so
    # the 3x3 sees exactly the zero padding the PyTorch conv applies to h.
    h_mid = conv1(x_mid2d)                                        # (R*Wp, Cmid)
    h_top = jnp.where(rb > 0, conv1(x_top_ref[0, 0]), 0.0)        # (Wp,   Cmid)
    h_bot = jnp.where(rb < n_rb - 1, conv1(x_bot_ref[0, 0]), 0.0)
    h = jnp.concatenate([h_top, h_mid, h_bot], axis=0)            # ((R+2)*Wp, Cmid)

    # ---- column (kw) neighbours: one ±1 sublane roll each, masked with a
    # (rows, 1) column mask broadcast along lanes.  Kept in f32 (review caveat
    # for ±1 shifts on packed bf16; v5e has no bf16 VALU).
    c_idx = jax.lax.broadcasted_iota(jnp.int32, (rows_tot, 1), 0) % Wp
    h_l = jnp.where(c_idx >= 1, pltpu.roll(h, shift=1, axis=0), 0.0)
    h_r = jnp.where(c_idx < w_valid - 1,
                    pltpu.roll(h, shift=rows_tot - 1, axis=0), 0.0)

    # ---- row (kh) neighbours are plain aligned slices of the halo-extended
    # buffer — no row rolls, no row masks.
    def kh_taps(src):
        cat = jnp.concatenate(
            [src[0:rows_mid],                      # kh = 0 (row above)
             src[Wp:Wp + rows_mid],                # kh = 1 (center)
             src[2 * Wp:2 * Wp + rows_mid]],       # kh = 2 (row below)
            axis=1)
        return cat.astype(jnp.bfloat16)            # (R*Wp, 3*Cmid)

    # ---- 3x3 conv as three accumulating MXU matmuls (K = 3*Cmid); the full
    # (rows, 9*Cmid) im2col matrix is never materialized.
    acc = jnp.dot(kh_taps(h_l), w2_ref[0], preferred_element_type=jnp.float32)
    acc = acc + jnp.dot(kh_taps(h), w2_ref[1], preferred_element_type=jnp.float32)
    acc = acc + jnp.dot(kh_taps(h_r), w2_ref[2], preferred_element_type=jnp.float32)

    y = _leaky(acc + b2_ref[...])                                 # (R*Wp, C) f32

    # ---- residual add (exact f32 x).
    o_ref[0] = (x_mid2d + y).reshape(R, Wp, C).astype(o_ref.dtype)


# ----------------------------- wrapper / tiling -------------------------------

def _vmem_budget_bytes():
    try:
        phys = int(pltpu.get_tpu_info().vmem_capacity_bytes)
    except Exception:
        phys = 64 * 1024 * 1024          # conservative fallback (v7x: 64 MiB/TC)
    return int((phys * 3) // 4)          # leave headroom for the compiler


def _block_vmem_bytes(R, Wp, C, Cmid):
    """Rough per-step VMEM footprint (weights counted double-buffered so the
    no-Buffered(1) fallback also fits)."""
    f32, bf16 = 4, 2
    rows_mid, rows_tot = R * Wp, (R + 2) * Wp
    io = 2 * (rows_mid + 2 * Wp) * C * f32          # x_top/x_mid/x_bot, 2 bufs
    io += 2 * rows_mid * C * f32                    # output, 2 bufs
    wts = 2 * ((C * Cmid + 9 * Cmid * C) * bf16 + (Cmid + C) * f32)
    tmp = 3 * rows_tot * Cmid * f32                 # h, h_l, h_r
    tmp += rows_mid * 3 * Cmid * (f32 + bf16)       # one kh_taps group
    tmp += 2 * rows_mid * C * f32                   # acc, y
    tmp += rows_mid * C * bf16                      # bf16 cast of x for the 1x1
    return io + wts + tmp


def _pick_rows_per_block(H, Wp, C, Cmid, budget):
    best = 1
    for R in range(1, H + 1):
        if H % R:
            continue
        if 5 * _block_vmem_bytes(R, Wp, C, Cmid) <= 4 * budget:   # ~25% headroom
            best = R
    return best


def _pallas_forward(x_p, w1, b1, w2, b2, *, rows_per_block, w_valid,
                    vmem_limit, single_buffer_weights):
    N, H, Wp, C = x_p.shape
    Cmid = w1.shape[1]
    R = rows_per_block
    num_rb = H // R
    const_kw = {"pipeline_mode": pl.Buffered(1)} if single_buffer_weights else {}

    kernel = functools.partial(resblock_kernel, w_valid=w_valid)

    flops = 2 * N * H * Wp * (C * Cmid + 9 * Cmid * C)
    bytes_accessed = (2 * 4 * N * H * Wp * C            # x in + out, f32
                      + 2 * (w1.size + w2.size)          # bf16 weights
                      + 4 * (b1.size + b2.size))         # f32 biases

    return pl.pallas_call(
        kernel,
        out_shape=jax.ShapeDtypeStruct((N, H, Wp, C), x_p.dtype),
        grid_spec=pltpu.PrefetchScalarGridSpec(
            num_scalar_prefetch=0,
            grid=(N, num_rb),
            in_specs=[
                # top halo row (clamped to 0; zeroed in-kernel at image top)
                pl.BlockSpec((1, 1, Wp, C),
                             lambda n, rb: (n, jnp.maximum(rb * R - 1, 0), 0, 0)),
                # center rows
                pl.BlockSpec((1, R, Wp, C), lambda n, rb: (n, rb, 0, 0)),
                # bottom halo row (clamped to H-1; zeroed at image bottom)
                pl.BlockSpec((1, 1, Wp, C),
                             lambda n, rb: (n, jnp.minimum(rb * R + R, H - 1), 0, 0)),
                # constant weights / biases (single-buffered when supported)
                pl.BlockSpec((C, Cmid), lambda n, rb: (0, 0), **const_kw),
                pl.BlockSpec((1, Cmid), lambda n, rb: (0, 0), **const_kw),
                pl.BlockSpec((3, 3 * Cmid, C), lambda n, rb: (0, 0, 0), **const_kw),
                pl.BlockSpec((1, C), lambda n, rb: (0, 0), **const_kw),
            ],
            out_specs=pl.BlockSpec((1, R, Wp, C), lambda n, rb: (n, rb, 0, 0)),
        ),
        compiler_params=pltpu.CompilerParams(
            # both axes independent -> megacore / 2-TC sharding even at N == 1
            dimension_semantics=("parallel", "parallel"),
            vmem_limit_bytes=int(vmem_limit),
        ),
        cost_estimate=pl.CostEstimate(
            flops=flops, transcendentals=0, bytes_accessed=bytes_accessed),
    )(x_p, x_p, x_p, w1, b1, w2, b2)


def darknet_residual_block_nhwc(x, w1, b1, w2, b2, rows_per_block=None):
    """NHWC-native forward.  x: (N, H, W, C) f32; w1: (C, Cmid) bf16;
    w2: (3, 3*Cmid, C) bf16; b1/b2: f32 row vectors (see prepare_params)."""
    N, H, W, C = x.shape
    Cmid = w1.shape[1]
    assert w2.shape == (3, 3 * Cmid, C)

    # Pad W to a multiple of 8 (real Darknet widths 13/26/52...).  Padded h1
    # columns never reach a valid output (column masks use the real W).
    Wp = max(8, ((W + 7) // 8) * 8)
    x_p = x if Wp == W else jnp.pad(x, ((0, 0), (0, 0), (0, Wp - W), (0, 0)))

    budget = _vmem_budget_bytes()
    if rows_per_block is None:
        rows_per_block = _pick_rows_per_block(H, Wp, C, Cmid, budget)
    assert H % rows_per_block == 0, "rows_per_block must divide H"

    run = functools.partial(
        _pallas_forward, x_p, w1, b1, w2, b2,
        rows_per_block=rows_per_block, w_valid=W, vmem_limit=budget)
    try:
        out_p = jax.block_until_ready(run(single_buffer_weights=True))
    except Exception:
        # TODO(synk): pl.Buffered(1) (single-buffered constant weight blocks)
        #             not accepted by this JAX/Mosaic build; fall back to the
        #             default double-buffered weight blocks.
        out_p = jax.block_until_ready(run(single_buffer_weights=False))

    return out_p if Wp == W else out_p[:, :, :W, :]


def darknet_residual_block_nchw(x_nchw, w1, b1, w2, b2, rows_per_block=None):
    """Drop-in NCHW adapter for PyTorch parity.  Prefer the NHWC entry point:
    these two transposes add a full extra HBM round trip of x and out."""
    x = jnp.transpose(x_nchw, (0, 2, 3, 1))
    out = darknet_residual_block_nhwc(x, w1, b1, w2, b2, rows_per_block)
    return jnp.transpose(out, (0, 3, 1, 2))


# ----------------------------- host-side prep --------------------------------

def _fold_bn(gamma, beta, mean, var, eps=1e-5):
    scale = gamma / jnp.sqrt(var + eps)
    bias = beta - mean * scale
    return scale, bias


def prepare_params(w1_torch, bn1, w2_torch, bn2):
    """Fold BN scales into the conv weights (host side, once) and lay them out
    for the kernel:
      w1 -> (C, Cmid)       bf16
      w2 -> (3, 3*Cmid, C)  bf16, grouped by kw (left/center/right), then kh
                             (up/center/down), then cin — the kernel's order."""
    Cmid, C = w1_torch.shape[0], w1_torch.shape[1]
    s1, b1 = _fold_bn(*bn1)
    s2, b2 = _fold_bn(*bn2)
    w1 = (jnp.transpose(w1_torch[:, :, 0, 0], (1, 0)) * s1[None, :]).astype(jnp.bfloat16)
    w2 = jnp.transpose(w2_torch, (3, 2, 1, 0)).reshape(9 * Cmid, C)   # (kw,kh,cin) rows
    w2 = (w2 * s2[None, :]).astype(jnp.bfloat16).reshape(3, 3 * Cmid, C)
    return (w1, b1.reshape(1, Cmid).astype(jnp.float32),
            w2, b2.reshape(1, C).astype(jnp.float32))


# ------------------------------- reference -----------------------------------

def _reference_nhwc(x, w1_t, bn1, w2_t, bn2):
    """Pure-JAX NHWC reference mirroring the PyTorch forward (eval-mode BN)."""
    eps = 1e-5
    g1, be1, m1, v1 = bn1
    g2, be2, m2, v2 = bn2
    N, H, W, C = x.shape
    h = jnp.einsum('nhwc,oc->nhwo', x, w1_t[:, :, 0, 0])
    h = (h - m1) / jnp.sqrt(v1 + eps) * g1 + be1
    h = jnp.where(h > 0, h, 0.1 * h)
    hp = jnp.pad(h, ((0, 0), (1, 1), (1, 1), (0, 0)))
    y = jnp.zeros_like(x)
    for dh in range(3):
        for dw in range(3):
            y = y + jnp.einsum('nhwc,oc->nhwo',
                               hp[:, dh:dh + H, dw:dw + W, :],
                               w2_t[:, :, dh, dw])
    y = (y - m2) / jnp.sqrt(v2 + eps) * g2 + be2
    y = jnp.where(y > 0, y, 0.1 * y)
    return x + y


if __name__ == "__main__":
    def make_case(key, N, C, H, W):
        Cmid = C // 2
        k = jax.random.split(key, 7)
        x = jax.random.normal(k[0], (N, H, W, C), jnp.float32)
        w1_t = 0.1 * jax.random.normal(k[1], (Cmid, C, 1, 1), jnp.float32)
        w2_t = 0.1 * jax.random.normal(k[2], (C, Cmid, 3, 3), jnp.float32)
        bn1 = (1.0 + 0.1 * jax.random.normal(k[3], (Cmid,), jnp.float32),
               0.1 * jax.random.normal(k[4], (Cmid,), jnp.float32),
               0.05 * jnp.arange(Cmid, dtype=jnp.float32),
               1.0 + 0.02 * jnp.arange(Cmid, dtype=jnp.float32))
        bn2 = (1.0 + 0.1 * jax.random.normal(k[5], (C,), jnp.float32),
               0.1 * jax.random.normal(k[6], (C,), jnp.float32),
               0.05 * jnp.arange(C, dtype=jnp.float32),
               1.0 + 0.02 * jnp.arange(C, dtype=jnp.float32))
        return x, w1_t, bn1, w2_t, bn2

    key = jax.random.PRNGKey(0)
    k1, k2 = jax.random.split(key)

    # Case 1: C=16, 16x16, two row blocks per image (exercises the halo path
    # between blocks and the zero-padded image top/bottom).
    x, w1_t, bn1, w2_t, bn2 = make_case(k1, N=2, C=16, H=16, W=16)
    w1, b1, w2, b2 = prepare_params(w1_t, bn1, w2_t, bn2)
    out = jax.block_until_ready(
        darknet_residual_block_nhwc(x, w1, b1, w2, b2, rows_per_block=8))
    ref = _reference_nhwc(x, w1_t, bn1, w2_t, bn2)
    assert out.shape == x.shape
    err1 = float(jnp.max(jnp.abs(out - ref)))
    # bf16 MXU matmuls -> loosened tolerance vs the f32 reference.
    assert jnp.allclose(out, ref, atol=5e-2, rtol=5e-2), f"case1 mismatch {err1}"

    # Case 2: W not a multiple of 8 (exercises the W-padding path).
    x, w1_t, bn1, w2_t, bn2 = make_case(k2, N=1, C=8, H=12, W=12)
    w1, b1, w2, b2 = prepare_params(w1_t, bn1, w2_t, bn2)
    out = jax.block_until_ready(
        darknet_residual_block_nhwc(x, w1, b1, w2, b2, rows_per_block=6))
    ref = _reference_nhwc(x, w1_t, bn1, w2_t, bn2)
    assert out.shape == x.shape
    err2 = float(jnp.max(jnp.abs(out - ref)))
    assert jnp.allclose(out, ref, atol=5e-2, rtol=5e-2), f"case2 mismatch {err2}"

    print("KERNEL_OK")
</pallas_src>

<mosaic_0001>
module attributes {stable_mosaic.version = 11 : i64} {
  func.func @resblock_kernel(%arg0: i32, %arg1: i32, %arg2: memref<1x1x16x16xf32, #tpu.memory_space<vmem>>, %arg3: memref<1x8x16x16xf32, #tpu.memory_space<vmem>>, %arg4: memref<1x1x16x16xf32, #tpu.memory_space<vmem>>, %arg5: memref<16x8xbf16, #tpu.memory_space<vmem>>, %arg6: memref<1x8xf32, #tpu.memory_space<vmem>>, %arg7: memref<3x24x16xbf16, #tpu.memory_space<vmem>>, %arg8: memref<1x16xf32, #tpu.memory_space<vmem>>, %arg9: memref<1x8x16x16xf32, #tpu.memory_space<vmem>>) attributes {dimension_semantics = [#tpu.dimension_semantics<parallel>, #tpu.dimension_semantics<parallel>], iteration_bounds = array<i64: 2, 2>, scalar_prefetch = 0 : i64, scratch_operands = 0 : i64, tpu.core_type = #tpu.core_type<tc>, window_params = [{transform_indices = @transform_0, window_bounds = array<i64: 1, 1, 16, 16>}, {transform_indices = @transform_1, window_bounds = array<i64: 1, 8, 16, 16>}, {transform_indices = @transform_2, window_bounds = array<i64: 1, 1, 16, 16>}, {pipeline_mode = #tpu.pipeline_mode<synchronous>, transform_indices = @transform_3, window_bounds = array<i64: 16, 8>}, {pipeline_mode = #tpu.pipeline_mode<synchronous>, transform_indices = @transform_4, window_bounds = array<i64: 1, 8>}, {pipeline_mode = #tpu.pipeline_mode<synchronous>, transform_indices = @transform_5, window_bounds = array<i64: 3, 24, 16>}, {pipeline_mode = #tpu.pipeline_mode<synchronous>, transform_indices = @transform_6, window_bounds = array<i64: 1, 16>}, {transform_indices = @transform_7, window_bounds = array<i64: 1, 8, 16, 16>}]} {
    %c0 = arith.constant 0 : index
    %c0_0 = arith.constant 0 : index
    %0 = vector.load %arg5[%c0, %c0_0] : memref<16x8xbf16, #tpu.memory_space<vmem>>, vector<16x8xbf16>
    %c0_1 = arith.constant 0 : index
    %c0_2 = arith.constant 0 : index
    %1 = vector.load %arg6[%c0_1, %c0_2] : memref<1x8xf32, #tpu.memory_space<vmem>>, vector<1x8xf32>
    %c0_3 = arith.constant 0 : index
    %c0_4 = arith.constant 0 : index
    %c0_5 = arith.constant 0 : index
    %c0_6 = arith.constant 0 : index
    %2 = vector.load %arg3[%c0_3, %c0_4, %c0_5, %c0_6] : memref<1x8x16x16xf32, #tpu.memory_space<vmem>>, vector<1x8x16x16xf32>
    %3 = vector.shape_cast %2 : vector<1x8x16x16xf32> to vector<8x16x16xf32>
    %4 = vector.shape_cast %3 : vector<8x16x16xf32> to vector<128x16xf32>
    %5 = arith.truncf %4 : vector<128x16xf32> to vector<128x16xbf16>
    %cst = arith.constant dense<0.000000e+00> : vector<128x8xf32>
    %6 = tpu.matmul %5, %0, %cst {dimension_numbers = #tpu.dot_dimension_numbers<[1], [0], [0], [1], [0, 0, 1, 1], [], []>} : vector<128x16xbf16>, vector<16x8xbf16>, vector<128x8xf32> -> vector<128x8xf32>
    %7 = vector.broadcast %1 : vector<1x8xf32> to vector<128x8xf32>
    %8 = arith.addf %6, %7 : vector<128x8xf32>
    %cst_7 = arith.constant 1.000000e-01 : f32
    %9 = vector.broadcast %cst_7 : f32 to vector<128x8xf32>
    %10 = arith.mulf %9, %8 : vector<128x8xf32>
    %11 = arith.maximumf %8, %10 : vector<128x8xf32>
    %c0_i32 = arith.constant 0 : i32
    %12 = arith.cmpi sgt, %arg1, %c0_i32 : i32
    %c0_8 = arith.constant 0 : index
    %c0_9 = arith.constant 0 : index
    %c0_10 = arith.constant 0 : index
    %c0_11 = arith.constant 0 : index
    %13 = vector.load %arg2[%c0_8, %c0_9, %c0_10, %c0_11] : memref<1x1x16x16xf32, #tpu.memory_space<vmem>>, vector<1x1x16x16xf32>
    %14 = vector.shape_cast %13 : vector<1x1x16x16xf32> to vector<16x16xf32>
    %15 = arith.truncf %14 : vector<16x16xf32> to vector<16x16xbf16>
    %cst_12 = arith.constant dense<0.000000e+00> : vector<16x8xf32>
    %16 = tpu.matmul %15, %0, %cst_12 {dimension_numbers = #tpu.dot_dimension_numbers<[1], [0], [0], [1], [0, 0, 1, 1], [], []>} : vector<16x16xbf16>, vector<16x8xbf16>, vector<16x8xf32> -> vector<16x8xf32>
    %17 = vector.broadcast %1 : vector<1x8xf32> to vector<16x8xf32>
    %18 = arith.addf %16, %17 : vector<16x8xf32>
    %cst_13 = arith.constant 1.000000e-01 : f32
    %19 = vector.broadcast %cst_13 : f32 to vector<16x8xf32>
    %20 = arith.mulf %19, %18 : vector<16x8xf32>
    %21 = arith.maximumf %18, %20 : vector<16x8xf32>
    %cst_14 = arith.constant 0.000000e+00 : f32
    %22 = vector.broadcast %cst_14 : f32 to vector<16x8xf32>
    %23 = arith.select %12, %21, %22 : vector<16x8xf32>
    %c1_i32 = arith.constant 1 : i32
    %24 = arith.cmpi slt, %arg1, %c1_i32 : i32
    %c0_15 = arith.constant 0 : index
    %c0_16 = arith.constant 0 : index
    %c0_17 = arith.constant 0 : index
    %c0_18 = arith.constant 0 : index
    %25 = vector.load %arg4[%c0_15, %c0_16, %c0_17, %c0_18] : memref<1x1x16x16xf32, #tpu.memory_space<vmem>>, vector<1x1x16x16xf32>
    %26 = vector.shape_cast %25 : vector<1x1x16x16xf32> to vector<16x16xf32>
    %27 = arith.truncf %26 : vector<16x16xf32> to vector<16x16xbf16>
    %cst_19 = arith.constant dense<0.000000e+00> : vector<16x8xf32>
    %28 = tpu.matmul %27, %0, %cst_19 {dimension_numbers = #tpu.dot_dimension_numbers<[1], [0], [0], [1], [0, 0, 1, 1], [], []>} : vector<16x16xbf16>, vector<16x8xbf16>, vector<16x8xf32> -> vector<16x8xf32>
    %29 = vector.broadcast %1 : vector<1x8xf32> to vector<16x8xf32>
    %30 = arith.addf %28, %29 : vector<16x8xf32>
    %cst_20 = arith.constant 1.000000e-01 : f32
    %31 = vector.broadcast %cst_20 : f32 to vector<16x8xf32>
    %32 = arith.mulf %31, %30 : vector<16x8xf32>
    %33 = arith.maximumf %30, %32 : vector<16x8xf32>
    %cst_21 = arith.constant 0.000000e+00 : f32
    %34 = vector.broadcast %cst_21 : f32 to vector<16x8xf32>
    %35 = arith.select %24, %33, %34 : vector<16x8xf32>
    %36 = tpu.concatenate %23, %11, %35 in 0 : vector<16x8xf32>, vector<128x8xf32>, vector<16x8xf32> -> vector<160x8xf32>
    %37 = tpu.iota {dimensions = array<i32: 0>} : vector<160x1xi32>
    %c16_i32 = arith.constant 16 : i32
    %c0_i32_22 = arith.constant 0 : i32
    %38 = arith.cmpi eq, %c16_i32, %c0_i32_22 : i32
    %c1_i32_23 = arith.constant 1 : i32
    %39 = arith.select %38, %c1_i32_23, %c16_i32 : i32
    %40 = vector.broadcast %39 : i32 to vector<160x1xi32>
    %41 = arith.remsi %37, %40 : vector<160x1xi32>
    %c0_i32_24 = arith.constant 0 : i32
    %42 = vector.broadcast %c0_i32_24 : i32 to vector<160x1xi32>
    %43 = arith.cmpi ne, %41, %42 : vector<160x1xi32>
    %c0_i32_25 = arith.constant 0 : i32
    %44 = vector.broadcast %c0_i32_25 : i32 to vector<160x1xi32>
    %45 = arith.cmpi slt, %41, %44 : vector<160x1xi32>
    %c0_i32_26 = arith.constant 0 : i32
    %46 = arith.cmpi slt, %39, %c0_i32_26 : i32
    %47 = vector.broadcast %46 : i1 to vector<160x1xi1>
    %48 = vector.broadcast %47 : vector<160x1xi1> to vector<160x1xi1>
    %49 = arith.xori %45, %48 : vector<160x1xi1>
    %50 = arith.andi %49, %43 : vector<160x1xi1>
    %51 = vector.broadcast %39 : i32 to vector<160x1xi32>
    %52 = arith.addi %41, %51 : vector<160x1xi32>
    %53 = arith.select %50, %52, %41 : vector<160x1xi1>, vector<160x1xi32>
    %c1_i32_27 = arith.constant 1 : i32
    %54 = vector.broadcast %c1_i32_27 : i32 to vector<160x1xi32>
    %55 = arith.cmpi sge, %53, %54 : vector<160x1xi32>
    %c1_i32_28 = arith.constant 1 : i32
    %56 = tpu.dynamic_rotate %36 by %c1_i32_28 dim 0 : vector<160x8xf32>, i32 -> vector<160x8xf32>
    %cst_29 = arith.constant 0.000000e+00 : f32
    %57 = vector.shape_cast %55 : vector<160x1xi1> to vector<160x1xi1>
    %58 = vector.broadcast %57 : vector<160x1xi1> to vector<160x8xi1>
    %59 = vector.broadcast %cst_29 : f32 to vector<160x8xf32>
    %60 = arith.select %58, %56, %59 : vector<160x8xi1>, vector<160x8xf32>
    %c15_i32 = arith.constant 15 : i32
    %61 = vector.broadcast %c15_i32 : i32 to vector<160x1xi32>
    %62 = arith.cmpi slt, %53, %61 : vector<160x1xi32>
    %c159_i32 = arith.constant 159 : i32
    %63 = tpu.dynamic_rotate %36 by %c159_i32 dim 0 : vector<160x8xf32>, i32 -> vector<160x8xf32>
    %cst_30 = arith.constant 0.000000e+00 : f32
    %64 = vector.shape_cast %62 : vector<160x1xi1> to vector<160x1xi1>
    %65 = vector.broadcast %64 : vector<160x1xi1> to vector<160x8xi1>
    %66 = vector.broadcast %cst_30 : f32 to vector<160x8xf32>
    %67 = arith.select %65, %63, %66 : vector<160x8xi1>, vector<160x8xf32>
    %68 = vector.extract_strided_slice %60 {offsets = [0, 0], sizes = [128, 8], strides = [1, 1]} : vector<160x8xf32> to vector<128x8xf32>
    %69 = vector.extract_strided_slice %60 {offsets = [16, 0], sizes = [128, 8], strides = [1, 1]} : vector<160x8xf32> to vector<128x8xf32>
    %70 = vector.extract_strided_slice %60 {offsets = [32, 0], sizes = [128, 8], strides = [1, 1]} : vector<160x8xf32> to vector<128x8xf32>
    %71 = tpu.concatenate %68, %69, %70 in 1 : vector<128x8xf32>, vector<128x8xf32>, vector<128x8xf32> -> vector<128x24xf32>
    %72 = arith.truncf %71 : vector<128x24xf32> to vector<128x24xbf16>
    %c0_31 = arith.constant 0 : index
    %c0_32 = arith.constant 0 : index
    %c0_33 = arith.constant 0 : index
    %73 = vector.load %arg7[%c0_31, %c0_32, %c0_33] : memref<3x24x16xbf16, #tpu.memory_space<vmem>>, vector<1x24x16xbf16>
    %74 = vector.shape_cast %73 : vector<1x24x16xbf16> to vector<24x16xbf16>
    %cst_34 = arith.constant dense<0.000000e+00> : vector<128x16xf32>
    %75 = tpu.matmul %72, %74, %cst_34 {dimension_numbers = #tpu.dot_dimension_numbers<[1], [0], [0], [1], [0, 0, 1, 1], [], []>} : vector<128x24xbf16>, vector<24x16xbf16>, vector<128x16xf32> -> vector<128x16xf32>
    %76 = vector.extract_strided_slice %36 {offsets = [0, 0], sizes = [128, 8], strides = [1, 1]} : vector<160x8xf32> to vector<128x8xf32>
    %77 = vector.extract_strided_slice %36 {offsets = [16, 0], sizes = [128, 8], strides = [1, 1]} : vector<160x8xf32> to vector<128x8xf32>
    %78 = vector.extract_strided_slice %36 {offsets = [32, 0], sizes = [128, 8], strides = [1, 1]} : vector<160x8xf32> to vector<128x8xf32>
    %79 = tpu.concatenate %76, %77, %78 in 1 : vector<128x8xf32>, vector<128x8xf32>, vector<128x8xf32> -> vector<128x24xf32>
    %80 = arith.truncf %79 : vector<128x24xf32> to vector<128x24xbf16>
    %c1 = arith.constant 1 : index
    %c0_35 = arith.constant 0 : index
    %c0_36 = arith.constant 0 : index
    %81 = vector.load %arg7[%c1, %c0_35, %c0_36] : memref<3x24x16xbf16, #tpu.memory_space<vmem>>, vector<1x24x16xbf16>
    %82 = vector.shape_cast %81 : vector<1x24x16xbf16> to vector<24x16xbf16>
    %cst_37 = arith.constant dense<0.000000e+00> : vector<128x16xf32>
    %83 = tpu.matmul %80, %82, %cst_37 {dimension_numbers = #tpu.dot_dimension_numbers<[1], [0], [0], [1], [0, 0, 1, 1], [], []>} : vector<128x24xbf16>, vector<24x16xbf16>, vector<128x16xf32> -> vector<128x16xf32>
    %84 = arith.addf %75, %83 : vector<128x16xf32>
    %85 = vector.extract_strided_slice %67 {offsets = [0, 0], sizes = [128, 8], strides = [1, 1]} : vector<160x8xf32> to vector<128x8xf32>
    %86 = vector.extract_strided_slice %67 {offsets = [16, 0], sizes = [128, 8], strides = [1, 1]} : vector<160x8xf32> to vector<128x8xf32>
    %87 = vector.extract_strided_slice %67 {offsets = [32, 0], sizes = [128, 8], strides = [1, 1]} : vector<160x8xf32> to vector<128x8xf32>
    %88 = tpu.concatenate %85, %86, %87 in 1 : vector<128x8xf32>, vector<128x8xf32>, vector<128x8xf32> -> vector<128x24xf32>
    %89 = arith.truncf %88 : vector<128x24xf32> to vector<128x24xbf16>
    %c2 = arith.constant 2 : index
    %c0_38 = arith.constant 0 : index
    %c0_39 = arith.constant 0 : index
    %90 = vector.load %arg7[%c2, %c0_38, %c0_39] : memref<3x24x16xbf16, #tpu.memory_space<vmem>>, vector<1x24x16xbf16>
    %91 = vector.shape_cast %90 : vector<1x24x16xbf16> to vector<24x16xbf16>
    %cst_40 = arith.constant dense<0.000000e+00> : vector<128x16xf32>
    %92 = tpu.matmul %89, %91, %cst_40 {dimension_numbers = #tpu.dot_dimension_numbers<[1], [0], [0], [1], [0, 0, 1, 1], [], []>} : vector<128x24xbf16>, vector<24x16xbf16>, vector<128x16xf32> -> vector<128x16xf32>
    %93 = arith.addf %84, %92 : vector<128x16xf32>
    %c0_41 = arith.constant 0 : index
    %c0_42 = arith.constant 0 : index
    %94 = vector.load %arg8[%c0_41, %c0_42] : memref<1x16xf32, #tpu.memory_space<vmem>>, vector<1x16xf32>
    %95 = vector.broadcast %94 : vector<1x16xf32> to vector<128x16xf32>
    %96 = arith.addf %93, %95 : vector<128x16xf32>
    %cst_43 = arith.constant 1.000000e-01 : f32
    %97 = vector.broadcast %cst_43 : f32 to vector<128x16xf32>
    %98 = arith.mulf %97, %96 : vector<128x16xf32>
    %99 = arith.maximumf %96, %98 : vector<128x16xf32>
    %100 = arith.addf %4, %99 : vector<128x16xf32>
    %101 = vector.shape_cast %100 : vector<128x16xf32> to vector<8x16x16xf32>
    %c0_44 = arith.constant 0 : index
    %c0_45 = arith.constant 0 : index
    %c0_46 = arith.constant 0 : index
    %c0_47 = arith.constant 0 : index
    %102 = vector.load %arg9[%c0_44, %c0_45, %c0_46, %c0_47] : memref<1x8x16x16xf32, #tpu.memory_space<vmem>>, vector<1x8x16x16xf32>
    %103 = vector.shape_cast %102 : vector<1x8x16x16xf32> to vector<8x16x16xf32>
    %104 = vector.shape_cast %101 : vector<8x16x16xf32> to vector<1x8x16x16xf32>
    tpu.vector_store %arg9[%c0_44, %c0_45, %c0_46, %c0_47], %104 {strides = array<i32>} : memref<1x8x16x16xf32, #tpu.memory_space<vmem>>, vector<1x8x16x16xf32>,
    return
  }
  func.func @transform_0(%arg0: i32, %arg1: i32) -> (i32, i32, i32, i32) {
    %c8_i32 = arith.constant 8 : i32
    %0 = arith.muli %arg1, %c8_i32 : i32
    %c1_i32 = arith.constant 1 : i32
    %1 = arith.subi %0, %c1_i32 : i32
    %c0_i32 = arith.constant 0 : i32
    %2 = arith.maxsi %1, %c0_i32 : i32
    %c0_i32_0 = arith.constant 0 : i32
    %c0_i32_1 = arith.constant 0 : i32
    %c0_i32_2 = arith.constant 0 : i32
    return %arg0, %2, %c0_i32_0, %c0_i32_1 : i32, i32, i32, i32
  }
  func.func @transform_1(%arg0: i32, %arg1: i32) -> (i32, i32, i32, i32) {
    %c0_i32 = arith.constant 0 : i32
    %c0_i32_0 = arith.constant 0 : i32
    %c0_i32_1 = arith.constant 0 : i32
    return %arg0, %arg1, %c0_i32, %c0_i32_0 : i32, i32, i32, i32
  }
  func.func @transform_2(%arg0: i32, %arg1: i32) -> (i32, i32, i32, i32) {
    %c8_i32 = arith.constant 8 : i32
    %0 = arith.muli %arg1, %c8_i32 : i32
    %c8_i32_0 = arith.constant 8 : i32
    %1 = arith.addi %0, %c8_i32_0 : i32
    %c15_i32 = arith.constant 15 : i32
    %2 = arith.minsi %1, %c15_i32 : i32
    %c0_i32 = arith.constant 0 : i32
    %c0_i32_1 = arith.constant 0 : i32
    %c0_i32_2 = arith.constant 0 : i32
    return %arg0, %2, %c0_i32, %c0_i32_1 : i32, i32, i32, i32
  }
  func.func @transform_3(%arg0: i32, %arg1: i32) -> (i32, i32) {
    %c0_i32 = arith.constant 0 : i32
    %c0_i32_0 = arith.constant 0 : i32
    %c0_i32_1 = arith.constant 0 : i32
    return %c0_i32, %c0_i32_0 : i32, i32
  }
  func.func @transform_4(%arg0: i32, %arg1: i32) -> (i32, i32) {
    %c0_i32 = arith.constant 0 : i32
    %c0_i32_0 = arith.constant 0 : i32
    %c0_i32_1 = arith.constant 0 : i32
    return %c0_i32, %c0_i32_0 : i32, i32
  }
  func.func @transform_5(%arg0: i32, %arg1: i32) -> (i32, i32, i32) {
    %c0_i32 = arith.constant 0 : i32
    %c0_i32_0 = arith.constant 0 : i32
    %c0_i32_1 = arith.constant 0 : i32
    %c0_i32_2 = arith.constant 0 : i32
    return %c0_i32, %c0_i32_0, %c0_i32_1 : i32, i32, i32
  }
  func.func @transform_6(%arg0: i32, %arg1: i32) -> (i32, i32) {
    %c0_i32 = arith.constant 0 : i32
    %c0_i32_0 = arith.constant 0 : i32
    %c0_i32_1 = arith.constant 0 : i32
    return %c0_i32, %c0_i32_0 : i32, i32
  }
  func.func @transform_7(%arg0: i32, %arg1: i32) -> (i32, i32, i32, i32) {
    %c0_i32 = arith.constant 0 : i32
    %c0_i32_0 = arith.constant 0 : i32
    %c0_i32_1 = arith.constant 0 : i32
    return %arg0, %arg1, %c0_i32, %c0_i32_0 : i32, i32, i32, i32
  }
}

module attributes {stable_mosaic.version = 11 : i64} {
  func.func @resblock_kernel(%arg0: i32, %arg1: i32, %arg2: memref<1x1x16x16xf32, #tpu.memory_space<vmem>>, %arg3: memref<1x8x16x16xf32, #tpu.memory_space<vmem>>, %arg4: memref<1x1x16x16xf32, #tpu.memory_space<vmem>>, %arg5: memref<16x8xbf16, #tpu.memory_space<vmem>>, %arg6: memref<1x8xf32, #tpu.memory_space<vmem>>, %arg7: memref<3x24x16xbf16, #tpu.memory_space<vmem>>, %arg8: memref<1x16xf32, #tpu.memory_space<vmem>>, %arg9: memref<1x8x16x16xf32, #tpu.memory_space<vmem>>) attributes {dimension_semantics = [#tpu.dimension_semantics<parallel>, #tpu.dimension_semantics<parallel>], iteration_bounds = array<i64: 2, 2>, scalar_prefetch = 0 : i64, scratch_operands = 0 : i64, tpu.core_type = #tpu.core_type<tc>, window_params = [{transform_indices = @transform_0, window_bounds = array<i64: 1, 1, 16, 16>}, {transform_indices = @transform_1, window_bounds = array<i64: 1, 8, 16, 16>}, {transform_indices = @transform_2, window_bounds = array<i64: 1, 1, 16, 16>}, {pipeline_mode = #tpu.pipeline_mode<synchronous>, transform_indices = @transform_3, window_bounds = array<i64: 16, 8>}, {pipeline_mode = #tpu.pipeline_mode<synchronous>, transform_indices = @transform_4, window_bounds = array<i64: 1, 8>}, {pipeline_mode = #tpu.pipeline_mode<synchronous>, transform_indices = @transform_5, window_bounds = array<i64: 3, 24, 16>}, {pipeline_mode = #tpu.pipeline_mode<synchronous>, transform_indices = @transform_6, window_bounds = array<i64: 1, 16>}, {transform_indices = @transform_7, window_bounds = array<i64: 1, 8, 16, 16>}]} {
    %c0 = arith.constant 0 : index
    %c0_0 = arith.constant 0 : index
    %0 = vector.load %arg5[%c0, %c0_0] : memref<16x8xbf16, #tpu.memory_space<vmem>>, vector<16x8xbf16>
    %c0_1 = arith.constant 0 : index
    %c0_2 = arith.constant 0 : index
    %1 = vector.load %arg6[%c0_1, %c0_2] : memref<1x8xf32, #tpu.memory_space<vmem>>, vector<1x8xf32>
    %c0_3 = arith.constant 0 : index
    %c0_4 = arith.constant 0 : index
    %c0_5 = arith.constant 0 : index
    %c0_6 = arith.constant 0 : index
    %2 = vector.load %arg3[%c0_3, %c0_4, %c0_5, %c0_6] : memref<1x8x16x16xf32, #tpu.memory_space<vmem>>, vector<1x8x16x16xf32>
    %3 = vector.shape_cast %2 : vector<1x8x16x16xf32> to vector<8x16x16xf32>
    %4 = vector.shape_cast %3 : vector<8x16x16xf32> to vector<128x16xf32>
    %5 = arith.truncf %4 : vector<128x16xf32> to vector<128x16xbf16>
    %cst = arith.constant dense<0.000000e+00> : vector<128x8xf32>
    %6 = tpu.matmul %5, %0, %cst {dimension_numbers = #tpu.dot_dimension_numbers<[1], [0], [0], [1], [0, 0, 1, 1], [], []>} : vector<128x16xbf16>, vector<16x8xbf16>, vector<128x8xf32> -> vector<128x8xf32>
    %7 = vector.broadcast %1 : vector<1x8xf32> to vector<128x8xf32>
    %8 = arith.addf %6, %7 : vector<128x8xf32>
    %cst_7 = arith.constant 1.000000e-01 : f32
    %9 = vector.broadcast %cst_7 : f32 to vector<128x8xf32>
    %10 = arith.mulf %9, %8 : vector<128x8xf32>
    %11 = arith.maximumf %8, %10 : vector<128x8xf32>
    %c0_i32 = arith.constant 0 : i32
    %12 = arith.cmpi sgt, %arg1, %c0_i32 : i32
    %c0_8 = arith.constant 0 : index
    %c0_9 = arith.constant 0 : index
    %c0_10 = arith.constant 0 : index
    %c0_11 = arith.constant 0 : index
    %13 = vector.load %arg2[%c0_8, %c0_9, %c0_10, %c0_11] : memref<1x1x16x16xf32, #tpu.memory_space<vmem>>, vector<1x1x16x16xf32>
    %14 = vector.shape_cast %13 : vector<1x1x16x16xf32> to vector<16x16xf32>
    %15 = arith.truncf %14 : vector<16x16xf32> to vector<16x16xbf16>
    %cst_12 = arith.constant dense<0.000000e+00> : vector<16x8xf32>
    %16 = tpu.matmul %15, %0, %cst_12 {dimension_numbers = #tpu.dot_dimension_numbers<[1], [0], [0], [1], [0, 0, 1, 1], [], []>} : vector<16x16xbf16>, vector<16x8xbf16>, vector<16x8xf32> -> vector<16x8xf32>
    %17 = vector.broadcast %1 : vector<1x8xf32> to vector<16x8xf32>
    %18 = arith.addf %16, %17 : vector<16x8xf32>
    %cst_13 = arith.constant 1.000000e-01 : f32
    %19 = vector.broadcast %cst_13 : f32 to vector<16x8xf32>
    %20 = arith.mulf %19, %18 : vector<16x8xf32>
    %21 = arith.maximumf %18, %20 : vector<16x8xf32>
    %cst_14 = arith.constant 0.000000e+00 : f32
    %22 = vector.broadcast %cst_14 : f32 to vector<16x8xf32>
    %23 = arith.select %12, %21, %22 : vector<16x8xf32>
    %c1_i32 = arith.constant 1 : i32
    %24 = arith.cmpi slt, %arg1, %c1_i32 : i32
    %c0_15 = arith.constant 0 : index
    %c0_16 = arith.constant 0 : index
    %c0_17 = arith.constant 0 : index
    %c0_18 = arith.constant 0 : index
    %25 = vector.load %arg4[%c0_15, %c0_16, %c0_17, %c0_18] : memref<1x1x16x16xf32, #tpu.memory_space<vmem>>, vector<1x1x16x16xf32>
    %26 = vector.shape_cast %25 : vector<1x1x16x16xf32> to vector<16x16xf32>
    %27 = arith.truncf %26 : vector<16x16xf32> to vector<16x16xbf16>
    %cst_19 = arith.constant dense<0.000000e+00> : vector<16x8xf32>
    %28 = tpu.matmul %27, %0, %cst_19 {dimension_numbers = #tpu.dot_dimension_numbers<[1], [0], [0], [1], [0, 0, 1, 1], [], []>} : vector<16x16xbf16>, vector<16x8xbf16>, vector<16x8xf32> -> vector<16x8xf32>
    %29 = vector.broadcast %1 : vector<1x8xf32> to vector<16x8xf32>
    %30 = arith.addf %28, %29 : vector<16x8xf32>
    %cst_20 = arith.constant 1.000000e-01 : f32
    %31 = vector.broadcast %cst_20 : f32 to vector<16x8xf32>
    %32 = arith.mulf %31, %30 : vector<16x8xf32>
    %33 = arith.maximumf %30, %32 : vector<16x8xf32>
    %cst_21 = arith.constant 0.000000e+00 : f32
    %34 = vector.broadcast %cst_21 : f32 to vector<16x8xf32>
    %35 = arith.select %24, %33, %34 : vector<16x8xf32>
    %36 = tpu.concatenate %23, %11, %35 in 0 : vector<16x8xf32>, vector<128x8xf32>, vector<16x8xf32> -> vector<160x8xf32>
    %37 = tpu.iota {dimensions = array<i32: 0>} : vector<160x1xi32>
    %c16_i32 = arith.constant 16 : i32
    %c0_i32_22 = arith.constant 0 : i32
    %38 = arith.cmpi eq, %c16_i32, %c0_i32_22 : i32
    %c1_i32_23 = arith.constant 1 : i32
    %39 = arith.select %38, %c1_i32_23, %c16_i32 : i32
    %40 = vector.broadcast %39 : i32 to vector<160x1xi32>
    %41 = arith.remsi %37, %40 : vector<160x1xi32>
    %c0_i32_24 = arith.constant 0 : i32
    %42 = vector.broadcast %c0_i32_24 : i32 to vector<160x1xi32>
    %43 = arith.cmpi ne, %41, %42 : vector<160x1xi32>
    %c0_i32_25 = arith.constant 0 : i32
    %44 = vector.broadcast %c0_i32_25 : i32 to vector<160x1xi32>
    %45 = arith.cmpi slt, %41, %44 : vector<160x1xi32>
    %c0_i32_26 = arith.constant 0 : i32
    %46 = arith.cmpi slt, %39, %c0_i32_26 : i32
    %47 = vector.broadcast %46 : i1 to vector<160x1xi1>
    %48 = vector.broadcast %47 : vector<160x1xi1> to vector<160x1xi1>
    %49 = arith.xori %45, %48 : vector<160x1xi1>
    %50 = arith.andi %49, %43 : vector<160x1xi1>
    %51 = vector.broadcast %39 : i32 to vector<160x1xi32>
    %52 = arith.addi %41, %51 : vector<160x1xi32>
    %53 = arith.select %50, %52, %41 : vector<160x1xi1>, vector<160x1xi32>
    %c1_i32_27 = arith.constant 1 : i32
    %54 = vector.broadcast %c1_i32_27 : i32 to vector<160x1xi32>
    %55 = arith.cmpi sge, %53, %54 : vector<160x1xi32>
    %c1_i32_28 = arith.constant 1 : i32
    %56 = tpu.dynamic_rotate %36 by %c1_i32_28 dim 0 : vector<160x8xf32>, i32 -> vector<160x8xf32>
    %cst_29 = arith.constant 0.000000e+00 : f32
    %57 = vector.shape_cast %55 : vector<160x1xi1> to vector<160x1xi1>
    %58 = vector.broadcast %57 : vector<160x1xi1> to vector<160x8xi1>
    %59 = vector.broadcast %cst_29 : f32 to vector<160x8xf32>
    %60 = arith.select %58, %56, %59 : vector<160x8xi1>, vector<160x8xf32>
    %c15_i32 = arith.constant 15 : i32
    %61 = vector.broadcast %c15_i32 : i32 to vector<160x1xi32>
    %62 = arith.cmpi slt, %53, %61 : vector<160x1xi32>
    %c159_i32 = arith.constant 159 : i32
    %63 = tpu.dynamic_rotate %36 by %c159_i32 dim 0 : vector<160x8xf32>, i32 -> vector<160x8xf32>
    %cst_30 = arith.constant 0.000000e+00 : f32
    %64 = vector.shape_cast %62 : vector<160x1xi1> to vector<160x1xi1>
    %65 = vector.broadcast %64 : vector<160x1xi1> to vector<160x8xi1>
    %66 = vector.broadcast %cst_30 : f32 to vector<160x8xf32>
    %67 = arith.select %65, %63, %66 : vector<160x8xi1>, vector<160x8xf32>
    %68 = vector.extract_strided_slice %60 {offsets = [0, 0], sizes = [128, 8], strides = [1, 1]} : vector<160x8xf32> to vector<128x8xf32>
    %69 = vector.extract_strided_slice %60 {offsets = [16, 0], sizes = [128, 8], strides = [1, 1]} : vector<160x8xf32> to vector<128x8xf32>
    %70 = vector.extract_strided_slice %60 {offsets = [32, 0], sizes = [128, 8], strides = [1, 1]} : vector<160x8xf32> to vector<128x8xf32>
    %71 = tpu.concatenate %68, %69, %70 in 1 : vector<128x8xf32>, vector<128x8xf32>, vector<128x8xf32> -> vector<128x24xf32>
    %72 = arith.truncf %71 : vector<128x24xf32> to vector<128x24xbf16>
    %c0_31 = arith.constant 0 : index
    %c0_32 = arith.constant 0 : index
    %c0_33 = arith.constant 0 : index
    %73 = vector.load %arg7[%c0_31, %c0_32, %c0_33] : memref<3x24x16xbf16, #tpu.memory_space<vmem>>, vector<1x24x16xbf16>
    %74 = vector.shape_cast %73 : vector<1x24x16xbf16> to vector<24x16xbf16>
    %cst_34 = arith.constant dense<0.000000e+00> : vector<128x16xf32>
    %75 = tpu.matmul %72, %74, %cst_34 {dimension_numbers = #tpu.dot_dimension_numbers<[1], [0], [0], [1], [0, 0, 1, 1], [], []>} : vector<128x24xbf16>, vector<24x16xbf16>, vector<128x16xf32> -> vector<128x16xf32>
    %76 = vector.extract_strided_slice %36 {offsets = [0, 0], sizes = [128, 8], strides = [1, 1]} : vector<160x8xf32> to vector<128x8xf32>
    %77 = vector.extract_strided_slice %36 {offsets = [16, 0], sizes = [128, 8], strides = [1, 1]} : vector<160x8xf32> to vector<128x8xf32>
    %78 = vector.extract_strided_slice %36 {offsets = [32, 0], sizes = [128, 8], strides = [1, 1]} : vector<160x8xf32> to vector<128x8xf32>
    %79 = tpu.concatenate %76, %77, %78 in 1 : vector<128x8xf32>, vector<128x8xf32>, vector<128x8xf32> -> vector<128x24xf32>
    %80 = arith.truncf %79 : vector<128x24xf32> to vector<128x24xbf16>
    %c1 = arith.constant 1 : index
    %c0_35 = arith.constant 0 : index
    %c0_36 = arith.constant 0 : index
    %81 = vector.load %arg7[%c1, %c0_35, %c0_36] : memref<3x24x16xbf16, #tpu.memory_space<vmem>>, vector<1x24x16xbf16>
    %82 = vector.shape_cast %81 : vector<1x24x16xbf16> to vector<24x16xbf16>
    %cst_37 = arith.constant dense<0.000000e+00> : vector<128x16xf32>
    %83 = tpu.matmul %80, %82, %cst_37 {dimension_numbers = #tpu.dot_dimension_numbers<[1], [0], [0], [1], [0, 0, 1, 1], [], []>} : vector<128x24xbf16>, vector<24x16xbf16>, vector<128x16xf32> -> vector<128x16xf32>
    %84 = arith.addf %75, %83 : vector<128x16xf32>
    %85 = vector.extract_strided_slice %67 {offsets = [0, 0], sizes = [128, 8], strides = [1, 1]} : vector<160x8xf32> to vector<128x8xf32>
    %86 = vector.extract_strided_slice %67 {offsets = [16, 0], sizes = [128, 8], strides = [1, 1]} : vector<160x8xf32> to vector<128x8xf32>
    %87 = vector.extract_strided_slice %67 {offsets = [32, 0], sizes = [128, 8], strides = [1, 1]} : vector<160x8xf32> to vector<128x8xf32>
    %88 = tpu.concatenate %85, %86, %87 in 1 : vector<128x8xf32>, vector<128x8xf32>, vector<128x8xf32> -> vector<128x24xf32>
    %89 = arith.truncf %88 : vector<128x24xf32> to vector<128x24xbf16>
    %c2 = arith.constant 2 : index
    %c0_38 = arith.constant 0 : index
    %c0_39 = arith.constant 0 : index
    %90 = vector.load %arg7[%c2, %c0_38, %c0_39] : memref<3x24x16xbf16, #tpu.memory_space<vmem>>, vector<1x24x16xbf16>
    %91 = vector.shape_cast %90 : vector<1x24x16xbf16> to vector<24x16xbf16>
    %cst_40 = arith.constant dense<0.000000e+00> : vector<128x16xf32>
    %92 = tpu.matmul %89, %91, %cst_40 {dimension_numbers = #tpu.dot_dimension_numbers<[1], [0], [0], [1], [0, 0, 1, 1], [], []>} : vector<128x24xbf16>, vector<24x16xbf16>, vector<128x16xf32> -> vector<128x16xf32>
    %93 = arith.addf %84, %92 : vector<128x16xf32>
    %c0_41 = arith.constant 0 : index
    %c0_42 = arith.constant 0 : index
    %94 = vector.load %arg8[%c0_41, %c0_42] : memref<1x16xf32, #tpu.memory_space<vmem>>, vector<1x16xf32>
    %95 = vector.broadcast %94 : vector<1x16xf32> to vector<128x16xf32>
    %96 = arith.addf %93, %95 : vector<128x16xf32>
    %cst_43 = arith.constant 1.000000e-01 : f32
    %97 = vector.broadcast %cst_43 : f32 to vector<128x16xf32>
    %98 = arith.mulf %97, %96 : vector<128x16xf32>
    %99 = arith.maximumf %96, %98 : vector<128x16xf32>
    %100 = arith.addf %4, %99 : vector<128x16xf32>
    %101 = vector.shape_cast %100 : vector<128x16xf32> to vector<8x16x16xf32>
    %c0_44 = arith.constant 0 : index
    %c0_45 = arith.constant 0 : index
    %c0_46 = arith.constant 0 : index
    %c0_47 = arith.constant 0 : index
    %102 = vector.load %arg9[%c0_44, %c0_45, %c0_46, %c0_47] : memref<1x8x16x16xf32, #tpu.memory_space<vmem>>, vector<1x8x16x16xf32>
    %103 = vector.shape_cast %102 : vector<1x8x16x16xf32> to vector<8x16x16xf32>
    %104 = vector.shape_cast %101 : vector<8x16x16xf32> to vector<1x8x16x16xf32>
    tpu.vector_store %arg9[%c0_44, %c0_45, %c0_46, %c0_47], %104 {strides = array<i32>} : memref<1x8x16x16xf32, #tpu.memory_space<vmem>>, vector<1x8x16x16xf32>,
    return
  }
  func.func @transform_0(%arg0: i32, %arg1: i32) -> (i32, i32, i32, i32) {
    %c8_i32 = arith.constant 8 : i32
    %0 = arith.muli %arg1, %c8_i32 : i32
    %c1_i32 = arith.constant 1 : i32
    %1 = arith.subi %0, %c1_i32 : i32
    %c0_i32 = arith.constant 0 : i32
    %2 = arith.maxsi %1, %c0_i32 : i32
    %c0_i32_0 = arith.constant 0 : i32
    %c0_i32_1 = arith.constant 0 : i32
    %c0_i32_2 = arith.constant 0 : i32
    return %arg0, %2, %c0_i32_0, %c0_i32_1 : i32, i32, i32, i32
  }
  func.func @transform_1(%arg0: i32, %arg1: i32) -> (i32, i32, i32, i32) {
    %c0_i32 = arith.constant 0 : i32
    %c0_i32_0 = arith.constant 0 : i32
    %c0_i32_1 = arith.constant 0 : i32
    return %arg0, %arg1, %c0_i32, %c0_i32_0 : i32, i32, i32, i32
  }
  func.func @transform_2(%arg0: i32, %arg1: i32) -> (i32, i32, i32, i32) {
    %c8_i32 = arith.constant 8 : i32
    %0 = arith.muli %arg1, %c8_i32 : i32
    %c8_i32_0 = arith.constant 8 : i32
    %1 = arith.addi %0, %c8_i32_0 : i32
    %c15_i32 = arith.constant 15 : i32
    %2 = arith.minsi %1, %c15_i32 : i32
    %c0_i32 = arith.constant 0 : i32
    %c0_i32_1 = arith.constant 0 : i32
    %c0_i32_2 = arith.constant 0 : i32
    return %arg0, %2, %c0_i32, %c0_i32_1 : i32, i32, i32, i32
  }
  func.func @transform_3(%arg0: i32, %arg1: i32) -> (i32, i32) {
    %c0_i32 = arith.constant 0 : i32
    %c0_i32_0 = arith.constant 0 : i32
    %c0_i32_1 = arith.constant 0 : i32
    return %c0_i32, %c0_i32_0 : i32, i32
  }
  func.func @transform_4(%arg0: i32, %arg1: i32) -> (i32, i32) {
    %c0_i32 = arith.constant 0 : i32
    %c0_i32_0 = arith.constant 0 : i32
    %c0_i32_1 = arith.constant 0 : i32
    return %c0_i32, %c0_i32_0 : i32, i32
  }
  func.func @transform_5(%arg0: i32, %arg1: i32) -> (i32, i32, i32) {
    %c0_i32 = arith.constant 0 : i32
    %c0_i32_0 = arith.constant 0 : i32
    %c0_i32_1 = arith.constant 0 : i32
    %c0_i32_2 = arith.constant 0 : i32
    return %c0_i32, %c0_i32_0, %c0_i32_1 : i32, i32, i32
  }
  func.func @transform_6(%arg0: i32, %arg1: i32) -> (i32, i32) {
    %c0_i32 = arith.constant 0 : i32
    %c0_i32_0 = arith.constant 0 : i32
    %c0_i32_1 = arith.constant 0 : i32
    return %c0_i32, %c0_i32_0 : i32, i32
  }
  func.func @transform_7(%arg0: i32, %arg1: i32) -> (i32, i32, i32, i32) {
    %c0_i32 = arith.constant 0 : i32
    %c0_i32_0 = arith.constant 0 : i32
    %c0_i32_1 = arith.constant 0 : i32
    return %arg0, %arg1, %c0_i32, %c0_i32_0 : i32, i32, i32, i32
  }
}

</mosaic_0001>

<bundles_post_ra>
// kernel: tpu_custom_call.1
= control target key start
LH: loop header
LB: loop body
LE: loop exit
PB: predicated region body
PF: predicated region fallthrough
CT: control target
= control target key end

     0   :  { %s4778_s0 = inlined_call_operand.hbm [shape: f32[2,16,16,16], index: 0, kind: input, shape index: {}]   ;;  %s4779_s1 = inlined_call_operand.hbm [shape: f32[2,16,16,16], index: 1, kind: input, shape index: {}]   ;;  %s4780_s2 = inlined_call_operand.hbm [shape: f32[2,16,16,16], index: 2, kind: input, shape index: {}]   ;;  %s4781_s3 = inlined_call_operand.vmem [shape: bf16[16,8], index: 3, kind: input, shape index: {}]   ;;  %s4782_s4 = inlined_call_operand.vmem [shape: f32[1,8], index: 4, kind: input, shape index: {}]   ;;  %s4783_s5 = inlined_call_operand.vmem [shape: bf16[3,24,16], index: 5, kind: input, shape index: {}]   ;;  %s4784_s6 = inlined_call_operand.vmem [shape: f32[1,16], index: 6, kind: input, shape index: {}]   ;;  %s4785_s7 = inlined_call_operand.hbm [shape: f32[2,16,16,16], index: 7, kind: output, shape index: {}]  }
   0x1   :  { %4842 = sst [smem:[#allocation46_spill]] %s4779_s1 }
   0x2   :  { %4843 = sst [smem:[#allocation47_spill]] %s4781_s3 }
   0x3   :  { %4844 = sst [smem:[#allocation48_spill]] %s4782_s4 }
   0x4   :  { %4845 = sst [smem:[#allocation49_spill]] %s4783_s5 }
   0x5   :  { %4846 = sst [smem:[#allocation50_spill]] %s4784_s6 }
   0x6   :  { %4847 = sst [smem:[#allocation51_spill]] %s4785_s7 }
   0x7   :  { %12 = vsyncpa [#allocation3], 0 }
   0x8   :  { %14 = vsyncpa [#allocation3 + $0x1], 0 }
   0x9   :  { %15 = vsyncpa [#allocation6], 0 }
   0xa   :  { %17 = vsyncpa [#allocation6 + $0x1], 0 }
   0xb   :  { %18 = vsyncpa [#allocation4], 0 }
   0xc   :  { %20 = vsyncpa [#allocation4 + $0x1], 0  ;;  %s3340_s24 = smov 0   ;;  %s3342_s25 = smov 0  }
   0xd   :  { %s3344_s26 = smov 0   ;;  %s3346_s27 = smov 0  }
   0xe   :  { %s3348_s28 = smov 0   ;;  %s3350_s29 = smov 0  }
   0xf   :  { %s3352_s30 = smov 0   ;;  %s3354_s8 = smov 0  }
  0x10   :  { %s3356_s9 = smov 0   ;;  %s3358_s10 = smov 0  }
  0x11   :  { %s3360_s11 = smov 0   ;;  %s3362_s12 = smov 0  }
  0x12   :  { %s3364_s13 = smov 0   ;;  %s3366_s14 = smov 0  }
  0x13 LB: > { %4848 = sst [smem:[#allocation13_spill]] %s3247_s27  ;;  %s3411_s15 = sadd.s32 4294967295, %s3287_s14   ;;  %s3287_s14 = sphi %s3366_s14, %s26_s14   ;;  %s3283_s13 = sphi %s3364_s13, %s5002_s13   ;;  %s3279_s12 = sphi %s3362_s12, %s5001_s12   ;;  %s3275_s11 = sphi %s3360_s11, %s5012_s11   ;;  %s3271_s10 = sphi %s3358_s10, %s5011_s10   ;;  %s3267_s9 = sphi %s3356_s9, %s5010_s9   ;;  %s3263_s8 = sphi %s3354_s8, %s5009_s8   ;;  %s3259_s30 = sphi %s3352_s30, %s5008_s30   ;;  %s3255_s29 = sphi %s3350_s29, %s5007_s29   ;;  %s3251_s28 = sphi %s3348_s28, %s5006_s28   ;;  %s3247_s27 = sphi %s3346_s27, %s4996_s27   ;;  %s3243_s26 = sphi %s3344_s26, %s5005_s26   ;;  %s3239_s25 = sphi %s3342_s25, %s5004_s25   ;;  %s3235_s24 = sphi %s3340_s24, %s5003_s24  }
  0x14   : > { %4849 = sst [smem:[#allocation14_spill]] %s3251_s28  ;;  %s2381_s16 = sadd.s32 4294967294, %s3287_s14  }
  0x15   : > { %4850 = sst [smem:[#allocation15_spill]] %s3263_s8  ;;  %s35_s17 = sadd.s32 1, %s3279_s12 }
  0x16   : > { %4851 = sst [smem:[#allocation16_spill]] %s3271_s10  ;;  %s38_s18 = sadd.s32 1, %s3283_s13 }
  0x17   : > { %4852 = sst [smem:[#allocation17_spill]] %s3275_s11  ;;  %p36_p0 = scmp.ge.s32.totalorder %s35_s17, 2 }
  0x18   : > { %4853 = sst [smem:[#allocation18_spill]] %s3279_s12  ;;  %p4796_p1 = scmp.eq.s32.totalorder %s3287_s14, 0 }
  0x19   : > { %4854 = sst [smem:[#allocation19_spill]] %s3283_s13  ;;  %p4795_p2 = scmp.eq.s32.totalorder %s3411_s15, 0 }
  0x1a   : > { %s5014_s17 = smov (%p36_p0, %s35_s17), 0  ;;  %s5016_s18 = smov (!%p36_p0, %s38_s18), %s3283_s13 }
  0x1b   : > { %4855 = sst [smem:[#allocation20_spill]] %s5014_s17  ;;  %p90_p3 = scmp.ne.s32.totalorder %s3255_s29, %s3251_s28 }
  0x1c   : > { %p96_p4 = scmp.ne.s32.totalorder %s3251_s28, %s3247_s27  ;;  %p242_p5 = scmp.eq.s32.totalorder %s3411_s15, 3 }
  0x1d   : > { %p3433_p6 = por %p90_p3, %p4796_p1  ;;  %p248_p7 = scmp.eq.s32.totalorder %s2381_s16, 3 }
  0x1e   : > { %p3439_p8 = por %p96_p4, %p4795_p2  ;;  %p3443_p9 = por %p242_p5, %p90_p3 }
  0x1f   : > { %p3447_p10 = por %p248_p7, %p96_p4  ;;  %p4794_p11 = scmp.lt.s32.totalorder %s3287_s14, 4 }
  0x20   : > { %s4857_s22 = scalar_select %p3439_p8, 1, 0 }
  0x21   : > { %s4859_s23 = scalar_select %p3443_p9, 1, 0 }
  0x22   : > { %4858 = sst [smem:[#allocation21_spill]] %s4857_s22  ;;  %s3453_s20 = sshll.u32 %s3283_s13, 5 }
  0x23   : > { %4860 = sst [smem:[#allocation22_spill]] %s4859_s23  ;;  %s307_s16 = sand.u32 1, %s3287_s14  }
  0x24   : > { %s4861_s19 = scalar_select %p3447_p10, 1, 0 }
  0x25   : > { %s309_s27 = sand.u32 1, %s3255_s29   ;;  %s2467_s11 = sshll.u32 %s3279_s12, 4 }
  0x26   : > { %4862 = sst [smem:[#allocation23_spill]] %s4861_s19  ;;  %s2396_s7 = sshll.u32 %s309_s27, 7 }
  0x27   : > { %s318_s6 = sadd.s32 %s2467_s11, %s3453_s20  ;;  %s311_s5 = scalar_lea.vmem [#allocation5], %s2396_s7 }
  0x28   : > { %s321_s4 = sshll.u32 %s311_s5, 4  ;;  %s2400_s10 = sshll.u32 %s318_s6, 7  ;;  %s3459_s4 = int_to_ptr.vmem [resolvable:$true] %s321_s4 }
  0x29   : > { %s4863_s1 = sld [smem:[#allocation46_spill]]  ;;  %p3470_p12 = pnand %p4794_p11, %p3433_p6 }
  0x2a   : > { %s3476_s5 = scalar_lea.sflag [#allocation6], %s307_s16 }
  0x2b   : > { %p3045_p4 = pneg %p3470_p12 }
  0x2f   : > { %s3464_s22 = scalar_lea.hbm %s4863_s1, %s2400_s10  ;;  %s3048_s10 = scalar_lea.hbm %s4863_s1, 8192 }
  0x30   : > { %s3043_s6 = scalar_lea.hbm %s3464_s22, 2048  ;;  %p3049_p6 = scmp.lt.u32.totalorder %s3464_s22, %s4863_s1 }
  0x31   : > { %p3044_p3 = scmp.ne.s32.totalorder %s3464_s22, %s3043_s6  ;;  %p3050_p11 = scmp.lt.u32.totalorder %s3048_s10, %s3043_s6 }
  0x32   : > { %p3052_p1 = scmp.lt.u32.totalorder %s3043_s6, %s3464_s22 }
  0x33   : > { %p3046_p5 = pnand %p3045_p4, %p3044_p3  ;;  %p3051_p2 = por %p3050_p11, %p3049_p6 }
  0x35   : > { %p3047_p7 = pneg %p3046_p5  ;;  %p3053_p13 = por %p3052_p1, %p3051_p2 }
  0x37   : > { %p3054_p0 = pnand %p3053_p13, %p3047_p7 }
  0x39   : > { %3057 = shalt.err (!%p3054_p0)
}
  0x3a   : > { %s3058_s23 = scalar_lea.vmem %s3459_s4, 2048  ;;  %s3289_s16 = smov [#allocation5]  }
  0x3b   : > { %p3059_p3 = scmp.ne.s32.totalorder %s3459_s4, %s3058_s23  ;;  %s3063_s3 = sshll.u32 %s3289_s16, 4  ;;  %s3064_s3 = int_to_ptr.vmem [resolvable:$false] %s3063_s3 }
  0x3c   : > { %s3065_s7 = scalar_lea.vmem %s3064_s3, 4096  ;;  %p3066_p9 = scmp.lt.s32.totalorder %s3459_s4, %s3064_s3 }
  0x3d   : > { %p3061_p5 = pnand %p3059_p3, %p3045_p4  ;;  %p3067_p11 = scmp.lt.s32.totalorder %s3065_s7, %s3058_s23 }
  0x3f   : > { %p3062_p10 = pneg %p3061_p5  ;;  %p3068_p6 = por %p3067_p11, %p3066_p9 }
  0x41   : > { %p3069_p1 = pnand %p3068_p6, %p3062_p10 }
  0x43   : > { %3072 = shalt.err (!%p3069_p1)
}
  0x44   : > { %s4798_s6 = smov 128   ;;  %s4800_s10 = smov 8  }
  0x45   : > { %2651 = dma.hbm_to_vmem [thread:$0]  (!%p3470_p12), %s3464_s22, 2048, %s3459_s4, %s3476_s5, %s4798_s6, %s4798_s6, %s4800_s10  }
  0x46   : > { %p4865_p2 = scmp.lt.s32.totalorder %s3287_s14, 5  ;;  %p4866_p9 = scmp.ge.s32.totalorder %s3287_s14, 1 }
  0x47   : > { %p40_p13 = scmp.ge.s32.totalorder %s5016_s18, 2  ;;  %s2382_s21 = sshll.u32 %s3279_s12, 3 }
  0x48   : > { %p3511_p10 = pnand %p4866_p9, %p4865_p2  ;;  %s2383_s23 = sadd.s32 4294967295, %s2382_s21 }
  0x49   : > { %s2384_s16 = sshll.u32 %s5014_s17, 3  ;;  %s5018_s18 = smov (%p40_p13, %s5016_s18), 0 }
  0x4a   : > { %s4867_s11 = scalar_select %p3511_p10, 1, 0 }
  0x4b   : > { %4869 = sst [smem:[#allocation25_spill]] %s5018_s18  ;;  %p44_p12 = scmp.gt.s32.totalorder %s2383_s23, 0 }
  0x4c   : > { %4868 = sst [smem:[#allocation24_spill]] %s4867_s11  ;;  %s2385_s4 = sadd.s32 4294967295, %s2384_s16 }
  0x4d   : > { %p48_p0 = scmp.gt.s32.totalorder %s2385_s4, 0  ;;  %s3523_s22 = ssub.s32 %s3283_s13, %s5018_s18 }
  0x4e   : > { %s5020_s23 = smov (!%p44_p12, %s2383_s23), 0  ;;  %s55_s27 = sadd.s32 1, %s3267_s9 }
  0x4f   : > { %s5022_s4 = smov (!%p48_p0, %s2385_s4), 0  ;;  %p62_p4 = scmp.ne.s32.totalorder %s3267_s9, %s3263_s8 }
  0x50   : > { %s51_s3 = ssub.s32 %s5020_s23, %s5022_s4  ;;  %p68_p7 = scmp.ne.s32.totalorder %s3263_s8, %s3259_s30 }
  0x51   : > { %s52_s7 = sor.u32 %s51_s3, %s3523_s22  ;;  %p4870_p3 = scmp.eq.s32.totalorder %s3287_s14, 0 }
  0x52   : > { %p53_p11 = scmp.eq.s32.totalorder %s52_s7, 0  ;;  %p4872_p6 = scmp.eq.s32.totalorder %s3411_s15, 0 }
  0x53   : > { %p3533_p5 = por %p4870_p3, %p62_p4  ;;  %s4875_s1 = ssub.s32 %s3279_s12, %s5014_s17 }
  0x54   : > { %p3539_p1 = por %p4872_p6, %p68_p7  ;;  %s80_s18 = sor.u32 %s4875_s1, %s3523_s22 }
  0x55   : > { %s3547_s13 = sadd.s32 8, %s2382_s21  ;;  %p81_p2 = scmp.eq.s32.totalorder %s80_s18, 0 }
  0x56   : > { %s4873_s10 = scalar_select %p3539_p1, 1, 0 }
  0x57   : > { %s3550_s30 = scalar_select %p53_p11, %s3267_s9, %s55_s27  }
  0x58   : > { %4874 = sst [smem:[#allocation26_spill]] %s4873_s10  ;;  %s3553_s4 = sadd.s32 8, %s2384_s16 }
  0x59   : > { %s280_s3 = sand.u32 1, %s3267_s9   ;;  %s4876_s7 = sadd.s32 1, %s3255_s29 }
  0x5a   : > { %s3559_s19 = scalar_select %p81_p2, %s3255_s29, %s4876_s7  }
  0x5b   : > { %s2390_s28 = sshll.u32 %s280_s3, 4  ;;  %s2393_s17 = sshll.u32 %s5020_s23, 1 }
  0x5c   : > { %s294_s1 = sadd.s32 %s3453_s20, %s2393_s17  ;;  %s284_s12 = scalar_lea.vmem [#allocation2], %s2390_s28 }
  0x5d   : > { %s2395_s21 = sshll.u32 %s294_s1, 7  ;;  %s297_s10 = sshll.u32 %s284_s12, 4  ;;  %s3568_s10 = int_to_ptr.vmem [resolvable:$true] %s297_s10 }
  0x5e   : > { %s3566_s27 = scalar_lea.hbm %s4778_s0, %s2395_s21  ;;  %p4877_p12 = scmp.lt.s32.totalorder %s3287_s14, 4 }
  0x5f   : > { %s3578_s28 = scalar_lea.sflag [#allocation3], %s280_s3  ;;  %s3073_s12 = scalar_lea.hbm %s3566_s27, 256 }
  0x60   : > { %p3574_p0 = pnand %p4877_p12, %p3533_p5  ;;  %p3074_p4 = scmp.ne.s32.totalorder %s3566_s27, %s3073_s12 }
  0x61   : > { %s3078_s6 = scalar_lea.hbm %s4778_s0, 8192  ;;  %p3079_p5 = scmp.lt.u32.totalorder %s3566_s27, %s4778_s0 }
  0x62   : > { %p3075_p7 = pneg %p3574_p0  ;;  %p3080_p6 = scmp.lt.u32.totalorder %s3078_s6, %s3073_s12 }
  0x63   : > { %p3082_p12 = scmp.lt.u32.totalorder %s3073_s12, %s3566_s27 }
  0x64   : > { %p3076_p3 = pnand %p3075_p7, %p3074_p4  ;;  %p3081_p2 = por %p3080_p6, %p3079_p5 }
  0x66   : > { %p3077_p11 = pneg %p3076_p3  ;;  %p3083_p13 = por %p3082_p12, %p3081_p2 }
  0x68   : > { %p3084_p9 = pnand %p3083_p13, %p3077_p11 }
  0x6a   : > { %3087 = shalt.err (!%p3084_p9)
}
  0x6b   : > { %s3088_s16 = scalar_lea.vmem %s3568_s10, 256  ;;  %s3292_s3 = smov [#allocation2]  }
  0x6c   : > { %p3089_p4 = scmp.ne.s32.totalorder %s3568_s10, %s3088_s16  ;;  %s3093_s7 = sshll.u32 %s3292_s3, 4  ;;  %s3094_s7 = int_to_ptr.vmem [resolvable:$false] %s3093_s7 }
  0x6d   : > { %s3095_s1 = scalar_lea.vmem %s3094_s7, 512  ;;  %p3096_p1 = scmp.lt.s32.totalorder %s3568_s10, %s3094_s7 }
  0x6e   : > { %p3091_p3 = pnand %p3089_p4, %p3075_p7  ;;  %p3097_p5 = scmp.lt.s32.totalorder %s3095_s1, %s3088_s16 }
  0x70   : > { %p3092_p8 = pneg %p3091_p3  ;;  %p3098_p6 = por %p3097_p5, %p3096_p1 }
  0x72   : > { %p3099_p2 = pnand %p3098_p6, %p3092_p8 }
  0x74   : > { %3102 = shalt.err (!%p3099_p2)
}
  0x75   : > { %s4879_s21 = smov 8   ;;  %s4880_s12 = smov 128  }
  0x76   : > { %2648 = dma.hbm_to_vmem [thread:$0]  (!%p3574_p0), %s3566_s27, 256, %s3568_s10, %s3578_s28, %s4880_s12, %s4880_s12, %s4879_s21  }
  0x77   : > { %p4881_p8 = scmp.lt.s32.totalorder %s3547_s13, 15  ;;  %p4882_p1 = scmp.lt.s32.totalorder %s3553_s4, 15 }
  0x78   : > { %s119_s18 = sadd.s32 1, %s3243_s26  ;;  %p126_p9 = scmp.ne.s32.totalorder %s3243_s26, %s3239_s25 }
  0x79   : > { %s5024_s13 = smov (!%p4881_p8, %s3547_s13), 15  ;;  %s5026_s4 = smov (!%p4882_p1, %s3553_s4), 15 }
  0x7a   : > { %s115_s8 = ssub.s32 %s5024_s13, %s5026_s4  ;;  %p132_p13 = scmp.ne.s32.totalorder %s3239_s25, %s3235_s24 }
  0x7b   : > { %s116_s17 = sor.u32 %s115_s8, %s3523_s22  ;;  %p4883_p7 = scmp.eq.s32.totalorder %s3287_s14, 0 }
  0x7c   : > { %p117_p12 = scmp.eq.s32.totalorder %s116_s17, 0  ;;  %p4885_p4 = scmp.eq.s32.totalorder %s3411_s15, 0 }
  0x7d   : > { %p3623_p11 = por %p126_p9, %p4883_p7  ;;  %s333_s27 = sand.u32 1, %s3243_s26  }
  0x7e   : > { %p3629_p3 = por %p132_p13, %p4885_p4  ;;  %s2403_s28 = sshll.u32 %s5024_s13, 1 }
  0x7f   : > { %s3635_s11 = scalar_select %p117_p12, %s3243_s26, %s119_s18  }
  0x80   : > { %s4886_s10 = scalar_select %p3629_p3, 1, 0 }
  0x81   : > { %s2401_s4 = sshll.u32 %s333_s27, 4  ;;  %s345_s23 = sadd.s32 %s2403_s28, %s3453_s20 }
  0x82   : > { %s2405_s24 = sshll.u32 %s345_s23, 7  ;;  %s335_s7 = scalar_lea.vmem [#allocation7], %s2401_s4 }
  0x83   : > { %s3641_s3 = scalar_lea.hbm %s4780_s2, %s2405_s24  ;;  %s348_s1 = sshll.u32 %s335_s7, 4  ;;  %s3643_s1 = int_to_ptr.vmem [resolvable:$true] %s348_s1 }
  0x84   : > { %p4887_p0 = scmp.lt.s32.totalorder %s3287_s14, 4  ;;  %s3103_s20 = scalar_lea.hbm %s3641_s3, 256 }
  0x85   : > { %p3104_p6 = scmp.ne.s32.totalorder %s3641_s3, %s3103_s20  ;;  %s3108_s17 = scalar_lea.hbm %s4780_s2, 8192 }
  0x86   : > { %p3649_p5 = pnand %p4887_p0, %p3623_p11  ;;  %p3109_p9 = scmp.lt.u32.totalorder %s3641_s3, %s4780_s2 }
  0x87   : > { %p3110_p13 = scmp.lt.u32.totalorder %s3108_s17, %s3103_s20  ;;  %p3112_p11 = scmp.lt.u32.totalorder %s3103_s20, %s3641_s3 }
  0x88   : > { %p3105_p2 = pneg %p3649_p5 }
  0x89   : > { %p3111_p7 = por %p3110_p13, %p3109_p9 }
  0x8a   : > { %p3106_p8 = pnand %p3105_p2, %p3104_p6 }
  0x8b   : > { %p3113_p12 = por %p3112_p11, %p3111_p7 }
  0x8c   : > { %p3107_p1 = pneg %p3106_p8 }
  0x8e   : > { %p3114_p4 = pnand %p3113_p12, %p3107_p1 }
  0x90   : > { %3117 = shalt.err (!%p3114_p4)
}
  0x91   : > { %s3118_s28 = scalar_lea.vmem %s3643_s1, 256  ;;  %s3293_s4 = smov [#allocation7]  }
  0x92   : > { %p3119_p0 = scmp.ne.s32.totalorder %s3643_s1, %s3118_s28  ;;  %s3123_s23 = sshll.u32 %s3293_s4, 4  ;;  %s3124_s23 = int_to_ptr.vmem [resolvable:$false] %s3123_s23 }
  0x93   : > { %s3125_s24 = scalar_lea.vmem %s3124_s23, 512  ;;  %p3126_p3 = scmp.lt.s32.totalorder %s3643_s1, %s3124_s23 }
  0x94   : > { %p3121_p6 = pnand %p3119_p0, %p3105_p2  ;;  %p3127_p9 = scmp.lt.s32.totalorder %s3125_s24, %s3118_s28 }
  0x96   : > { %p3122_p8 = pneg %p3121_p6  ;;  %p3128_p13 = por %p3127_p9, %p3126_p3 }
  0x98   : > { %p3129_p7 = pnand %p3128_p13, %p3122_p8 }
  0x9a   : > { %3132 = shalt.err (!%p3129_p7)
}
  0x9b   : > { %2654 = dma.hbm_to_vmem [thread:$0]  (!%p3649_p5), %s3641_s3, 256, %s3643_s1, %s3476_s5, %s4880_s12, %s4880_s12, %s4879_s21  }
  0x9c   : > { %360 = sbr.rel (%p3511_p10) target bundleno = 877 (0x36d), region = 48 }
  0xa3   : > { %s4890_s16 = sld [smem:[#allocation15_spill]]  ;;  %s4891_s7 = sld [smem:[#allocation26_spill]] }
  0xa9   : > { %s362_s20 = sand.u32 1, %s4890_s16   ;;  %p4892_p3 = scmp.ne.s32.totalorder %s4891_s7, 0 }
  0xaa   : > { %s3685_s18 = sshll.u32 %s362_s20, 4  ;;  %s363_s8 = scalar_lea.sflag [#allocation3], %s362_s20 }
  0xab   : > { %s366_s17 = scalar_lea.vmem [#allocation2], %s3685_s18 }
  0xac   : > { %3218 = dma.done.wait (%p4892_p3), %s363_s8, 256  }
  0xad   : > { %3220 = vsyncadd (%p4892_p3), %s363_s8, 4294967040  ;;  %s4893_s13 = sld [smem:[#allocation14_spill]]  ;;  %s4894_s5 = sld [smem:[#allocation21_spill]] }
  0xae   : > { %s371_s21 = sand.u32 1, %s3411_s15  }
  0xaf   : > { %s372_s1 = scalar_lea.sflag [#allocation6], %s371_s21 }
  0xb3   : > { %s373_s12 = sand.u32 1, %s4893_s13   ;;  %p4895_p10 = scmp.ne.s32.totalorder %s4894_s5, 0 }
  0xb4   : > { %s3696_s3 = sshll.u32 %s373_s12, 7 }
  0xb5   : > { %s3699_s6 = scalar_lea.vmem [#allocation5], %s3696_s3 }
  0xb6   : > { %3222 = dma.done.wait (%p4895_p10), %s372_s1, 2048  }
  0xb7   : > { %3224 = vsyncadd (%p4895_p10), %s372_s1, 4294965248  ;;  %s382_s27 = sand.u32 1, %s3239_s25   ;;  %p4896_p5 = scmp.ne.s32.totalorder %s4886_s10, 0 }
  0xb8   : > { %s2409_s28 = sshll.u32 %s382_s27, 4 }
  0xb9   : > { %s384_s4 = scalar_lea.vmem [#allocation7], %s2409_s28 }
  0xba   : > { %3226 = dma.done.wait (%p4896_p5), %s372_s1, 256  }
  0xbb   : > { %3228 = vsyncadd (%p4896_p5), %s372_s1, 4294967040  ;;  %v3294_v0 = vmov 0.0   ;;  %vm3295_vm0 = vmmov 0   ;;  %s4897_s24 = sld [smem:[#allocation47_spill]]  ;;  %v439_v2 = vld [vmem:[%s3699_s6] sm:$0xff]  ;;  %v440_v3 = vld [vmem:[%s3699_s6 + $0x8] sm:$0xff]  ;;  %v743_v32 = vlaneseq }
  0xbc   : > { %2536 = vmatprep.subr.bf16.mxu1 %v3294_v0  ;;  %2538 = vmatprep.mubr.msk.bf16.mxu1 %vm3295_vm0, %v3294_v0  ;;  %vm475_vm1 = vcmask 130048   ;;  %v441_v4 = vld [vmem:[%s3699_s6 + $0x10] sm:$0xff]  ;;  %v455_v5 = vpack.c.bf16 %v440_v3, %v439_v2  ;;  %v442_v6 = vld [vmem:[%s3699_s6 + $0x18] sm:$0xff]  ;;  %v443_v7 = vld [vmem:[%s3699_s6 + $0x20] sm:$0xff]  ;;  %s4898_s10 = sld [smem:[#allocation16_spill]]  ;;  %s4899_s7 = sld [smem:[#allocation48_spill]] }
  0xbd   : > { %v444_v8 = vld [vmem:[%s3699_s6 + $0x28] sm:$0xff]  ;;  %v456_v9 = vpack.c.bf16 %v442_v6, %v441_v4  ;;  %v445_v11 = vld [vmem:[%s3699_s6 + $0x30] sm:$0xff]  ;;  %v446_v12 = vld [vmem:[%s3699_s6 + $0x38] sm:$0xff]  ;;  %v3745_v33 = vshrl.u32 %v743_v32, 7  ;;  %s3296_s18 = smov 8   ;;  %s3297_s8 = smov 16  }
  0xbe   : > { %v457_v10 = vpack.c.bf16 %v444_v8, %v443_v7  ;;  %2514 = vmatprep.mubr.msk.bf16.mxu0 %vm475_vm1, %v455_v5  ;;  %v687_v13 = vld [vmem:[%s384_s4] sm:$0xff]  ;;  %v688_v14 = vld [vmem:[%s384_s4 + $0x8] sm:$0xff]  ;;  %v458_v18 = vpack.c.bf16 %v446_v12, %v445_v11  ;;  %s4929_s1 = sld [smem:[#allocation49_spill]]  ;;  %s4987_s5 = sld [smem:[#allocation50_spill]] }
  0xbf   : > { %v447_v15 = vld [vmem:[%s3699_s6 + $0x40] sm:$0xff]  ;;  %v448_v16 = vld [vmem:[%s3699_s6 + $0x48] sm:$0xff]  ;;  %v689_v17 = vpack.c.bf16 %v688_v14, %v687_v13  ;;  %v449_v20 = vld [vmem:[%s3699_s6 + $0x50] sm:$0xff]  ;;  %v748_v34 = vadd.s32 32, %v3745_v33  ;;  %v747_v35 = vadd.s32 24, %v3745_v33  ;;  %v750_v38 = vadd.s32 48, %v3745_v33 }
  0xc0   : > { %v459_v19 = vpack.c.bf16 %v448_v16, %v447_v15  ;;  %v450_v21 = vld [vmem:[%s3699_s6 + $0x58] sm:$0xff]  ;;  %v451_v22 = vld [vmem:[%s3699_s6 + $0x60] sm:$0xff]  ;;  %v452_v23 = vld [vmem:[%s3699_s6 + $0x68] sm:$0xff]  ;;  %v3757_v39 = vadd.s32 64, %v3745_v33  ;;  %v3760_v40 = vadd.s32 80, %v3745_v33  ;;  %vm1044_vm2 = vcmp.lt.s32.totalorder %v3745_v33, 1 }
  0xc1   : > { %v3020_v1 = vld [vmem:[%s4897_s24] sm:$0xff]   ;;  %v460_v24 = vpack.c.bf16 %v450_v21, %v449_v20  ;;  %v461_v25 = vpack.c.bf16 %v452_v23, %v451_v22  ;;  %v453_v26 = vld [vmem:[%s3699_s6 + $0x70] sm:$0xff]  ;;  %v454_v27 = vld [vmem:[%s3699_s6 + $0x78] sm:$0xff]  ;;  %v796_v37 = vand.u32 15, %v748_v34  ;;  %v789_v42 = vand.u32 15, %v747_v35  ;;  %s4629_s21 = scalar_lea.vmem [#allocation8], %s3696_s3 }
  0xc2   : > { %2512 = vmatprep.subr.bf16.mxu0 %v3020_v1  ;;  %2537 = vmatpush3.bf16.msra.mxu1 %v3020_v1  ;;  %v462_v28 = vpack.c.bf16 %v454_v27, %v453_v26  ;;  %v630_v29 = vld [vmem:[%s366_s17] sm:$0xff]  ;;  %v631_v30 = vld [vmem:[%s366_s17 + $0x8] sm:$0xff]  ;;  %p686_p2 = scmp.lt.s32.totalorder %s4898_s10, 1  ;;  %v3767_v45 = vadd.s32 96, %v3745_v33  ;;  %v3770_v46 = vadd.s32 40, %v3745_v33  ;;  %vm1165_vm4 = vcmp.lt.s32.totalorder %v3745_v33, 7 }
  0xc3   : > { %2513 = vmatpush3.bf16.msra.mxu0 %v3020_v1  ;;  %v632_v31 = vpack.c.bf16 %v631_v30, %v630_v29  ;;  %v3753_v36 = vld [vmem:[%s4899_s7] ss:$0 sm:$0xff]  ;;  %vm3773_vm3 = vcmp.ge.s32.totalorder %v796_v37, 1  ;;  %v810_v50 = vand.u32 15, %v750_v38  ;;  %v824_v55 = vand.u32 15, %v3757_v39  ;;  %p629_p1 = scmp.gt.s32.totalorder %s4898_s10, 0 }
  0xc4   : > { %2530 = vmatprep.subr.bf16.mxu0 %v3294_v0  ;;  %s3762_s20 = scalar_select %p686_p2, 1, 0  ;;  %v838_v56 = vand.u32 15, %v3760_v40  ;;  %vm3782_vm5 = vcmp.lt.s32.totalorder %v789_v42, 15  ;;  %v852_v2 = vand.u32 15, %v3767_v45  ;;  %v803_v3 = vand.u32 15, %v3770_v46 }
  0xc5   : > { %2539 = vmatmul.mubr.msk.bf16.vlgmr.msra.gmra.mrb[0].mxu1 %vm475_vm1, %v689_v17  ;;  %v3804_v11 = vadd.s32 112, %v3745_v33  ;;  %v3807_v12 = vadd.s32 144, %v3745_v33  ;;  %vm3813_vm7 = vcmp.ge.s32.totalorder %v810_v50, 1  ;;  %vm3845_vm8 = vcmp.ge.s32.totalorder %v824_v55, 1  ;;  %s3923_s17 = scalar_select %p629_p1, 1, 0 }
  0xc6   : > { %2515 = vmatmul.mubr.msk.bf16.vlgmr.msra.gmra.mrb[0].mxu0 %vm475_vm1, %v456_v9  ;;  %v739_v61 = vstv %s3762_s20  ;;  %vm3884_vm9 = vcmp.ge.s32.totalorder %v838_v56, 1  ;;  %vm3910_vm10 = vcmp.ge.s32.totalorder %v852_v2, 1  ;;  %vm4082_vm15 = vcmp.lt.s32.totalorder %v803_v3, 15  ;;  %s4988_s3 = sld [smem:[#allocation17_spill]]  ;;  %s2468_s27 = sshll.u32 %s4898_s10, 4 }
  0xc7   : > { %2531 = vmatpush3.bf16.msra.mxu0 %v3020_v1  ;;  %2518 = vmatprep.mubr.msk.bf16.mxu0 %vm475_vm1, %v457_v10  ;;  %vm3799_vm6 = vcmp.eq.s32.totalorder %v739_v61, 1  ;;  %v866_v49 = vand.u32 15, %v3804_v11  ;;  %s2241_s10 = sshll.u32 %s4629_s21, 4  ;;  %s4989_s23 = sld [smem:[#allocation22_spill]]  ;;  %s4685_s10 = int_to_ptr.vmem [resolvable:$true] %s2241_s10 }
  0xc8   : > { %s4990_s16 = sld [smem:[#allocation51_spill]]  ;;  %s4701_s20 = scalar_lea.sflag [#allocation4], %s373_s12 }
  0xc9   : > { %vm3961_vm11 = vcmp.ge.s32.totalorder %v866_v49, 1 }
  0xcc   : > { %s2463_s28 = sshll.u32 %s4988_s3, 5 }
  0xcd   : > { %s2238_s4 = sadd.s32 %s2468_s27, %s2463_s28  ;;  %p4991_p12 = scmp.ne.s32.totalorder %s4989_s23, 0 }
  0xce   : > { %2519 = vmatmul.mubr.msk.bf16.gmra.mrb[4].mxu0 %vm475_vm1, %v458_v18  ;;  %s2464_s15 = sshll.u32 %s2238_s4, 7 }
  0xcf   : > { %2522 = vmatprep.mubr.msk.bf16.mxu0 %vm475_vm1, %v459_v19  ;;  %s4693_s7 = scalar_lea.hbm %s4990_s16, %s2464_s15 }
  0xd6   : > { %2523 = vmatmul.mubr.msk.bf16.gmra.mrb[8].mxu0 %vm475_vm1, %v460_v24 }
  0xd7   : > { %2526 = vmatprep.mubr.msk.bf16.mxu0 %vm475_vm1, %v461_v25 }
  0xde   : > { %2527 = vmatmul.mubr.msk.bf16.gmra.mrb[12].mxu0 %vm475_vm1, %v462_v28 }
  0xdf   : > { %2532 = vmatprep.mubr.msk.bf16.mxu0 %vm3295_vm0, %v3294_v0 }
  0xe6   : > { %2533 = vmatmul.mubr.msk.bf16.vlgmr.msra.gmra.mrb[16].mxu0 %vm475_vm1, %v632_v31 }
 0x198   : > { %v727_v54 = vpop.f32.mrb[0].mxu1 }
 0x199   : > { %v2516_v41 = vpop.f32.mrb[0].mxu0  ;;  %v728_v60 = vadd.f32 %v3753_v36, %v727_v54  ;;  %v2540_v62 = vpop.f32.mrb[1].mxu1  ;;  %v894_v54 = vand.u32 15, %v3807_v12 }
 0x19a   : > { %v543_v43 = vadd.f32 %v2516_v41, %v3753_v36  ;;  %v534_v44 = vpop.f32.mrb[1].mxu0  ;;  %v730_v1 = vpop.f32.mrb[2].mxu1 }
 0x19b   : > { %v535_v47 = vadd.f32 %v3753_v36, %v534_v44  ;;  %v2517_v48 = vpop.f32.mrb[2].mxu0  ;;  %v734_v6 = vmul.f32 0.1, %v728_v60  ;;  %v3795_v7 = vadd.f32 %v3753_v36, %v730_v1  ;;  %v2541_v8 = vpop.f32.mrb[3].mxu1  ;;  %vm4003_vm12 = vcmp.ge.s32.totalorder %v894_v54, 1 }
 0x19c   : > { %v599_v51 = vmul.f32 0.1, %v543_v43  ;;  %v546_v52 = vadd.f32 %v2517_v48, %v3753_v36  ;;  %v537_v53 = vpop.f32.mrb[3].mxu0 }
 0x19d   : > { %v597_v57 = vmul.f32 0.1, %v535_v47  ;;  %v538_v58 = vadd.f32 %v3753_v36, %v537_v53  ;;  %v736_v18 = vmax.f32 %v728_v60, %v734_v6  ;;  %v735_v23 = vmul.f32 0.1, %v3795_v7 }
 0x19e   : > { %v3788_v63 = vmax.f32 %v543_v43, %v599_v51  ;;  %v600_v0 = vmul.f32 0.1, %v546_v52  ;;  %v3871_v53 = vadd.s32 128, %v3745_v33 }
 0x19f   : > { %v3792_v4 = vmax.f32 %v535_v47, %v597_v57  ;;  %v598_v5 = vmul.f32 0.1, %v538_v58  ;;  %v3833_v34 = vsel %vm3799_vm6, %v736_v18, 0.0  ;;  %v737_v60 = vmax.f32 %v3795_v7, %v735_v23 }
 0x1a0   : > { %v3797_v9 = vmax.f32 %v546_v52, %v600_v0  ;;  %v1028_v15 = vrot.slane %v3788_v63, 7  ;;  %v4818_v16 = vrot.slane %v3788_v63, 1 }
 0x1a1   : > { %v3809_v13 = vmax.f32 %v538_v58, %v598_v5  ;;  %v2520_v14 = vpop.f32.mrb[4].mxu0  ;;  %v4817_v22 = vrot.slane %v3792_v4, 1  ;;  %v1042_v5 = vrot.slane %v3833_v34, 7  ;;  %v3900_v11 = vsel %vm3799_vm6, %v737_v60, 0.0 }
 0x1a2   : > { %v559_v19 = vadd.f32 %v2520_v14, %v3753_v36  ;;  %v550_v20 = vpop.f32.mrb[5].mxu0  ;;  %v1029_v21 = vrot.slane %v3797_v9, 7 }
 0x1a3   : > { %v551_v24 = vadd.f32 %v3753_v36, %v550_v20  ;;  %v2521_v25 = vpop.f32.mrb[6].mxu0  ;;  %v2780_v26 = vpack.i.bf16 %v3809_v13, %v3792_v4  ;;  %v1027_v27 = vrot.slane %v3809_v13, 7  ;;  %v1148_v28 = vrot.slane %v3809_v13, 1 }
 0x1a4   : > { %v603_v29 = vmul.f32 0.1, %v559_v19  ;;  %v562_v30 = vadd.f32 %v2521_v25, %v3753_v36  ;;  %v553_v31 = vpop.f32.mrb[7].mxu0  ;;  %v3829_v32 = vsel %vm1044_vm2, %v1028_v15, %v1029_v21  ;;  %v4816_v20 = vrot.slane %v3900_v11, 7 }
 0x1a5   : > { %v601_v35 = vmul.f32 0.1, %v551_v24  ;;  %v554_v37 = vadd.f32 %v3753_v36, %v553_v31  ;;  %2781 = vrot.lane.b32.xlu0 %v2780_v26, %s3296_s18  ;;  %v1060_v38 = vsel %vm1044_vm2, %v1027_v27, %v1028_v15  ;;  %v1181_v39 = vsel %vm1165_vm4, %v1148_v28, %v4818_v16 }
 0x1a6   : > { %v3849_v42 = vmax.f32 %v559_v19, %v603_v29  ;;  %v604_v43 = vmul.f32 0.1, %v562_v30  ;;  %v3853_v44 = vsel %vm3773_vm3, %v1060_v38, 0.0  ;;  %v3859_v47 = vsel %vm1165_vm4, %v4817_v22, %v1148_v28 }
 0x1a7   : > { %v3861_v48 = vmax.f32 %v551_v24, %v601_v35  ;;  %v602_v50 = vmul.f32 0.1, %v554_v37  ;;  %v2790_v51 = vpack.i.bf16 %v3829_v32, %v3853_v44  ;;  %v3867_v52 = vsel %vm3782_vm5, %v1181_v39, 0.0 }
 0x1a8   : > { %4910 = vst [vmem:[#allocation27_spill] sm:$0xff] %v3849_v42  ;;  %v3874_v55 = vmax.f32 %v562_v30, %v604_v43  ;;  %v2795_v1 = vpack.i.bf16 %v3867_v52, %v3859_v47  ;;  %v1032_v6 = vrot.slane %v3849_v42, 7  ;;  %v880_v30 = vand.u32 15, %v3871_v53 }
 0x1a9   : > { %v3876_v57 = vmax.f32 %v554_v37, %v602_v50  ;;  %v2524_v58 = vpop.f32.mrb[8].mxu0  ;;  %2791 = vrot.lane.b32.xlu1 %v2790_v51, %s3297_s8  ;;  %2786 = vrot.lane.b32.xlu0 %v2790_v51, %s3296_s18  ;;  %v1030_v59 = vrot.slane %v3861_v48, 7  ;;  %v3947_v37 = vsel %vm1044_vm2, %v1042_v5, %v4816_v20  ;;  %v3950_v38 = vadd.s32 56, %v3745_v33 }
 0x1aa   : > { %v575_v62 = vadd.f32 %v2524_v58, %v3753_v36  ;;  %v566_v0 = vpop.f32.mrb[9].mxu0  ;;  %v1033_v17 = vrot.slane %v3874_v55, 7  ;;  %v682_v51 = vstv %s3923_s17  ;;  %vm4010_vm13 = vcmp.ge.s32.totalorder %v880_v30, 1  ;;  %s3298_s17 = smov [#allocation8]  }
 0x1ab   : > { %v567_v8 = vadd.f32 %v3753_v36, %v566_v0  ;;  %v2525_v7 = vpop.f32.mrb[10].mxu0  ;;  %v1031_v40 = vrot.slane %v3876_v57, 7  ;;  %v1058_v56 = vsel %vm1044_vm2, %v1029_v21, %v1030_v59  ;;  %v3970_v0 = vadd.s32 16, %v3745_v33 }
 0x1ac   : > { %v607_v14 = vmul.f32 0.1, %v575_v62  ;;  %v578_v15 = vadd.f32 %v2525_v7, %v3753_v36  ;;  %v569_v18 = vpop.f32.mrb[11].mxu0  ;;  %v3905_v19 = vsel %vm3813_vm7, %v1058_v56, 0.0  ;;  %v3957_v41 = vsel %vm1044_vm2, %v1032_v6, %v1033_v17 }
 0x1ad   : > { %v605_v21 = vmul.f32 0.1, %v567_v8  ;;  %v570_v10 = vadd.f32 %v3753_v36, %v569_v18  ;;  %2796 = vrot.lane.b32.xlu1 %v2795_v1, %s3296_s18  ;;  %v3918_v24 = vsel %vm1044_vm2, %v1030_v59, %v1031_v40  ;;  %v1056_v29 = vsel %vm1044_vm2, %v1031_v40, %v1032_v6 }
 0x1ae   : > { %v3925_v25 = vmax.f32 %v575_v62, %v607_v14  ;;  %v608_v45 = vmul.f32 0.1, %v578_v15  ;;  %v2805_v2 = vpack.i.bf16 %v3918_v24, %v3905_v19  ;;  %v3939_v35 = vsel %vm3845_vm8, %v1056_v29, 0.0 }
 0x1af   : > { %v3929_v26 = vmax.f32 %v567_v8, %v605_v21  ;;  %v606_v28 = vmul.f32 0.1, %v570_v10  ;;  %v2815_v60 = vpack.i.bf16 %v3957_v41, %v3939_v35  ;;  %v817_v23 = vand.u32 15, %v3950_v38 }
 0x1b0   : > { %4915 = vst [vmem:[#allocation28_spill] sm:$0xff] %v3925_v25  ;;  %v3934_v31 = vmax.f32 %v578_v15, %v608_v45  ;;  %2806 = vrot.lane.b32.xlu0 %v2805_v2, %s3296_s18  ;;  %v1036_v62 = vrot.slane %v3925_v25, 7  ;;  %vm4018_vm14 = vcmp.eq.s32.totalorder %v682_v51, 1 }
 0x1b1   : > { %4916 = vst [vmem:[#allocation29_spill] sm:$0xff] %v3929_v26  ;;  %v3952_v39 = vmax.f32 %v570_v10, %v606_v28  ;;  %v2528_v43 = vpop.f32.mrb[12].mxu0  ;;  %2801 = vrot.lane.b32.xlu1 %v2805_v2, %s3297_s8  ;;  %v1034_v50 = vrot.slane %v3929_v26, 7  ;;  %vm4089_vm3 = vcmp.lt.s32.totalorder %v817_v23, 15 }
 0x1b2   : > { %4917 = vst [vmem:[#allocation30_spill] sm:$0xff] %v3934_v31  ;;  %v591_v58 = vadd.f32 %v2528_v43, %v3753_v36  ;;  %v582_v59 = vpop.f32.mrb[13].mxu0  ;;  %v1037_v15 = vrot.slane %v3934_v31, 7 }
 0x1b3   : > { %4918 = vst [vmem:[#allocation31_spill] sm:$0xff] %v3952_v39  ;;  %v583_v1 = vadd.f32 %v3753_v36, %v582_v59  ;;  %v2529_v6 = vpop.f32.mrb[14].mxu0  ;;  %v1035_v8 = vrot.slane %v3952_v39, 7  ;;  %v1054_v49 = vsel %vm1044_vm2, %v1033_v17, %v1034_v50 }
 0x1b4   : > { %v611_v7 = vmul.f32 0.1, %v591_v58  ;;  %v594_v40 = vadd.f32 %v2529_v6, %v3753_v36  ;;  %v585_v56 = vpop.f32.mrb[15].mxu0  ;;  %2816 = vrot.lane.b32.xlu0 %v2815_v60, %s3297_s8  ;;  %v3980_v14 = vsel %vm3884_vm9, %v1054_v49, 0.0  ;;  %v4025_v54 = vsel %vm1044_vm2, %v1036_v62, %v1037_v15 }
 0x1b5   : > { %v609_v18 = vmul.f32 0.1, %v583_v1  ;;  %v586_v21 = vadd.f32 %v3753_v36, %v585_v56  ;;  %2811 = vrot.lane.b32.xlu1 %v2815_v60, %s3296_s18  ;;  %v3987_v10 = vsel %vm1044_vm2, %v1034_v50, %v1035_v8  ;;  %v1052_v17 = vsel %vm1044_vm2, %v1035_v8, %v1036_v62  ;;  %v3021_v62 = vld [vmem:[%s4929_s1] sm:$0xff]  }
 0x1b6   : > { %v3991_v45 = vmax.f32 %v591_v58, %v611_v7  ;;  %v612_v2 = vmul.f32 0.1, %v594_v40  ;;  %v2825_v61 = vpack.i.bf16 %v3987_v10, %v3980_v14  ;;  %v3999_v43 = vsel %vm3910_vm10, %v1052_v17, 0.0  ;;  %2562 = vmatprep.subr.bf16.mxu1 %v3021_v62 }
 0x1b7   : > { %v3995_v28 = vmax.f32 %v583_v1, %v609_v18  ;;  %v610_v29 = vmul.f32 0.1, %v586_v21  ;;  %v782_v60 = vand.u32 15, %v3970_v0  ;;  %v757_v8 = vadd.s32 104, %v3745_v33  ;;  %2563 = vmatpush3.bf16.msra.mxu1 %v3021_v62 }
 0x1b8   : > { %v4007_v59 = vmax.f32 %v594_v40, %v612_v2  ;;  %2826 = vrot.lane.b32.xlu0 %v2825_v61, %s3296_s18  ;;  %v2835_v51 = vpack.i.bf16 %v4025_v54, %v3999_v43  ;;  %v1040_v49 = vrot.slane %v3991_v45, 7 }
 0x1b9   : > { %4921 = vst [vmem:[#allocation32_spill] sm:$0xff] %v3995_v28  ;;  %v4016_v1 = vmax.f32 %v586_v21, %v610_v29  ;;  %v670_v6 = vpop.f32.mrb[16].mxu0  ;;  %2821 = vrot.lane.b32.xlu1 %v2825_v61, %s3297_s8  ;;  %v1038_v30 = vrot.slane %v3995_v28, 7  ;;  %v761_v21 = vadd.s32 136, %v3745_v33  ;;  %vm1006_vm0 = vcmp.ge.s32.totalorder %v782_v60, 1 }
 0x1ba   : > { %v4030_v0 = vadd.f32 %v3753_v36, %v670_v6  ;;  %v2534_v38 = vpop.f32.mrb[17].mxu0  ;;  %v1041_v7 = vrot.slane %v4007_v59, 7  ;;  %v759_v6 = vadd.s32 120, %v3745_v33  ;;  %v4824_v12 = vrot.slane %v3995_v28, 1 }
 0x1bb   : > { %4926 = vst [vmem:[#allocation33_spill] sm:$0xff] %v4016_v1  ;;  %v673_v40 = vpop.f32.mrb[18].mxu0  ;;  %v1039_v56 = vrot.slane %v4016_v1, 7  ;;  %v1050_v18 = vsel %vm1044_vm2, %v1037_v15, %v1038_v30  ;;  %v763_v38 = vadd.s32 152, %v3745_v33  ;;  %v887_v16 = vand.u32 15, %v761_v21 }
 0x1bc   : > { %v674_v17 = vadd.f32 %v3753_v36, %v673_v40  ;;  %v2535_v2 = vpop.f32.mrb[19].mxu0  ;;  %2836 = vrot.lane.b32.xlu0 %v2835_v51, %s3297_s8  ;;  %v4047_v61 = vsel %vm3961_vm11, %v1050_v18, 0.0  ;;  %v1047_v29 = vsel %vm1044_vm2, %v1040_v49, %v1041_v7  ;;  %v1046_v53 = vsel %vm1044_vm2, %v1041_v7, %v1042_v5 }
 0x1bd   : > { %2831 = vrot.lane.b32.xlu1 %v2835_v51, %s3296_s18  ;;  %v4055_v15 = vsel %vm1044_vm2, %v1038_v30, %v1039_v56  ;;  %v1048_v36 = vsel %vm1044_vm2, %v1039_v56, %v1040_v49  ;;  %v745_v51 = vadd.s32 8, %v3745_v33  ;;  %v1123_v49 = vsel %vm4003_vm12, %v1046_v53, 0.0 }
 0x1be   : > { %v678_v40 = vmul.f32 0.1, %v674_v17  ;;  %v2845_v18 = vpack.i.bf16 %v4055_v15, %v4047_v61  ;;  %v1121_v30 = vsel %vm4010_vm13, %v1048_v36, 0.0  ;;  %v4821_v56 = vrot.slane %v3861_v48, 1 }
 0x1bf   : > { %v859_v2 = vand.u32 15, %v757_v8  ;;  %v677_v5 = vmul.f32 0.1, %v4030_v0  ;;  %v2860_v62 = vpack.i.bf16 %v1047_v29, %v1121_v30  ;;  %v2850_v20 = vpack.i.bf16 %v3947_v37, %v1123_v49 }
 0x1c0   : > { %v680_v7 = vmax.f32 %v674_v17, %v678_v40  ;;  %2846 = vrot.lane.b32.xlu0 %v2845_v18, %s3296_s18  ;;  %v873_v22 = vand.u32 15, %v759_v6  ;;  %v901_v58 = vand.u32 15, %v763_v38  ;;  %v1150_v17 = vrot.slane %v3797_v9, 1  ;;  %v4256_v40 = vld [vmem:[%s4929_s1 + $0x18] sm:$0xff]  }
 0x1c1   : > { %2841 = vrot.lane.b32.xlu1 %v2845_v18, %s3297_s8  ;;  %v775_v29 = vand.u32 15, %v745_v51  ;;  %v1026_v6 = vrot.slane %v3792_v4, 7  ;;  %v768_v36 = vand.u32 15, %v3745_v33  ;;  %v679_v46 = vmax.f32 %v4030_v0, %v677_v5  ;;  %v3023_v5 = vld [vmem:[%s4929_s1 + $0xc] sm:$0xff]  }
 0x1c2   : > { %v4078_v50 = vsel %vm4018_vm14, %v680_v7, 0.0  ;;  %v1179_v3 = vsel %vm1165_vm4, %v1150_v17, %v4821_v56  ;;  %v4101_v53 = vadd.s32 72, %v3745_v33  ;;  %vm4103_vm5 = vcmp.lt.s32.totalorder %v859_v2, 15  ;;  %2542 = vmatprep.subr.bf16.mxu0 %v3023_v5 }
 0x1c3   : > { %v4819_v37 = vrot.slane %v4078_v50, 7  ;;  %vm4112_vm6 = vcmp.lt.s32.totalorder %v873_v22, 15  ;;  %vm4116_vm7 = vcmp.lt.s32.totalorder %v887_v16, 15  ;;  %vm4120_vm8 = vcmp.lt.s32.totalorder %v901_v58, 15  ;;  %2543 = vmatpush3.bf16.msra.mxu0 %v3023_v5 }
 0x1c4   : > { %2861 = vrot.lane.b32.xlu0 %v2860_v62, %s3297_s8  ;;  %v1152_v22 = vrot.slane %v3876_v57, 1  ;;  %vm4133_vm9 = vcmp.lt.s32.totalorder %v775_v29, 15  ;;  %v1163_v16 = vrot.slane %v3833_v34, 1  ;;  %v2875_v49 = vpack.i.bf16 %v3797_v9, %v3788_v63 }
 0x1c5   : > { %2851 = vrot.lane.b32.xlu1 %v2850_v20, %s3297_s8  ;;  %v1062_v23 = vsel %vm1044_vm2, %v4819_v37, %v1026_v6  ;;  %v4128_v20 = vsel %vm1044_vm2, %v1026_v6, %v1027_v27  ;;  %v4144_v27 = vsel %vm4082_vm15, %v1179_v3, 0.0  ;;  %vm4146_vm10 = vcmp.ge.s32.totalorder %v768_v36, 1 }
 0x1c6   : > { %v4130_v18 = vsel %vm1006_vm0, %v1062_v23, 0.0  ;;  %4944 = vst [vmem:[#allocation34_spill] sm:$0xff] %v4144_v27  ;;  %v1164_v7 = vrot.slane %v3900_v11, 1  ;;  %v4156_v58 = vsel %vm4018_vm14, %v679_v46, 0.0  ;;  %v4820_v29 = vrot.slane %v3849_v42, 1 }
 0x1c7   : > { %v2865_v30 = vpack.i.bf16 %v4128_v20, %v4130_v18  ;;  %v1161_v8 = vrot.slane %v3991_v45, 1  ;;  %v4947_v6 = vrot.slane %v3788_v63, 1  ;;  %v1158_v3 = vrot.slane %v3934_v31, 1 }
 0x1c8   : > { %v1160_v23 = vrot.slane %v4016_v1, 1  ;;  %v1162_v37 = vrot.slane %v4007_v59, 1  ;;  %v4951_v5 = vrot.slane %v3861_v48, 1  ;;  %v4954_v38 = vrot.slane %v3792_v4, 1 }
 0x1c9   : > { %2856 = vrot.lane.b32.xlu1 %v2860_v62, %s3296_s18  ;;  %2866 = vrot.lane.b32.xlu0 %v2865_v30, %s3296_s18  ;;  %v4166_v36 = vsel %vm1165_vm4, %v4947_v6, %v1150_v17  ;;  %v1177_v62 = vsel %vm1165_vm4, %v1152_v22, %v4820_v29  ;;  %v4179_v30 = vpack.i.bf16 %v4007_v59, %v3991_v45  ;;  %v1145_v17 = vrot.slane %v4156_v58, 1 }
 0x1ca   : > { %4948 = vst [vmem:[#allocation35_spill] sm:$0xff] %v4166_v36  ;;  %v2885_v46 = vpack.i.bf16 %v4144_v27, %v4166_v36  ;;  %v1171_v6 = vsel %vm1165_vm4, %v1158_v3, %v4824_v12  ;;  %v1146_v29 = vrot.slane %v4078_v50, 1  ;;  %v1169_v45 = vsel %vm1165_vm4, %v1160_v23, %v1161_v8 }
 0x1cb   : > { %v4192_v56 = vsel %vm4103_vm5, %v1171_v6, 0.0  ;;  %v1166_v36 = vsel %vm1165_vm4, %v1163_v16, %v1164_v7  ;;  %v1024_v27 = vrot.slane %v4156_v58, 7  ;;  %v4205_v59 = vsel %vm4112_vm6, %v1169_v45, 0.0  ;;  %v3025_v45 = vld [vmem:[%s4929_s1 + $0x14] ss:$0 sps:$4 sm:$0xff]  }
 0x1cc   : > { %4949 = vst [vmem:[#allocation36_spill] sm:$0xff] %v4192_v56  ;;  %4950 = vst [vmem:[#allocation37_spill] sm:$0xff] %v4205_v59  ;;  %v1167_v60 = vsel %vm1165_vm4, %v1162_v37, %v1163_v16  ;;  %v4213_v6 = vsel %vm1165_vm4, %v4951_v5, %v1152_v22  ;;  %v4217_v12 = vsel %vm4089_vm3, %v1177_v62, 0.0  ;;  %v3022_v16 = vld [vmem:[%s4929_s1 + $0x8] ss:$0 sps:$4 sm:$0xff]   ;;  %v1185_v21 = vsel %vm1165_vm4, %v1164_v7, %v1145_v17 }
 0x1cd   : > { %2876 = vrot.lane.b32.xlu1 %v2875_v49, %s3297_s8  ;;  %2871 = vrot.lane.b32.xlu0 %v2875_v49, %s3296_s18  ;;  %4952 = vst [vmem:[#allocation38_spill] sm:$0xff] %v4213_v6  ;;  %4953 = vst [vmem:[#allocation39_spill] sm:$0xff] %v4217_v12  ;;  %v1168_v49 = vsel %vm1165_vm4, %v1161_v8, %v1162_v37  ;;  %v1243_v0 = vsel %vm4116_vm7, %v1167_v60, 0.0  ;;  %v1245_v37 = vsel %vm4120_vm8, %v1185_v21, 0.0  ;;  %v4955_v5 = vrot.slane %v4078_v50, 7 }
 0x1ce   : > { %v4229_v22 = vpack.i.bf16 %v1243_v0, %v1168_v49  ;;  %v4241_v8 = vsel %vm1165_vm4, %v1146_v29, %v4954_v38  ;;  %v4245_v60 = vsel %vm1165_vm4, %v1145_v17, %v1146_v29  ;;  %v3015_v49 = vpack.i.bf16 %v1245_v37, %v1166_v36 }
 0x1cf   : > { %v4251_v7 = vsel %vm1044_vm2, %v1024_v27, %v4955_v5  ;;  %v4956_v17 = vrot.slane %v3900_v11, 7  ;;  %vm1596_vm11 = vcmask 1043456   ;;  %v2895_v37 = vpack.i.bf16 %v4217_v12, %v4213_v6 }
 0x1d0   : > { %2635 = vmatprep.subr.msk.bf16.mxu1 %vm1596_vm11, %v3022_v16  ;;  %2634 = vmatprep.subr.msk.bf16.mxu0 %vm1596_vm11, %v3025_v45  ;;  %v1598_v36 = vsel %vm1596_vm11, %v3025_v45, 0  ;;  %v1155_v38 = vrot.slane %v3929_v26, 1  ;;  %v755_v45 = vadd.s32 88, %v3745_v33  ;;  %v1154_v5 = vrot.slane %v3874_v55, 1 }
 0x1d1   : > { %2886 = vrot.lane.b32.xlu1 %v2885_v46, %s3297_s8  ;;  %2881 = vrot.lane.b32.xlu0 %v2885_v46, %s3296_s18  ;;  %v4267_v0 = vsel %vm1044_vm2, %v4956_v17, %v1024_v27  ;;  %v1731_v46 = vsel %vm1596_vm11, %v3022_v16, 0  ;;  %v2890_v27 = vpack.i.bf16 %v3876_v57, %v3861_v48  ;;  %v831_v16 = vand.u32 15, %v4101_v53 }
 0x1d2   : > { %2565 = vmatpush3.bf16.msra.mxu1 %v1731_v46  ;;  %2545 = vmatpush3.bf16.msra.mxu0 %v1598_v36  ;;  %v1175_v17 = vsel %vm1165_vm4, %v1154_v5, %v1155_v38  ;;  %v845_v46 = vand.u32 15, %v755_v45  ;;  %v1156_v36 = vrot.slane %v3952_v39, 1  ;;  %v2915_v53 = vpack.i.bf16 %v3874_v55, %v3849_v42 }
 0x1d3   : > { %2582 = vmatprep.subr.bf16.mxu1 %v4256_v40  ;;  %vm1134_vm2 = vcmp.lt.s32.totalorder %v831_v16, 15  ;;  %v1157_v21 = vrot.slane %v3925_v25, 1  ;;  %v4965_v33 = vpack.i.bf16 %v3900_v11, %v3833_v34  ;;  %vm1571_vm13 = vcmask 195584  }
 0x1d4   : > { %v4295_v29 = vsel %vm1134_vm2, %v1175_v17, 0.0  ;;  %vm1136_vm12 = vcmp.lt.s32.totalorder %v845_v46, 15  ;;  %v4311_v17 = vsel %vm1165_vm4, %v1155_v38, %v1156_v36  ;;  %v2955_v38 = vpack.i.bf16 %v3934_v31, %v3925_v25 }
 0x1d5   : > { %2896 = vrot.lane.b32.xlu1 %v2895_v37, %s3297_s8  ;;  %2891 = vrot.lane.b32.xlu0 %v2890_v27, %s3297_s8  ;;  %4957 = vst [vmem:[#allocation40_spill] sm:$0xff] %v4295_v29  ;;  %4960 = vst [vmem:[#allocation42_spill] sm:$0xff] %v4311_v17 }
 0x1d9   : > { %2906 = vrot.lane.b32.xlu1 %v2895_v37, %s3296_s18  ;;  %2901 = vrot.lane.b32.xlu0 %v2890_v27, %s3296_s18  ;;  %v1173_v37 = vsel %vm1165_vm4, %v1156_v36, %v1157_v21  ;;  %v4958_v27 = vrot.slane %v3849_v42, 1  ;;  %v4333_v36 = vsel %vm1165_vm4, %v1157_v21, %v1158_v3  ;;  %v2970_v3 = vpack.i.bf16 %v4016_v1, %v3995_v28 }
 0x1da   : > { %v4313_v62 = vsel %vm1136_vm12, %v1173_v37, 0.0  ;;  %4962 = vst [vmem:[#allocation44_spill] sm:$0xff] %v4333_v36  ;;  %v4963_v37 = vrot.slane %v3995_v28, 1 }
 0x1db   : > { %v4305_v16 = vsel %vm1165_vm4, %v4958_v27, %v1154_v5  ;;  %4961 = vst [vmem:[#allocation43_spill] sm:$0xff] %v4313_v62  ;;  %v2935_v46 = vpack.i.bf16 %v4313_v62, %v4311_v17  ;;  %v2930_v5 = vpack.i.bf16 %v3952_v39, %v3929_v26 }
 0x1dc   : > { %4959 = vst [vmem:[#allocation41_spill] sm:$0xff] %v4305_v16  ;;  %v2925_v45 = vpack.i.bf16 %v4295_v29, %v4305_v16  ;;  %v4343_v27 = vsel %vm1165_vm4, %v4963_v37, %v1160_v23  ;;  %vm1360_vm4 = vcmask 64512  }
 0x1dd   : > { %2916 = vrot.lane.b32.xlu1 %v2915_v53, %s3297_s8  ;;  %2911 = vrot.lane.b32.xlu0 %v2915_v53, %s3296_s18  ;;  %v2965_v53 = vpack.i.bf16 %v4192_v56, %v4333_v36  ;;  %4964 = vst [vmem:[#allocation45_spill] sm:$0xff] %v4343_v27 }
 0x1e1   : > { %2926 = vrot.lane.b32.xlu1 %v2925_v45, %s3297_s8  ;;  %2921 = vrot.lane.b32.xlu0 %v2925_v45, %s3296_s18  ;;  %v2975_v45 = vpack.i.bf16 %v4205_v59, %v4343_v27 }
 0x1e5   : > { %2936 = vrot.lane.b32.xlu1 %v2935_v46, %s3297_s8  ;;  %2931 = vrot.lane.b32.xlu0 %v2930_v5, %s3297_s8 }
 0x1e9   : > { %2946 = vrot.lane.b32.xlu1 %v2935_v46, %s3296_s18  ;;  %2941 = vrot.lane.b32.xlu0 %v2930_v5, %s3296_s18 }
 0x1ed   : > { %2956 = vrot.lane.b32.xlu1 %v2955_v38, %s3297_s8  ;;  %2951 = vrot.lane.b32.xlu0 %v2955_v38, %s3296_s18 }
 0x1f1   : > { %2966 = vrot.lane.b32.xlu1 %v2965_v53, %s3297_s8  ;;  %2961 = vrot.lane.b32.xlu0 %v2965_v53, %s3296_s18 }
 0x1f5   : > { %2976 = vrot.lane.b32.xlu1 %v2975_v45, %s3297_s8  ;;  %2971 = vrot.lane.b32.xlu0 %v2970_v3, %s3297_s8 }
 0x1f9   : > { %2986 = vrot.lane.b32.xlu1 %v2975_v45, %s3296_s18  ;;  %2981 = vrot.lane.b32.xlu0 %v2970_v3, %s3296_s18 }
 0x1fd   : > { %2996 = vrot.lane.b32.xlu1 %v4179_v30, %s3297_s8  ;;  %2991 = vrot.lane.b32.xlu0 %v4179_v30, %s3296_s18 }
 0x201   : > { %3006 = vrot.lane.b32.xlu1 %v4229_v22, %s3297_s8  ;;  %3001 = vrot.lane.b32.xlu0 %v4229_v22, %s3296_s18 }
 0x205   : > { %3016 = vrot.lane.b32.xlu1 %v3015_v49, %s3297_s8  ;;  %3011 = vrot.lane.b32.xlu0 %v4965_v33, %s3297_s8  ;;  %s3133_s8 = scalar_lea.vmem %s4685_s10, 2048 }
 0x206   : > { %p3134_p11 = scmp.ne.s32.totalorder %s4685_s10, %s3133_s8 }
 0x208   : > { %p3135_p4 = pnand %p3134_p11, %p4991_p12 }
 0x20a   : > { %p3136_p0 = pneg %p3135_p4 }
 0x217   : > { %v2782_v23 = vpop.permute.xlu0 %2781 }
 0x218   : > { %v2784_v11 = vunpack.i.h.bf16 %v2782_v23  ;;  %v2783_v33 = vunpack.i.l.bf16 %v2782_v23 }
 0x21a   : > { %v1519_v39 = vsel %vm1360_vm4, %v4078_v50, %v2784_v11  ;;  %v1518_v23 = vsel %vm1360_vm4, %v4156_v58, %v2783_v33  ;;  %v4966_v50 = vsel %vm4133_vm9, %v4241_v8, 0.0 }
 0x21b   : > { %v2792_v21 = vpop.permute.xlu1 %2791  ;;  %v2787_v46 = vpop.permute.xlu0 %2786 }
 0x21c   : > { %v2789_v28 = vunpack.i.h.bf16 %v2787_v46  ;;  %v2788_v1 = vunpack.i.l.bf16 %v2787_v46  ;;  %v2794_v16 = vunpack.i.h.bf16 %v2792_v21  ;;  %v2793_v29 = vunpack.i.l.bf16 %v2792_v21 }
 0x21e   : > { %v1363_v46 = vsel %vm1360_vm4, %v4130_v18, %v2788_v1  ;;  %v1364_v6 = vsel %vm1360_vm4, %v4128_v20, %v2789_v28 }
 0x21f   : > { %v2797_v5 = vpop.permute.xlu1 %2796 }
 0x220   : > { %v2799_v56 = vunpack.i.h.bf16 %v2797_v5  ;;  %v2798_v25 = vunpack.i.l.bf16 %v2797_v5 }
 0x222   : > { %v2807_v38 = vpop.permute.xlu0 %2806  ;;  %v1944_v58 = vsel %vm1360_vm4, %v4245_v60, %v2798_v25  ;;  %v4967_v25 = vsel %vm4146_vm10, %v4267_v0, 0.0 }
 0x223   : > { %v2802_v53 = vpop.permute.xlu1 %2801  ;;  %v2809_v31 = vunpack.i.h.bf16 %v2807_v38  ;;  %v2808_v17 = vunpack.i.l.bf16 %v2807_v38 }
 0x224   : > { %v2804_v62 = vunpack.i.h.bf16 %v2802_v53  ;;  %v2803_v26 = vunpack.i.l.bf16 %v2802_v53  ;;  %v1945_v53 = vsel %vm1360_vm4, %v4966_v50, %v2799_v56 }
 0x225   : > { %v1366_v1 = vsel %vm1360_vm4, %v3829_v32, %v2809_v31  ;;  %v1365_v28 = vsel %vm1360_vm4, %v3853_v44, %v2808_v17 }
 0x226   : > { %v2817_v30 = vpop.permute.xlu0 %2816  ;;  %v1379_v20 = vsel %vm475_vm1, %v1363_v46, %v2803_v26  ;;  %v1380_v18 = vsel %vm475_vm1, %v1364_v6, %v2804_v62 }
 0x227   : > { %v4368_v37 = vpop.permute.xlu1 %2811  ;;  %v2819_v5 = vunpack.i.h.bf16 %v2817_v30  ;;  %v2818_v12 = vunpack.i.l.bf16 %v2817_v30 }
 0x228   : > { %v2814_v51 = vunpack.i.h.bf16 %v4368_v37  ;;  %v2813_v8 = vunpack.i.l.bf16 %v4368_v37  ;;  %v1394_v37 = vpack.c.bf16 %v1380_v18, %v1379_v20 }
 0x229   : > { %v1381_v31 = vsel %vm475_vm1, %v1365_v28, %v2818_v12  ;;  %v1382_v44 = vsel %vm475_vm1, %v1366_v1, %v2819_v5 }
 0x22a   : > { %v4370_v45 = vpop.permute.xlu0 %2826  ;;  %v1367_v50 = vsel %vm1360_vm4, %v3905_v19, %v2813_v8 }
 0x22b   : > { %v4372_v3 = vpop.permute.xlu1 %2821  ;;  %v2829_v0 = vunpack.i.h.bf16 %v4370_v45  ;;  %v2828_v33 = vunpack.i.l.bf16 %v4370_v45 }
 0x22c   : > { %v2824_v17 = vunpack.i.h.bf16 %v4372_v3 }
 0x22d   : > { %v1370_v19 = vsel %vm1360_vm4, %v3957_v41, %v2829_v0 }
 0x22e   : > { %v4374_v22 = vpop.permute.xlu0 %2836 }
 0x22f   : > { %v4376_v49 = vpop.permute.xlu1 %2831  ;;  %v2839_v46 = vunpack.i.h.bf16 %v4374_v22  ;;  %v2838_v5 = vunpack.i.l.bf16 %v4374_v22  ;;  %v3026_v22 = vld [vmem:[%s4929_s1 + $0x20] ss:$0 sps:$4 sm:$0xff]  }
 0x231   : > { %v1386_v8 = vsel %vm475_vm1, %v1370_v19, %v2839_v46 }
 0x232   : > { %v4378_v27 = vpop.permute.xlu0 %2846 }
 0x233   : > { %v4380_v34 = vpop.permute.xlu1 %2841 }
 0x236   : > { %v4382_v59 = vpop.permute.xlu0 %2861 }
 0x237   : > { %v4384_v36 = vpop.permute.xlu1 %2851  ;;  %v2864_v0 = vunpack.i.h.bf16 %v4382_v59 }
 0x23b   : > { %v4394_v42 = vpop.permute.xlu1 %2856  ;;  %v2867_v38 = vpop.permute.xlu0 %2866 }
 0x23c   : > { %v2869_v21 = vunpack.i.h.bf16 %v2867_v38  ;;  %v2868_v11 = vunpack.i.l.bf16 %v2867_v38  ;;  %v1395_v38 = vpack.c.bf16 %v1382_v44, %v1381_v31  ;;  %v2022_v44 = vsel %vm1596_vm11, %v3026_v22, 0 }
 0x23e   : > { %v1362_v56 = vsel %vm1360_vm4, %v4251_v7, %v2869_v21  ;;  %v1361_v32 = vsel %vm1360_vm4, %v4967_v25, %v2868_v11  ;;  %v2823_v7 = vunpack.i.l.bf16 %v4372_v3  ;;  %v1368_v3 = vsel %vm1360_vm4, %v3918_v24, %v2814_v51 }
 0x23f   : > { %v2877_v26 = vpop.permute.xlu1 %2876  ;;  %v2872_v60 = vpop.permute.xlu0 %2871  ;;  %v1377_v6 = vsel %vm475_vm1, %v1361_v32, %v2793_v29  ;;  %v1378_v62 = vsel %vm475_vm1, %v1362_v56, %v2794_v16  ;;  %v1369_v24 = vsel %vm1360_vm4, %v3939_v35, %v2828_v33  ;;  %v2863_v33 = vunpack.i.l.bf16 %v4382_v59 }
 0x240   : > { %v2879_v30 = vunpack.i.h.bf16 %v2877_v26  ;;  %v2878_v2 = vunpack.i.l.bf16 %v2877_v26  ;;  %v1393_v12 = vpack.c.bf16 %v1378_v62, %v1377_v6  ;;  %v2874_v20 = vunpack.i.h.bf16 %v2872_v60 }
 0x241   : > { %v2873_v18 = vunpack.i.l.bf16 %v2872_v60  ;;  %v1385_v51 = vsel %vm475_vm1, %v1369_v24, %v2838_v5  ;;  %v2834_v26 = vunpack.i.h.bf16 %v4376_v49 }
 0x242   : > { %v1535_v29 = vsel %vm475_vm1, %v1519_v39, %v2879_v30  ;;  %v1534_v16 = vsel %vm475_vm1, %v1518_v23, %v2878_v2  ;;  %2566 = vmatprep.mubr.msk.bf16.mxu1 %vm1571_vm13, %v1393_v12  ;;  %v1383_v39 = vsel %vm475_vm1, %v1367_v50, %v2823_v7  ;;  %v1384_v23 = vsel %vm475_vm1, %v1368_v3, %v2824_v17 }
 0x243   : > { %v1550_v21 = vpack.c.bf16 %v1535_v29, %v1534_v16  ;;  %v2887_v45 = vpop.permute.xlu1 %2886  ;;  %v4435_v11 = vpop.permute.xlu0 %2881  ;;  %2567 = vmatmul.mubr.msk.bf16.vlgmr.msra.gmra.mrb[4].mxu1 %vm1571_vm13, %v1394_v37  ;;  %v1396_v41 = vpack.c.bf16 %v1384_v23, %v1383_v39  ;;  %v1397_v6 = vpack.c.bf16 %v1386_v8, %v1385_v51  ;;  %v1521_v62 = vsel %vm1360_vm4, %v3809_v13, %v2874_v20 }
 0x244   : > { %v2889_v1 = vunpack.i.h.bf16 %v2887_v45  ;;  %v2888_v28 = vunpack.i.l.bf16 %v2887_v45  ;;  %2570 = vmatprep.mubr.msk.bf16.mxu1 %vm1571_vm13, %v1395_v38  ;;  %2583 = vmatpush3.bf16.msra.mxu1 %v4256_v40  ;;  %v2849_v40 = vunpack.i.h.bf16 %v4378_v27  ;;  %v1520_v17 = vsel %vm1360_vm4, %v3792_v4, %v2873_v18 }
 0x245   : > { %2546 = vmatprep.mubr.msk.bf16.mxu0 %vm1571_vm13, %v1550_v21  ;;  %2636 = vmatprep.subr.msk.bf16.mxu1 %vm1596_vm11, %v3026_v22  ;;  %v2848_v7 = vunpack.i.l.bf16 %v4378_v27  ;;  %v2844_v30 = vunpack.i.h.bf16 %v4380_v34  ;;  %v1372_v5 = vsel %vm1360_vm4, %v3987_v10, %v2834_v26  ;;  %v2859_v10 = vunpack.i.h.bf16 %v4394_v42 }
 0x246   : > { %v4452_v56 = vsel %vm475_vm1, %v1944_v58, %v2888_v28  ;;  %v4455_v25 = vsel %vm475_vm1, %v1945_v53, %v2889_v1  ;;  %v2833_v58 = vunpack.i.l.bf16 %v4376_v49  ;;  %v2843_v49 = vunpack.i.l.bf16 %v4380_v34 }
 0x247   : > { %v1976_v35 = vpack.c.bf16 %v4455_v25, %v4452_v56  ;;  %v4460_v32 = vpop.permute.xlu1 %2896  ;;  %v2892_v31 = vpop.permute.xlu0 %2891  ;;  %v1374_v59 = vsel %vm1360_vm4, %v4025_v54, %v2849_v40  ;;  %v1373_v29 = vsel %vm1360_vm4, %v3999_v43, %v2848_v7  ;;  %v1388_v38 = vsel %vm475_vm1, %v1372_v5, %v2844_v30  ;;  %v4969_v5 = vld [vmem:[#allocation35_spill] sm:$0xff] }
 0x248   : > { %v2894_v60 = vunpack.i.h.bf16 %v2892_v31  ;;  %v2893_v53 = vunpack.i.l.bf16 %v2892_v31  ;;  %2585 = vmatpush3.bf16.msra.mxu1 %v2022_v44  ;;  %v1371_v34 = vsel %vm1360_vm4, %v3980_v14, %v2833_v58  ;;  %v1389_v3 = vsel %vm475_vm1, %v1373_v29, %v2863_v33 }
 0x249   : > { %v1387_v16 = vsel %vm475_vm1, %v1371_v34, %v2843_v49  ;;  %v1390_v50 = vsel %vm475_vm1, %v1374_v59, %v2864_v0  ;;  %v2858_v14 = vunpack.i.l.bf16 %v4394_v42  ;;  %v1376_v42 = vsel %vm1360_vm4, %v4055_v15, %v2859_v10 }
 0x24a   : > { %v1536_v2 = vsel %vm475_vm1, %v1520_v17, %v2893_v53  ;;  %v1537_v37 = vsel %vm475_vm1, %v1521_v62, %v2894_v60  ;;  %v1398_v23 = vpack.c.bf16 %v1388_v38, %v1387_v16  ;;  %v1399_v19 = vpack.c.bf16 %v1390_v50, %v1389_v3 }
 0x24b   : > { %v1551_v12 = vpack.c.bf16 %v1537_v37, %v1536_v2  ;;  %v4478_v13 = vpop.permute.xlu1 %2906  ;;  %v2902_v46 = vpop.permute.xlu0 %2901  ;;  %2571 = vmatmul.mubr.msk.bf16.gmra.mrb[8].mxu1 %vm1571_vm13, %v1396_v41  ;;  %v1375_v51 = vsel %vm1360_vm4, %v4047_v61, %v2858_v14  ;;  %v2884_v31 = vunpack.i.h.bf16 %v4435_v11  ;;  %v2883_v44 = vunpack.i.l.bf16 %v4435_v11 }
 0x24c   : > { %v2904_v4 = vunpack.i.h.bf16 %v2902_v46  ;;  %v2903_v27 = vunpack.i.l.bf16 %v2902_v46  ;;  %2574 = vmatprep.mubr.msk.bf16.mxu1 %vm1571_vm13, %v1397_v6  ;;  %v2899_v60 = vunpack.i.h.bf16 %v4460_v32  ;;  %v2908_v37 = vunpack.i.l.bf16 %v4478_v13 }
 0x24d   : > { %2547 = vmatmul.mubr.msk.bf16.vlgmr.msra.gmra.mrb[20].mxu0 %vm1571_vm13, %v1551_v12  ;;  %v1947_v11 = vsel %vm1360_vm4, %v3867_v52, %v2884_v31  ;;  %v1946_v2 = vsel %vm1360_vm4, %v3859_v47, %v2883_v44  ;;  %v4973_v31 = vld [vmem:[#allocation40_spill] sm:$0xff] }
 0x24e   : > { %v1523_v54 = vsel %vm1360_vm4, %v3797_v9, %v2904_v4  ;;  %v1522_v43 = vsel %vm1360_vm4, %v3788_v63, %v2903_v27  ;;  %v2854_v63 = vunpack.i.h.bf16 %v4384_v36  ;;  %v2853_v9 = vunpack.i.l.bf16 %v4384_v36 }
 0x24f   : > { %v2917_v21 = vpop.permute.xlu1 %2916  ;;  %v2912_v45 = vpop.permute.xlu0 %2911  ;;  %v2898_v36 = vunpack.i.l.bf16 %v4460_v32  ;;  %v2909_v32 = vunpack.i.h.bf16 %v4478_v13  ;;  %v1963_v33 = vsel %vm475_vm1, %v1947_v11, %v2899_v60  ;;  %v4968_v13 = vld [vmem:[#allocation34_spill] sm:$0xff]  ;;  %v1948_v34 = vsel %vm1360_vm4, %v4969_v5, %v2908_v37 }
 0x250   : > { %v2919_v22 = vunpack.i.h.bf16 %v2917_v21  ;;  %v2918_v39 = vunpack.i.l.bf16 %v2917_v21  ;;  %v2914_v8 = vunpack.i.h.bf16 %v2912_v45  ;;  %v2913_v41 = vunpack.i.l.bf16 %v2912_v45  ;;  %v4970_v21 = vld [vmem:[#allocation27_spill] sm:$0xff] }
 0x251   : > { %v1391_v61 = vsel %vm475_vm1, %v1375_v51, %v2853_v9  ;;  %v1392_v58 = vsel %vm475_vm1, %v1376_v42, %v2854_v63  ;;  %v1949_v27 = vsel %vm1360_vm4, %v4968_v13, %v2909_v32  ;;  %v4972_v42 = vld [vmem:[#allocation38_spill] sm:$0xff] }
 0x252   : > { %v1538_v1 = vsel %vm475_vm1, %v1522_v43, %v2918_v39  ;;  %v1539_v28 = vsel %vm475_vm1, %v1523_v54, %v2919_v22  ;;  %v1525_v40 = vsel %vm1360_vm4, %v3876_v57, %v2914_v8  ;;  %v1524_v62 = vsel %vm1360_vm4, %v3861_v48, %v2913_v41  ;;  %v4978_v13 = vld [vmem:[#allocation42_spill] sm:$0xff] }
 0x253   : > { %v1552_v24 = vpack.c.bf16 %v1539_v28, %v1538_v1  ;;  %v2927_v20 = vpop.permute.xlu1 %2926  ;;  %v4503_v18 = vpop.permute.xlu0 %2921  ;;  %2575 = vmatmul.mubr.msk.bf16.gmra.mrb[12].mxu1 %vm1571_vm13, %v1398_v23  ;;  %v1400_v30 = vpack.c.bf16 %v1392_v58, %v1391_v61  ;;  %v1962_v48 = vsel %vm475_vm1, %v1946_v2, %v2898_v36 }
 0x254   : > { %2578 = vmatprep.mubr.msk.bf16.mxu1 %vm1571_vm13, %v1399_v19  ;;  %v2929_v52 = vunpack.i.h.bf16 %v2927_v20  ;;  %v2928_v12 = vunpack.i.l.bf16 %v2927_v20  ;;  %v1977_v47 = vpack.c.bf16 %v1963_v33, %v1962_v48  ;;  %v2924_v56 = vunpack.i.h.bf16 %v4503_v18 }
 0x255   : > { %2550 = vmatprep.mubr.msk.bf16.mxu0 %vm1571_vm13, %v1552_v24  ;;  %v2923_v25 = vunpack.i.l.bf16 %v4503_v18 }
 0x256   : > { %v1964_v16 = vsel %vm475_vm1, %v1948_v34, %v2928_v12  ;;  %v1965_v38 = vsel %vm475_vm1, %v1949_v27, %v2929_v52 }
 0x257   : > { %v4516_v15 = vpop.permute.xlu1 %2936  ;;  %v2932_v26 = vpop.permute.xlu0 %2931  ;;  %v1978_v54 = vpack.c.bf16 %v1965_v38, %v1964_v16  ;;  %v1950_v51 = vsel %vm1360_vm4, %v4972_v42, %v2923_v25 }
 0x258   : > { %v2934_v53 = vunpack.i.h.bf16 %v2932_v26  ;;  %v2933_v6 = vunpack.i.l.bf16 %v2932_v26  ;;  %v2939_v10 = vunpack.i.h.bf16 %v4516_v15  ;;  %v2938_v14 = vunpack.i.l.bf16 %v4516_v15  ;;  %v4974_v15 = vld [vmem:[#allocation41_spill] sm:$0xff] }
 0x25a   : > { %v1540_v17 = vsel %vm475_vm1, %v1524_v62, %v2933_v6  ;;  %v1541_v7 = vsel %vm475_vm1, %v1525_v40, %v2934_v53  ;;  %v1966_v8 = vsel %vm475_vm1, %v1950_v51, %v2938_v14  ;;  %v4975_v62 = vld [vmem:[#allocation31_spill] sm:$0xff] }
 0x25b   : > { %v1553_v49 = vpack.c.bf16 %v1541_v7, %v1540_v17  ;;  %v2947_v57 = vpop.permute.xlu1 %2946  ;;  %v2942_v0 = vpop.permute.xlu0 %2941  ;;  %2579 = vmatmul.mubr.msk.bf16.gmra.mrb[16].mxu1 %vm1571_vm13, %v1400_v30  ;;  %v4976_v17 = vld [vmem:[#allocation29_spill] sm:$0xff] }
 0x25c   : > { %v2944_v46 = vunpack.i.h.bf16 %v2942_v0  ;;  %v2943_v4 = vunpack.i.l.bf16 %v2942_v0  ;;  %2586 = vmatprep.mubr.msk.bf16.mxu1 %vm1571_vm13, %v1976_v35  ;;  %v2949_v43 = vunpack.i.h.bf16 %v2947_v57  ;;  %v2948_v23 = vunpack.i.l.bf16 %v2947_v57 }
 0x25d   : > { %2551 = vmatmul.mubr.msk.bf16.gmra.mrb[24].mxu0 %vm1571_vm13, %v1553_v49 }
 0x25e   : > { %v1527_v35 = vsel %vm1360_vm4, %v3874_v55, %v2944_v46  ;;  %v1526_v45 = vsel %vm1360_vm4, %v4970_v21, %v2943_v4  ;;  %v4971_v55 = vld [vmem:[#allocation39_spill] sm:$0xff]  ;;  %v1953_v44 = vsel %vm1360_vm4, %v4973_v31, %v2949_v43  ;;  %v1952_v26 = vsel %vm1360_vm4, %v4974_v15, %v2948_v23  ;;  %v4981_v43 = vld [vmem:[#allocation36_spill] sm:$0xff] }
 0x25f   : > { %v2957_v59 = vpop.permute.xlu1 %2956  ;;  %v2952_v29 = vpop.permute.xlu0 %2951  ;;  %v1951_v18 = vsel %vm1360_vm4, %v4971_v55, %v2924_v56  ;;  %v4977_v4 = vld [vmem:[#allocation43_spill] sm:$0xff]  ;;  %v4979_v56 = vld [vmem:[#allocation30_spill] sm:$0xff] }
 0x260   : > { %v2959_v3 = vunpack.i.h.bf16 %v2957_v59  ;;  %v2958_v50 = vunpack.i.l.bf16 %v2957_v59  ;;  %v2954_v63 = vunpack.i.h.bf16 %v2952_v29  ;;  %v2953_v9 = vunpack.i.l.bf16 %v2952_v29 }
 0x261   : > { %v1967_v41 = vsel %vm475_vm1, %v1951_v18, %v2939_v10 }
 0x262   : > { %v1542_v22 = vsel %vm475_vm1, %v1526_v45, %v2958_v50  ;;  %v1543_v39 = vsel %vm475_vm1, %v1527_v35, %v2959_v3  ;;  %v1979_v40 = vpack.c.bf16 %v1967_v41, %v1966_v8  ;;  %v1529_v11 = vsel %vm1360_vm4, %v4975_v62, %v2954_v63  ;;  %v4980_v35 = vld [vmem:[#allocation28_spill] sm:$0xff] }
 0x263   : > { %v1554_v1 = vpack.c.bf16 %v1543_v39, %v1542_v22  ;;  %v2967_v28 = vpop.permute.xlu1 %2966  ;;  %v2962_v19 = vpop.permute.xlu0 %2961  ;;  %2587 = vmatmul.mubr.msk.bf16.vlgmr.msra.gmra.mrb[4].mxu1 %vm1571_vm13, %v1977_v47  ;;  %v1528_v7 = vsel %vm1360_vm4, %v4976_v17, %v2953_v9 }
 0x264   : > { %v2969_v24 = vunpack.i.h.bf16 %v2967_v28  ;;  %v2968_v20 = vunpack.i.l.bf16 %v2967_v28  ;;  %2590 = vmatprep.mubr.msk.bf16.mxu1 %vm1571_vm13, %v1978_v54  ;;  %v2964_v30 = vunpack.i.h.bf16 %v2962_v19  ;;  %v2963_v2 = vunpack.i.l.bf16 %v2962_v19 }
 0x265   : > { %2554 = vmatprep.mubr.msk.bf16.mxu0 %vm1571_vm13, %v1554_v1  ;;  %v4982_v1 = vld [vmem:[#allocation44_spill] sm:$0xff] }
 0x266   : > { %v1968_v60 = vsel %vm475_vm1, %v1952_v26, %v2968_v20  ;;  %v1969_v36 = vsel %vm475_vm1, %v1953_v44, %v2969_v24  ;;  %v1955_v47 = vsel %vm1360_vm4, %v4977_v4, %v2964_v30  ;;  %v1954_v27 = vsel %vm1360_vm4, %v4978_v13, %v2963_v2  ;;  %v4620_v4 = vld [vmem:[%s4987_s5] ss:$0 sm:$0xff] }
 0x267   : > { %v2977_v61 = vpop.permute.xlu1 %2976  ;;  %v2972_v58 = vpop.permute.xlu0 %2971  ;;  %v1980_v49 = vpack.c.bf16 %v1969_v36, %v1968_v60  ;;  %v4984_v60 = vld [vmem:[#allocation32_spill] sm:$0xff] }
 0x268   : > { %v2974_v53 = vunpack.i.h.bf16 %v2972_v58  ;;  %v2973_v6 = vunpack.i.l.bf16 %v2972_v58  ;;  %v2979_v57 = vunpack.i.h.bf16 %v2977_v61  ;;  %v2978_v0 = vunpack.i.l.bf16 %v2977_v61  ;;  %v4983_v61 = vld [vmem:[#allocation33_spill] sm:$0xff] }
 0x26a   : > { %v1544_v32 = vsel %vm475_vm1, %v1528_v7, %v2973_v6  ;;  %v1545_v37 = vsel %vm475_vm1, %v1529_v11, %v2974_v53  ;;  %v1970_v5 = vsel %vm475_vm1, %v1954_v27, %v2978_v0  ;;  %v1971_v34 = vsel %vm475_vm1, %v1955_v47, %v2979_v57  ;;  %v4985_v53 = vld [vmem:[#allocation37_spill] sm:$0xff] }
 0x26b   : > { %v1555_v48 = vpack.c.bf16 %v1545_v37, %v1544_v32  ;;  %v2987_v33 = vpop.permute.xlu1 %2986  ;;  %v2982_v52 = vpop.permute.xlu0 %2981  ;;  %2591 = vmatmul.mubr.msk.bf16.gmra.mrb[8].mxu1 %vm1571_vm13, %v1979_v40  ;;  %v1981_v45 = vpack.c.bf16 %v1971_v34, %v1970_v5  ;;  %v4986_v40 = vld [vmem:[#allocation45_spill] sm:$0xff] }
 0x26c   : > { %v2984_v12 = vunpack.i.h.bf16 %v2982_v52  ;;  %v2983_v46 = vunpack.i.l.bf16 %v2982_v52  ;;  %2594 = vmatprep.mubr.msk.bf16.mxu1 %vm1571_vm13, %v1980_v49  ;;  %v2989_v16 = vunpack.i.h.bf16 %v2987_v33  ;;  %v2988_v38 = vunpack.i.l.bf16 %v2987_v33 }
 0x26d   : > { %2555 = vmatmul.mubr.msk.bf16.gmra.mrb[28].mxu0 %vm1571_vm13, %v1555_v48 }
 0x26e   : > { %v1531_v25 = vsel %vm1360_vm4, %v4979_v56, %v2984_v12  ;;  %v1530_v21 = vsel %vm1360_vm4, %v4980_v35, %v2983_v46  ;;  %v1957_v23 = vsel %vm1360_vm4, %v4981_v43, %v2989_v16  ;;  %v1956_v28 = vsel %vm1360_vm4, %v4982_v1, %v2988_v38 }
 0x26f   : > { %v2997_v59 = vpop.permute.xlu1 %2996  ;;  %v2992_v29 = vpop.permute.xlu0 %2991 }
 0x270   : > { %v2999_v3 = vunpack.i.h.bf16 %v2997_v59  ;;  %v2998_v50 = vunpack.i.l.bf16 %v2997_v59  ;;  %v2994_v20 = vunpack.i.h.bf16 %v2992_v29  ;;  %v2993_v55 = vunpack.i.l.bf16 %v2992_v29 }
 0x272   : > { %v1546_v10 = vsel %vm475_vm1, %v1530_v21, %v2998_v50  ;;  %v1547_v14 = vsel %vm475_vm1, %v1531_v25, %v2999_v3  ;;  %v1533_v58 = vsel %vm1360_vm4, %v4983_v61, %v2994_v20  ;;  %v1532_v36 = vsel %vm1360_vm4, %v4984_v60, %v2993_v55 }
 0x273   : > { %v1556_v22 = vpack.c.bf16 %v1547_v14, %v1546_v10  ;;  %v3007_v39 = vpop.permute.xlu1 %3006  ;;  %v3002_v54 = vpop.permute.xlu0 %3001  ;;  %2595 = vmatmul.mubr.msk.bf16.gmra.mrb[12].mxu1 %vm1571_vm13, %v1981_v45 }
 0x274   : > { %v3009_v19 = vunpack.i.h.bf16 %v3007_v39  ;;  %v3008_v24 = vunpack.i.l.bf16 %v3007_v39  ;;  %v3004_v18 = vunpack.i.h.bf16 %v3002_v54  ;;  %v3003_v42 = vunpack.i.l.bf16 %v3002_v54 }
 0x275   : > { %2558 = vmatprep.mubr.msk.bf16.mxu0 %vm1571_vm13, %v1556_v22  ;;  %v3027_v22 = vld [vmem:[%s3699_s6 + $0x10] sm:$0xff] }
 0x276   : > { %v1972_v51 = vsel %vm475_vm1, %v1956_v28, %v3008_v24  ;;  %v1973_v63 = vsel %vm475_vm1, %v1957_v23, %v3009_v19  ;;  %v1959_v6 = vsel %vm1360_vm4, %v4985_v53, %v3004_v18  ;;  %v1958_v62 = vsel %vm1360_vm4, %v4986_v40, %v3003_v42  ;;  %v3028_v28 = vld [vmem:[%s3699_s6] sm:$0xff]  ;;  %v3029_v42 = vld [vmem:[%s3699_s6 + $0x18] sm:$0xff] }
 0x277   : > { %v1982_v9 = vpack.c.bf16 %v1973_v63, %v1972_v51  ;;  %v3017_v8 = vpop.permute.xlu1 %3016  ;;  %v3012_v41 = vpop.permute.xlu0 %3011 }
 0x278   : > { %v3019_v31 = vunpack.i.h.bf16 %v3017_v8  ;;  %v3018_v44 = vunpack.i.l.bf16 %v3017_v8  ;;  %v3014_v15 = vunpack.i.h.bf16 %v3012_v41  ;;  %v3013_v26 = vunpack.i.l.bf16 %v3012_v41 }
 0x279   : > { %2598 = vmatprep.mubr.msk.bf16.mxu1 %vm1571_vm13, %v1982_v9 }
 0x27a   : > { %v1974_v11 = vsel %vm475_vm1, %v1958_v62, %v3018_v44  ;;  %v1975_v17 = vsel %vm475_vm1, %v1959_v6, %v3019_v31  ;;  %v1548_v7 = vsel %vm475_vm1, %v1532_v36, %v3013_v26  ;;  %v1549_v30 = vsel %vm475_vm1, %v1533_v58, %v3014_v15  ;;  %v3030_v31 = vld [vmem:[%s3699_s6 + $0x8] sm:$0xff] }
 0x27b   : > { %v1983_v2 = vpack.c.bf16 %v1975_v17, %v1974_v11  ;;  %v1557_v32 = vpack.c.bf16 %v1549_v30, %v1548_v7  ;;  %v3031_v7 = vld [vmem:[%s3699_s6 + $0x30] sm:$0xff] }
 0x27d   : > { %2559 = vmatmul.mubr.msk.bf16.gmra.mrb[32].mxu0 %vm1571_vm13, %v1557_v32  ;;  %2599 = vmatmul.mubr.msk.bf16.gmra.mrb[16].mxu1 %vm1571_vm13, %v1983_v2 }
 0x320   : > { %v2548_v37 = vpop.f32.mrb[20].mxu0 }
 0x321   : > { %v1634_v49 = vpop.f32.mrb[21].mxu0 }
 0x322   : > { %v2549_v57 = vpop.f32.mrb[22].mxu0 }
 0x323   : > { %v1637_v0 = vpop.f32.mrb[23].mxu0 }
 0x330   : > { %v2552_v48 = vpop.f32.mrb[24].mxu0 }
 0x331   : > { %v1650_v33 = vpop.f32.mrb[25].mxu0 }
 0x332   : > { %v2553_v52 = vpop.f32.mrb[26].mxu0 }
 0x333   : > { %v1653_v12 = vpop.f32.mrb[27].mxu0 }
 0x336   : > { %v2588_v46 = vpop.f32.mrb[4].mxu1 }
 0x337   : > { %v2602_v47 = vadd.f32 %v2588_v46, %v2548_v37  ;;  %v2058_v13 = vpop.f32.mrb[5].mxu1 }
 0x338   : > { %v2603_v27 = vadd.f32 %v2058_v13, %v1634_v49  ;;  %v2589_v5 = vpop.f32.mrb[6].mxu1  ;;  %v3032_v49 = vld [vmem:[%s3699_s6 + $0x20] sm:$0xff] }
 0x339   : > { %v2146_v34 = vadd.f32 %v2602_v47, %v4620_v4  ;;  %v2604_v59 = vadd.f32 %v2589_v5, %v2549_v57  ;;  %v2061_v29 = vpop.f32.mrb[7].mxu1 }
 0x33a   : > { %v2144_v16 = vadd.f32 %v2603_v27, %v4620_v4  ;;  %v2605_v38 = vadd.f32 %v2061_v29, %v1637_v0  ;;  %v3034_v27 = vld [vmem:[%s3699_s6 + $0x28] sm:$0xff] }
 0x33b   : > { %v2162_v3 = vmul.f32 0.1, %v2146_v34  ;;  %v2147_v50 = vadd.f32 %v2604_v59, %v4620_v4 }
 0x33c   : > { %v2160_v56 = vmul.f32 0.1, %v2144_v16  ;;  %v2145_v25 = vadd.f32 %v2605_v38, %v4620_v4 }
 0x33d   : > { %v2178_v35 = vmax.f32 %v2146_v34, %v2162_v3  ;;  %v2163_v21 = vmul.f32 0.1, %v2147_v50 }
 0x33e   : > { %v2176_v45 = vmax.f32 %v2144_v16, %v2160_v56  ;;  %v2161_v10 = vmul.f32 0.1, %v2145_v25  ;;  %v2592_v14 = vpop.f32.mrb[8].mxu1 }
 0x33f   : > { %v2194_v39 = vadd.f32 %v3027_v22, %v2178_v35  ;;  %v2179_v54 = vmax.f32 %v2147_v50, %v2163_v21  ;;  %v2606_v43 = vadd.f32 %v2592_v14, %v2552_v48  ;;  %v2074_v23 = vpop.f32.mrb[9].mxu1  ;;  %v3035_v21 = vld [vmem:[%s3699_s6 + $0x50] sm:$0xff] }
 0x340   : > { %v2556_v1 = vpop.f32.mrb[28].mxu0  ;;  %v2192_v19 = vadd.f32 %v3028_v28, %v2176_v45  ;;  %v2177_v24 = vmax.f32 %v2145_v25, %v2161_v10  ;;  %v2607_v20 = vadd.f32 %v2074_v23, %v1650_v33  ;;  %v2593_v55 = vpop.f32.mrb[10].mxu1 }
 0x341   : > { %v1666_v18 = vpop.f32.mrb[29].mxu0  ;;  %2210 = vst.msk [vmem:[%s4629_s21 + $0x10] sm:$0xff] %vm475_vm1, %v2194_v39  ;;  %v2195_v51 = vadd.f32 %v3029_v42, %v2179_v54  ;;  %v2150_v63 = vadd.f32 %v2606_v43, %v4620_v4  ;;  %v2608_v9 = vadd.f32 %v2593_v55, %v2553_v52  ;;  %v2077_v8 = vpop.f32.mrb[11].mxu1  ;;  %v3033_v52 = vld [vmem:[%s3699_s6 + $0x38] sm:$0xff]  ;;  %v3036_v39 = vld [vmem:[%s3699_s6 + $0x40] sm:$0xff]  ;;  %v3038_v42 = vld [vmem:[%s3699_s6 + $0x48] sm:$0xff] }
 0x342   : > { %v2557_v41 = vpop.f32.mrb[30].mxu0  ;;  %2208 = vst.msk [vmem:[%s4629_s21] sm:$0xff] %vm475_vm1, %v2192_v19  ;;  %v2193_v44 = vadd.f32 %v3030_v31, %v2177_v24  ;;  %v2148_v15 = vadd.f32 %v2607_v20, %v4620_v4  ;;  %v2609_v26 = vadd.f32 %v2077_v8, %v1653_v12  ;;  %v3037_v19 = vld [vmem:[%s3699_s6 + $0x58] sm:$0xff] }
 0x343   : > { %v1669_v61 = vpop.f32.mrb[31].mxu0  ;;  %2211 = vst.msk [vmem:[%s4629_s21 + $0x18] sm:$0xff] %vm475_vm1, %v2195_v51  ;;  %v2166_v58 = vmul.f32 0.1, %v2150_v63  ;;  %v2151_v60 = vadd.f32 %v2608_v9, %v4620_v4 }
 0x344   : > { %2209 = vst.msk [vmem:[%s4629_s21 + $0x8] sm:$0xff] %vm475_vm1, %v2193_v44  ;;  %v2164_v36 = vmul.f32 0.1, %v2148_v15  ;;  %v2149_v53 = vadd.f32 %v2609_v26, %v4620_v4 }
 0x345   : > { %v2182_v6 = vmax.f32 %v2150_v63, %v2166_v58  ;;  %v2167_v40 = vmul.f32 0.1, %v2151_v60 }
 0x346   : > { %v2180_v62 = vmax.f32 %v2148_v15, %v2164_v36  ;;  %v2165_v11 = vmul.f32 0.1, %v2149_v53  ;;  %v2596_v17 = vpop.f32.mrb[12].mxu1 }
 0x347   : > { %v2198_v30 = vadd.f32 %v3031_v7, %v2182_v6  ;;  %v2183_v2 = vmax.f32 %v2151_v60, %v2167_v40  ;;  %v2610_v32 = vadd.f32 %v2596_v17, %v2556_v1  ;;  %v2090_v37 = vpop.f32.mrb[13].mxu1  ;;  %v3039_v40 = vld [vmem:[%s3699_s6 + $0x70] sm:$0xff]  ;;  %v3040_v17 = vld [vmem:[%s3699_s6 + $0x60] sm:$0xff] }
 0x348   : > { %v2196_v57 = vadd.f32 %v3032_v49, %v2180_v62  ;;  %v2181_v0 = vmax.f32 %v2149_v53, %v2165_v11  ;;  %v2611_v48 = vadd.f32 %v2090_v37, %v1666_v18  ;;  %v2597_v33 = vpop.f32.mrb[14].mxu1 }
 0x349   : > { %2214 = vst.msk [vmem:[%s4629_s21 + $0x30] sm:$0xff] %vm475_vm1, %v2198_v30  ;;  %v2199_v12 = vadd.f32 %v3033_v52, %v2183_v2  ;;  %v2154_v46 = vadd.f32 %v2610_v32, %v4620_v4  ;;  %v2612_v47 = vadd.f32 %v2597_v33, %v2557_v41  ;;  %v2093_v13 = vpop.f32.mrb[15].mxu1  ;;  %v3042_v32 = vld [vmem:[%s3699_s6 + $0x68] sm:$0xff] }
 0x34a   : > { %2212 = vst.msk [vmem:[%s4629_s21 + $0x20] sm:$0xff] %vm475_vm1, %v2196_v57  ;;  %v2197_v5 = vadd.f32 %v3034_v27, %v2181_v0  ;;  %v2152_v34 = vadd.f32 %v2611_v48, %v4620_v4  ;;  %v2613_v59 = vadd.f32 %v2093_v13, %v1669_v61 }
 0x34b   : > { %2215 = vst.msk [vmem:[%s4629_s21 + $0x38] sm:$0xff] %vm475_vm1, %v2199_v12  ;;  %v2170_v29 = vmul.f32 0.1, %v2154_v46  ;;  %v2155_v16 = vadd.f32 %v2612_v47, %v4620_v4 }
 0x34c   : > { %2213 = vst.msk [vmem:[%s4629_s21 + $0x28] sm:$0xff] %vm475_vm1, %v2197_v5  ;;  %v2168_v38 = vmul.f32 0.1, %v2152_v34  ;;  %v2153_v3 = vadd.f32 %v2613_v59, %v4620_v4 }
 0x34d   : > { %v2186_v50 = vmax.f32 %v2154_v46, %v2170_v29  ;;  %v2171_v56 = vmul.f32 0.1, %v2155_v16 }
 0x34e   : > { %v2184_v25 = vmax.f32 %v2152_v34, %v2168_v38  ;;  %v2169_v35 = vmul.f32 0.1, %v2153_v3 }
 0x34f   : > { %v2202_v45 = vadd.f32 %v3035_v21, %v2186_v50  ;;  %v2187_v10 = vmax.f32 %v2155_v16, %v2171_v56 }
 0x350   : > { %v2560_v14 = vpop.f32.mrb[32].mxu0  ;;  %v2600_v22 = vpop.f32.mrb[16].mxu1  ;;  %v2200_v54 = vadd.f32 %v3036_v39, %v2184_v25  ;;  %v2185_v43 = vmax.f32 %v2153_v3, %v2169_v35 }
 0x351   : > { %v2614_v23 = vadd.f32 %v2600_v22, %v2560_v14  ;;  %v1682_v1 = vpop.f32.mrb[33].mxu0  ;;  %v2106_v28 = vpop.f32.mrb[17].mxu1  ;;  %2218 = vst.msk [vmem:[%s4629_s21 + $0x50] sm:$0xff] %vm475_vm1, %v2202_v45  ;;  %v2203_v24 = vadd.f32 %v3037_v19, %v2187_v10 }
 0x352   : > { %v2615_v20 = vadd.f32 %v2106_v28, %v1682_v1  ;;  %v2561_v55 = vpop.f32.mrb[34].mxu0  ;;  %v2601_v18 = vpop.f32.mrb[18].mxu1  ;;  %2216 = vst.msk [vmem:[%s4629_s21 + $0x40] sm:$0xff] %vm475_vm1, %v2200_v54  ;;  %v2201_v51 = vadd.f32 %v3038_v42, %v2185_v43 }
 0x353   : > { %v2158_v63 = vadd.f32 %v2614_v23, %v4620_v4  ;;  %v2616_v9 = vadd.f32 %v2601_v18, %v2561_v55  ;;  %v1685_v8 = vpop.f32.mrb[35].mxu0  ;;  %v2109_v41 = vpop.f32.mrb[19].mxu1  ;;  %2219 = vst.msk [vmem:[%s4629_s21 + $0x58] sm:$0xff] %vm475_vm1, %v2203_v24 }
 0x354   : > { %v2156_v31 = vadd.f32 %v2615_v20, %v4620_v4  ;;  %v2617_v44 = vadd.f32 %v2109_v41, %v1685_v8  ;;  %2217 = vst.msk [vmem:[%s4629_s21 + $0x48] sm:$0xff] %vm475_vm1, %v2201_v51 }
 0x355   : > { %v2174_v15 = vmul.f32 0.1, %v2158_v63  ;;  %v2159_v26 = vadd.f32 %v2616_v9, %v4620_v4 }
 0x356   : > { %v2172_v61 = vmul.f32 0.1, %v2156_v31  ;;  %v2157_v58 = vadd.f32 %v2617_v44, %v4620_v4  ;;  %v3041_v4 = vld [vmem:[%s3699_s6 + $0x78] sm:$0xff]  ;;  %s3137_s6 = sshll.u32 %s3298_s17, 4  ;;  %s3138_s6 = int_to_ptr.vmem [resolvable:$false] %s3137_s6 }
 0x357   : > { %v2190_v60 = vmax.f32 %v2158_v63, %v2174_v15  ;;  %v2175_v36 = vmul.f32 0.1, %v2159_v26  ;;  %s3139_s5 = scalar_lea.vmem %s3138_s6, 4096  ;;  %p3140_p6 = scmp.lt.s32.totalorder %s4685_s10, %s3138_s6 }
 0x358   : > { %v2188_v53 = vmax.f32 %v2156_v31, %v2172_v61  ;;  %v2173_v6 = vmul.f32 0.1, %v2157_v58  ;;  %p3141_p8 = scmp.lt.s32.totalorder %s3139_s5, %s3133_s8 }
 0x359   : > { %v2206_v62 = vadd.f32 %v3039_v40, %v2190_v60  ;;  %v2191_v11 = vmax.f32 %v2159_v26, %v2175_v36 }
 0x35a   : > { %v2204_v7 = vadd.f32 %v3040_v17, %v2188_v53  ;;  %v2189_v30 = vmax.f32 %v2157_v58, %v2173_v6  ;;  %p3142_p9 = por %p3141_p8, %p3140_p6 }
 0x35b   : > { %2222 = vst.msk [vmem:[%s4629_s21 + $0x70] sm:$0xff] %vm475_vm1, %v2206_v62  ;;  %v2207_v2 = vadd.f32 %v3041_v4, %v2191_v11 }
 0x35c   : > { %2220 = vst.msk [vmem:[%s4629_s21 + $0x60] sm:$0xff] %vm475_vm1, %v2204_v7  ;;  %v2205_v37 = vadd.f32 %v3042_v32, %v2189_v30  ;;  %p3143_p13 = pnand %p3142_p9, %p3136_p0 }
 0x35d   : > { %2223 = vst.msk [vmem:[%s4629_s21 + $0x78] sm:$0xff] %vm475_vm1, %v2207_v2 }
 0x35e   : > { %2221 = vst.msk [vmem:[%s4629_s21 + $0x68] sm:$0xff] %vm475_vm1, %v2205_v37 }
 0x35f   : > { %3146 = shalt.err (!%p3143_p13)
}
 0x360   : > { %s3147_s13 = scalar_lea.hbm %s4693_s7, 2048  ;;  %s3151_s3 = scalar_lea.hbm %s4990_s16, 8192 }
 0x361   : > { %p3148_p7 = scmp.ne.s32.totalorder %s4693_s7, %s3147_s13  ;;  %p3152_p5 = scmp.lt.u32.totalorder %s4693_s7, %s4990_s16 }
 0x362   : > { %p3153_p2 = scmp.lt.u32.totalorder %s3151_s3, %s3147_s13  ;;  %p3155_p11 = scmp.lt.u32.totalorder %s3147_s13, %s4693_s7 }
 0x363   : > { %p3149_p3 = pnand %p3148_p7, %p4991_p12 }
 0x364   : > { %p3154_p1 = por %p3153_p2, %p3152_p5 }
 0x365   : > { %p3150_p10 = pneg %p3149_p3 }
 0x366   : > { %p3156_p4 = por %p3155_p11, %p3154_p1 }
 0x368   : > { %p3157_p0 = pnand %p3156_p4, %p3150_p10 }
 0x36a   : > { %3160 = shalt.err (!%p3157_p0)
}
 0x36b   : > { %s3299_s4 = smov 128  }
 0x36c   : > { %2643 = dma.vmem_to_hbm [thread:$0]  (%p4991_p12), %s4685_s10, 2048, %s4693_s7, %s4701_s20, %s3299_s4, %s3299_s4, %s3296_s18  }
 0x36d PF: > { %s4992_s15 = sld [smem:[#allocation13_spill]]  ;;  %s4993_s24 = sld [smem:[#allocation23_spill]] }
 0x36e   : > { %p2660_p6 = scmp.ge.s32.totalorder %s3287_s14, 2 }
 0x373   : > { %s2256_s22 = sand.u32 1, %s4992_s15   ;;  %p4994_p8 = scmp.ne.s32.totalorder %s4993_s24, 0 }
 0x374   : > { %s2257_s8 = scalar_lea.sflag [#allocation4], %s2256_s22 }
 0x375   : > { %p2656_p9 = pnand %p2660_p6, %p4994_p8 }
 0x377   : > { %3230 = dma.done.wait (!%p2656_p9), %s2257_s8, 2048  }
 0x378   : > { %3232 = vsyncadd (!%p2656_p9), %s2257_s8, 4294965248  ;;  %s26_s14 = sadd.s32 1, %s3287_s14   ;;  %s4996_s27 = sld [smem:[#allocation14_spill]] }
 0x379   : > { %p4731_p13 = scmp.ge.s32.totalorder %s26_s14, 6   ;;  %s4997_s18 = sld [smem:[#allocation15_spill]] }
 0x37a   : > { %s4998_s10 = smov %s3550_s30  ;;  %s4999_s7 = sld [smem:[#allocation18_spill]] }
 0x37b   : > { %s5000_s20 = sld [smem:[#allocation19_spill]]  ;;  %s5001_s12 = sld [smem:[#allocation20_spill]] }
 0x37c   : > { %s5002_s13 = sld [smem:[#allocation25_spill]]  ;;  %s5003_s24 = smov %s3239_s25 }
 0x37d   : > { %s5004_s25 = smov %s3243_s26  ;;  %s5005_s26 = smov %s3635_s11 }
 0x37e   : > { %s5006_s28 = smov %s3255_s29  ;;  %s5007_s29 = smov %s3559_s19 }
 0x37f   : > { %s5008_s30 = smov %s4997_s18  ;;  %s5009_s8 = smov %s3267_s9 }
 0x380   : > { %s5010_s9 = smov %s4998_s10  ;;  %s5011_s10 = smov %s4999_s7 }
 0x381   : > { %s5012_s11 = smov %s5000_s20  ;;  %25 = sbr.rel (!%p4731_p13) target bundleno = 19 (0x13), region = 119 }
 0x388   :  { %2262 = vsyncpa [#allocation3], 1 }
 0x389   :  { %2264 = vsyncpa [#allocation3 + $0x1], 1 }
 0x38a   :  { %2265 = vsyncpa [#allocation6], 1 }
 0x38b   :  { %2267 = vsyncpa [#allocation6 + $0x1], 1 }
 0x38c   :  { %2268 = vsyncpa [#allocation4], 1 }
 0x38d   :  { %2270 = vsyncpa [#allocation4 + $0x1], 1 }

// kernel: tpu_custom_call.1
= control target key start
LH: loop header
LB: loop body
LE: loop exit
PB: predicated region body
PF: predicated region fallthrough
CT: control target
= control target key end

     0   :  { %s4778_s0 = inlined_call_operand.hbm [shape: f32[2,16,16,16], index: 0, kind: input, shape index: {}]   ;;  %s4779_s1 = inlined_call_operand.hbm [shape: f32[2,16,16,16], index: 1, kind: input, shape index: {}]   ;;  %s4780_s2 = inlined_call_operand.hbm [shape: f32[2,16,16,16], index: 2, kind: input, shape index: {}]   ;;  %s4781_s3 = inlined_call_operand.vmem [shape: bf16[16,8], index: 3, kind: input, shape index: {}]   ;;  %s4782_s4 = inlined_call_operand.vmem [shape: f32[1,8], index: 4, kind: input, shape index: {}]   ;;  %s4783_s5 = inlined_call_operand.vmem [shape: bf16[3,24,16], index: 5, kind: input, shape index: {}]   ;;  %s4784_s6 = inlined_call_operand.vmem [shape: f32[1,16], index: 6, kind: input, shape index: {}]   ;;  %s4785_s7 = inlined_call_operand.hbm [shape: f32[2,16,16,16], index: 7, kind: output, shape index: {}]  }
   0x1   :  { %4842 = sst [smem:[#allocation46_spill]] %s4779_s1 }
   0x2   :  { %4843 = sst [smem:[#allocation47_spill]] %s4781_s3 }
   0x3   :  { %4844 = sst [smem:[#allocation48_spill]] %s4782_s4 }
   0x4   :  { %4845 = sst [smem:[#allocation49_spill]] %s4783_s5 }
   0x5   :  { %4846 = sst [smem:[#allocation50_spill]] %s4784_s6 }
   0x6   :  { %4847 = sst [smem:[#allocation51_spill]] %s4785_s7 }
   0x7   :  { %12 = vsyncpa [#allocation3], 0 }
   0x8   :  { %14 = vsyncpa [#allocation3 + $0x1], 0 }
   0x9   :  { %15 = vsyncpa [#allocation6], 0 }
   0xa   :  { %17 = vsyncpa [#allocation6 + $0x1], 0 }
   0xb   :  { %18 = vsyncpa [#allocation4], 0 }
   0xc   :  { %20 = vsyncpa [#allocation4 + $0x1], 0  ;;  %s3340_s24 = smov 0   ;;  %s3342_s25 = smov 0  }
   0xd   :  { %s3344_s26 = smov 0   ;;  %s3346_s27 = smov 0  }
   0xe   :  { %s3348_s28 = smov 0   ;;  %s3350_s29 = smov 0  }
   0xf   :  { %s3352_s30 = smov 0   ;;  %s3354_s8 = smov 0  }
  0x10   :  { %s3356_s9 = smov 0   ;;  %s3358_s10 = smov 0  }
  0x11   :  { %s3360_s11 = smov 0   ;;  %s3362_s12 = smov 0  }
  0x12   :  { %s3364_s13 = smov 0   ;;  %s3366_s14 = smov 0  }
  0x13 LB: > { %4848 = sst [smem:[#allocation13_spill]] %s3247_s27  ;;  %s3411_s15 = sadd.s32 4294967295, %s3287_s14   ;;  %s3287_s14 = sphi %s3366_s14, %s26_s14   ;;  %s3283_s13 = sphi %s3364_s13, %s5002_s13   ;;  %s3279_s12 = sphi %s3362_s12, %s5001_s12   ;;  %s3275_s11 = sphi %s3360_s11, %s5012_s11   ;;  %s3271_s10 = sphi %s3358_s10, %s5011_s10   ;;  %s3267_s9 = sphi %s3356_s9, %s5010_s9   ;;  %s3263_s8 = sphi %s3354_s8, %s5009_s8   ;;  %s3259_s30 = sphi %s3352_s30, %s5008_s30   ;;  %s3255_s29 = sphi %s3350_s29, %s5007_s29   ;;  %s3251_s28 = sphi %s3348_s28, %s5006_s28   ;;  %s3247_s27 = sphi %s3346_s27, %s4996_s27   ;;  %s3243_s26 = sphi %s3344_s26, %s5005_s26   ;;  %s3239_s25 = sphi %s3342_s25, %s5004_s25   ;;  %s3235_s24 = sphi %s3340_s24, %s5003_s24  }
  0x14   : > { %4849 = sst [smem:[#allocation14_spill]] %s3251_s28  ;;  %s2381_s16 = sadd.s32 4294967294, %s3287_s14  }
  0x15   : > { %4850 = sst [smem:[#allocation15_spill]] %s3263_s8  ;;  %s35_s17 = sadd.s32 1, %s3279_s12 }
  0x16   : > { %4851 = sst [smem:[#allocation16_spill]] %s3271_s10  ;;  %s38_s18 = sadd.s32 1, %s3283_s13 }
  0x17   : > { %4852 = sst [smem:[#allocation17_spill]] %s3275_s11  ;;  %p36_p0 = scmp.ge.s32.totalorder %s35_s17, 2 }
  0x18   : > { %4853 = sst [smem:[#allocation18_spill]] %s3279_s12  ;;  %p4796_p1 = scmp.eq.s32.totalorder %s3287_s14, 0 }
  0x19   : > { %4854 = sst [smem:[#allocation19_spill]] %s3283_s13  ;;  %p4795_p2 = scmp.eq.s32.totalorder %s3411_s15, 0 }
  0x1a   : > { %s5014_s17 = smov (%p36_p0, %s35_s17), 0  ;;  %s5016_s18 = smov (!%p36_p0, %s38_s18), %s3283_s13 }
  0x1b   : > { %4855 = sst [smem:[#allocation20_spill]] %s5014_s17  ;;  %p90_p3 = scmp.ne.s32.totalorder %s3255_s29, %s3251_s28 }
  0x1c   : > { %p96_p4 = scmp.ne.s32.totalorder %s3251_s28, %s3247_s27  ;;  %p242_p5 = scmp.eq.s32.totalorder %s3411_s15, 3 }
  0x1d   : > { %p3433_p6 = por %p90_p3, %p4796_p1  ;;  %p248_p7 = scmp.eq.s32.totalorder %s2381_s16, 3 }
  0x1e   : > { %p3439_p8 = por %p96_p4, %p4795_p2  ;;  %p3443_p9 = por %p242_p5, %p90_p3 }
  0x1f   : > { %p3447_p10 = por %p248_p7, %p96_p4  ;;  %p4794_p11 = scmp.lt.s32.totalorder %s3287_s14, 4 }
  0x20   : > { %s4857_s22 = scalar_select %p3439_p8, 1, 0 }
  0x21   : > { %s4859_s23 = scalar_select %p3443_p9, 1, 0 }
  0x22   : > { %4858 = sst [smem:[#allocation21_spill]] %s4857_s22  ;;  %s3453_s20 = sshll.u32 %s3283_s13, 5 }
  0x23   : > { %4860 = sst [smem:[#allocation22_spill]] %s4859_s23  ;;  %s307_s16 = sand.u32 1, %s3287_s14  }
  0x24   : > { %s4861_s19 = scalar_select %p3447_p10, 1, 0 }
  0x25   : > { %s309_s27 = sand.u32 1, %s3255_s29   ;;  %s2467_s11 = sshll.u32 %s3279_s12, 4 }
  0x26   : > { %4862 = sst [smem:[#allocation23_spill]] %s4861_s19  ;;  %s2396_s7 = sshll.u32 %s309_s27, 7 }
  0x27   : > { %s318_s6 = sadd.s32 %s2467_s11, %s3453_s20  ;;  %s311_s5 = scalar_lea.vmem [#allocation5], %s2396_s7 }
  0x28   : > { %s321_s4 = sshll.u32 %s311_s5, 4  ;;  %s2400_s10 = sshll.u32 %s318_s6, 7  ;;  %s3459_s4 = int_to_ptr.vmem [resolvable:$true] %s321_s4 }
  0x29   : > { %s4863_s1 = sld [smem:[#allocation46_spill]]  ;;  %p3470_p12 = pnand %p4794_p11, %p3433_p6 }
  0x2a   : > { %s3476_s5 = scalar_lea.sflag [#allocation6], %s307_s16 }
  0x2b   : > { %p3045_p4 = pneg %p3470_p12 }
  0x2f   : > { %s3464_s22 = scalar_lea.hbm %s4863_s1, %s2400_s10  ;;  %s3048_s10 = scalar_lea.hbm %s4863_s1, 8192 }
  0x30   : > { %s3043_s6 = scalar_lea.hbm %s3464_s22, 2048  ;;  %p3049_p6 = scmp.lt.u32.totalorder %s3464_s22, %s4863_s1 }
  0x31   : > { %p3044_p3 = scmp.ne.s32.totalorder %s3464_s22, %s3043_s6  ;;  %p3050_p11 = scmp.lt.u32.totalorder %s3048_s10, %s3043_s6 }
  0x32   : > { %p3052_p1 = scmp.lt.u32.totalorder %s3043_s6, %s3464_s22 }
  0x33   : > { %p3046_p5 = pnand %p3045_p4, %p3044_p3  ;;  %p3051_p2 = por %p3050_p11, %p3049_p6 }
  0x35   : > { %p3047_p7 = pneg %p3046_p5  ;;  %p3053_p13 = por %p3052_p1, %p3051_p2 }
  0x37   : > { %p3054_p0 = pnand %p3053_p13, %p3047_p7 }
  0x39   : > { %3057 = shalt.err (!%p3054_p0)
}
  0x3a   : > { %s3058_s23 = scalar_lea.vmem %s3459_s4, 2048  ;;  %s3289_s16 = smov [#allocation5]  }
  0x3b   : > { %p3059_p3 = scmp.ne.s32.totalorder %s3459_s4, %s3058_s23  ;;  %s3063_s3 = sshll.u32 %s3289_s16, 4  ;;  %s3064_s3 = int_to_ptr.vmem [resolvable:$false] %s3063_s3 }
  0x3c   : > { %s3065_s7 = scalar_lea.vmem %s3064_s3, 4096  ;;  %p3066_p9 = scmp.lt.s32.totalorder %s3459_s4, %s3064_s3 }
  0x3d   : > { %p3061_p5 = pnand %p3059_p3, %p3045_p4  ;;  %p3067_p11 = scmp.lt.s32.totalorder %s3065_s7, %s3058_s23 }
  0x3f   : > { %p3062_p10 = pneg %p3061_p5  ;;  %p3068_p6 = por %p3067_p11, %p3066_p9 }
  0x41   : > { %p3069_p1 = pnand %p3068_p6, %p3062_p10 }
  0x43   : > { %3072 = shalt.err (!%p3069_p1)
}
  0x44   : > { %s4798_s6 = smov 128   ;;  %s4800_s10 = smov 8  }
  0x45   : > { %2651 = dma.hbm_to_vmem [thread:$0]  (!%p3470_p12), %s3464_s22, 2048, %s3459_s4, %s3476_s5, %s4798_s6, %s4798_s6, %s4800_s10  }
  0x46   : > { %p4865_p2 = scmp.lt.s32.totalorder %s3287_s14, 5  ;;  %p4866_p9 = scmp.ge.s32.totalorder %s3287_s14, 1 }
  0x47   : > { %p40_p13 = scmp.ge.s32.totalorder %s5016_s18, 2  ;;  %s2382_s21 = sshll.u32 %s3279_s12, 3 }
  0x48   : > { %p3511_p10 = pnand %p4866_p9, %p4865_p2  ;;  %s2383_s23 = sadd.s32 4294967295, %s2382_s21 }
  0x49   : > { %s2384_s16 = sshll.u32 %s5014_s17, 3  ;;  %s5018_s18 = smov (%p40_p13, %s5016_s18), 0 }
  0x4a   : > { %s4867_s11 = scalar_select %p3511_p10, 1, 0 }
  0x4b   : > { %4869 = sst [smem:[#allocation25_spill]] %s5018_s18  ;;  %p44_p12 = scmp.gt.s32.totalorder %s2383_s23, 0 }
  0x4c   : > { %4868 = sst [smem:[#allocation24_spill]] %s4867_s11  ;;  %s2385_s4 = sadd.s32 4294967295, %s2384_s16 }
  0x4d   : > { %p48_p0 = scmp.gt.s32.totalorder %s2385_s4, 0  ;;  %s3523_s22 = ssub.s32 %s3283_s13, %s5018_s18 }
  0x4e   : > { %s5020_s23 = smov (!%p44_p12, %s2383_s23), 0  ;;  %s55_s27 = sadd.s32 1, %s3267_s9 }
  0x4f   : > { %s5022_s4 = smov (!%p48_p0, %s2385_s4), 0  ;;  %p62_p4 = scmp.ne.s32.totalorder %s3267_s9, %s3263_s8 }
  0x50   : > { %s51_s3 = ssub.s32 %s5020_s23, %s5022_s4  ;;  %p68_p7 = scmp.ne.s32.totalorder %s3263_s8, %s3259_s30 }
  0x51   : > { %s52_s7 = sor.u32 %s51_s3, %s3523_s22  ;;  %p4870_p3 = scmp.eq.s32.totalorder %s3287_s14, 0 }
  0x52   : > { %p53_p11 = scmp.eq.s32.totalorder %s52_s7, 0  ;;  %p4872_p6 = scmp.eq.s32.totalorder %s3411_s15, 0 }
  0x53   : > { %p3533_p5 = por %p4870_p3, %p62_p4  ;;  %s4875_s1 = ssub.s32 %s3279_s12, %s5014_s17 }
  0x54   : > { %p3539_p1 = por %p4872_p6, %p68_p7  ;;  %s80_s18 = sor.u32 %s4875_s1, %s3523_s22 }
  0x55   : > { %s3547_s13 = sadd.s32 8, %s2382_s21  ;;  %p81_p2 = scmp.eq.s32.totalorder %s80_s18, 0 }
  0x56   : > { %s4873_s10 = scalar_select %p3539_p1, 1, 0 }
  0x57   : > { %s3550_s30 = scalar_select %p53_p11, %s3267_s9, %s55_s27  }
  0x58   : > { %4874 = sst [smem:[#allocation26_spill]] %s4873_s10  ;;  %s3553_s4 = sadd.s32 8, %s2384_s16 }
  0x59   : > { %s280_s3 = sand.u32 1, %s3267_s9   ;;  %s4876_s7 = sadd.s32 1, %s3255_s29 }
  0x5a   : > { %s3559_s19 = scalar_select %p81_p2, %s3255_s29, %s4876_s7  }
  0x5b   : > { %s2390_s28 = sshll.u32 %s280_s3, 4  ;;  %s2393_s17 = sshll.u32 %s5020_s23, 1 }
  0x5c   : > { %s294_s1 = sadd.s32 %s3453_s20, %s2393_s17  ;;  %s284_s12 = scalar_lea.vmem [#allocation2], %s2390_s28 }
  0x5d   : > { %s2395_s21 = sshll.u32 %s294_s1, 7  ;;  %s297_s10 = sshll.u32 %s284_s12, 4  ;;  %s3568_s10 = int_to_ptr.vmem [resolvable:$true] %s297_s10 }
  0x5e   : > { %s3566_s27 = scalar_lea.hbm %s4778_s0, %s2395_s21  ;;  %p4877_p12 = scmp.lt.s32.totalorder %s3287_s14, 4 }
  0x5f   : > { %s3578_s28 = scalar_lea.sflag [#allocation3], %s280_s3  ;;  %s3073_s12 = scalar_lea.hbm %s3566_s27, 256 }
  0x60   : > { %p3574_p0 = pnand %p4877_p12, %p3533_p5  ;;  %p3074_p4 = scmp.ne.s32.totalorder %s3566_s27, %s3073_s12 }
  0x61   : > { %s3078_s6 = scalar_lea.hbm %s4778_s0, 8192  ;;  %p3079_p5 = scmp.lt.u32.totalorder %s3566_s27, %s4778_s0 }
  0x62   : > { %p3075_p7 = pneg %p3574_p0  ;;  %p3080_p6 = scmp.lt.u32.totalorder %s3078_s6, %s3073_s12 }
  0x63   : > { %p3082_p12 = scmp.lt.u32.totalorder %s3073_s12, %s3566_s27 }
  0x64   : > { %p3076_p3 = pnand %p3075_p7, %p3074_p4  ;;  %p3081_p2 = por %p3080_p6, %p3079_p5 }
  0x66   : > { %p3077_p11 = pneg %p3076_p3  ;;  %p3083_p13 = por %p3082_p12, %p3081_p2 }
  0x68   : > { %p3084_p9 = pnand %p3083_p13, %p3077_p11 }
  0x6a   : > { %3087 = shalt.err (!%p3084_p9)
}
  0x6b   : > { %s3088_s16 = scalar_lea.vmem %s3568_s10, 256  ;;  %s3292_s3 = smov [#allocation2]  }
  0x6c   : > { %p3089_p4 = scmp.ne.s32.totalorder %s3568_s10, %s3088_s16  ;;  %s3093_s7 = sshll.u32 %s3292_s3, 4  ;;  %s3094_s7 = int_to_ptr.vmem [resolvable:$false] %s3093_s7 }
  0x6d   : > { %s3095_s1 = scalar_lea.vmem %s3094_s7, 512  ;;  %p3096_p1 = scmp.lt.s32.totalorder %s3568_s10, %s3094_s7 }
  0x6e   : > { %p3091_p3 = pnand %p3089_p4, %p3075_p7  ;;  %p3097_p5 = scmp.lt.s32.totalorder %s3095_s1, %s3088_s16 }
  0x70   : > { %p3092_p8 = pneg %p3091_p3  ;;  %p3098_p6 = por %p3097_p5, %p3096_p1 }
  0x72   : > { %p3099_p2 = pnand %p3098_p6, %p3092_p8 }
  0x74   : > { %3102 = shalt.err (!%p3099_p2)
}
  0x75   : > { %s4879_s21 = smov 8   ;;  %s4880_s12 = smov 128  }
  0x76   : > { %2648 = dma.hbm_to_vmem [thread:$0]  (!%p3574_p0), %s3566_s27, 256, %s3568_s10, %s3578_s28, %s4880_s12, %s4880_s12, %s4879_s21  }
  0x77   : > { %p4881_p8 = scmp.lt.s32.totalorder %s3547_s13, 15  ;;  %p4882_p1 = scmp.lt.s32.totalorder %s3553_s4, 15 }
  0x78   : > { %s119_s18 = sadd.s32 1, %s3243_s26  ;;  %p126_p9 = scmp.ne.s32.totalorder %s3243_s26, %s3239_s25 }
  0x79   : > { %s5024_s13 = smov (!%p4881_p8, %s3547_s13), 15  ;;  %s5026_s4 = smov (!%p4882_p1, %s3553_s4), 15 }
  0x7a   : > { %s115_s8 = ssub.s32 %s5024_s13, %s5026_s4  ;;  %p132_p13 = scmp.ne.s32.totalorder %s3239_s25, %s3235_s24 }
  0x7b   : > { %s116_s17 = sor.u32 %s115_s8, %s3523_s22  ;;  %p4883_p7 = scmp.eq.s32.totalorder %s3287_s14, 0 }
  0x7c   : > { %p117_p12 = scmp.eq.s32.totalorder %s116_s17, 0  ;;  %p4885_p4 = scmp.eq.s32.totalorder %s3411_s15, 0 }
  0x7d   : > { %p3623_p11 = por %p126_p9, %p4883_p7  ;;  %s333_s27 = sand.u32 1, %s3243_s26  }
  0x7e   : > { %p3629_p3 = por %p132_p13, %p4885_p4  ;;  %s2403_s28 = sshll.u32 %s5024_s13, 1 }
  0x7f   : > { %s3635_s11 = scalar_select %p117_p12, %s3243_s26, %s119_s18  }
  0x80   : > { %s4886_s10 = scalar_select %p3629_p3, 1, 0 }
  0x81   : > { %s2401_s4 = sshll.u32 %s333_s27, 4  ;;  %s345_s23 = sadd.s32 %s2403_s28, %s3453_s20 }
  0x82   : > { %s2405_s24 = sshll.u32 %s345_s23, 7  ;;  %s335_s7 = scalar_lea.vmem [#allocation7], %s2401_s4 }
  0x83   : > { %s3641_s3 = scalar_lea.hbm %s4780_s2, %s2405_s24  ;;  %s348_s1 = sshll.u32 %s335_s7, 4  ;;  %s3643_s1 = int_to_ptr.vmem [resolvable:$true] %s348_s1 }
  0x84   : > { %p4887_p0 = scmp.lt.s32.totalorder %s3287_s14, 4  ;;  %s3103_s20 = scalar_lea.hbm %s3641_s3, 256 }
  0x85   : > { %p3104_p6 = scmp.ne.s32.totalorder %s3641_s3, %s3103_s20  ;;  %s3108_s17 = scalar_lea.hbm %s4780_s2, 8192 }
  0x86   : > { %p3649_p5 = pnand %p4887_p0, %p3623_p11  ;;  %p3109_p9 = scmp.lt.u32.totalorder %s3641_s3, %s4780_s2 }
  0x87   : > { %p3110_p13 = scmp.lt.u32.totalorder %s3108_s17, %s3103_s20  ;;  %p3112_p11 = scmp.lt.u32.totalorder %s3103_s20, %s3641_s3 }
  0x88   : > { %p3105_p2 = pneg %p3649_p5 }
  0x89   : > { %p3111_p7 = por %p3110_p13, %p3109_p9 }
  0x8a   : > { %p3106_p8 = pnand %p3105_p2, %p3104_p6 }
  0x8b   : > { %p3113_p12 = por %p3112_p11, %p3111_p7 }
  0x8c   : > { %p3107_p1 = pneg %p3106_p8 }
  0x8e   : > { %p3114_p4 = pnand %p3113_p12, %p3107_p1 }
  0x90   : > { %3117 = shalt.err (!%p3114_p4)
}
  0x91   : > { %s3118_s28 = scalar_lea.vmem %s3643_s1, 256  ;;  %s3293_s4 = smov [#allocation7]  }
  0x92   : > { %p3119_p0 = scmp.ne.s32.totalorder %s3643_s1, %s3118_s28  ;;  %s3123_s23 = sshll.u32 %s3293_s4, 4  ;;  %s3124_s23 = int_to_ptr.vmem [resolvable:$false] %s3123_s23 }
  0x93   : > { %s3125_s24 = scalar_lea.vmem %s3124_s23, 512  ;;  %p3126_p3 = scmp.lt.s32.totalorder %s3643_s1, %s3124_s23 }
  0x94   : > { %p3121_p6 = pnand %p3119_p0, %p3105_p2  ;;  %p3127_p9 = scmp.lt.s32.totalorder %s3125_s24, %s3118_s28 }
  0x96   : > { %p3122_p8 = pneg %p3121_p6  ;;  %p3128_p13 = por %p3127_p9, %p3126_p3 }
  0x98   : > { %p3129_p7 = pnand %p3128_p13, %p3122_p8 }
  0x9a   : > { %3132 = shalt.err (!%p3129_p7)
}
  0x9b   : > { %2654 = dma.hbm_to_vmem [thread:$0]  (!%p3649_p5), %s3641_s3, 256, %s3643_s1, %s3476_s5, %s4880_s12, %s4880_s12, %s4879_s21  }
  0x9c   : > { %360 = sbr.rel (%p3511_p10) target bundleno = 877 (0x36d), region = 48 }
  0xa3   : > { %s4890_s16 = sld [smem:[#allocation15_spill]]  ;;  %s4891_s7 = sld [smem:[#allocation26_spill]] }
  0xa9   : > { %s362_s20 = sand.u32 1, %s4890_s16   ;;  %p4892_p3 = scmp.ne.s32.totalorder %s4891_s7, 0 }
  0xaa   : > { %s3685_s18 = sshll.u32 %s362_s20, 4  ;;  %s363_s8 = scalar_lea.sflag [#allocation3], %s362_s20 }
  0xab   : > { %s366_s17 = scalar_lea.vmem [#allocation2], %s3685_s18 }
  0xac   : > { %3218 = dma.done.wait (%p4892_p3), %s363_s8, 256  }
  0xad   : > { %3220 = vsyncadd (%p4892_p3), %s363_s8, 4294967040  ;;  %s4893_s13 = sld [smem:[#allocation14_spill]]  ;;  %s4894_s5 = sld [smem:[#allocation21_spill]] }
  0xae   : > { %s371_s21 = sand.u32 1, %s3411_s15  }
  0xaf   : > { %s372_s1 = scalar_lea.sflag [#allocation6], %s371_s21 }
  0xb3   : > { %s373_s12 = sand.u32 1, %s4893_s13   ;;  %p4895_p10 = scmp.ne.s32.totalorder %s4894_s5, 0 }
  0xb4   : > { %s3696_s3 = sshll.u32 %s373_s12, 7 }
  0xb5   : > { %s3699_s6 = scalar_lea.vmem [#allocation5], %s3696_s3 }
  0xb6   : > { %3222 = dma.done.wait (%p4895_p10), %s372_s1, 2048  }
  0xb7   : > { %3224 = vsyncadd (%p4895_p10), %s372_s1, 4294965248  ;;  %s382_s27 = sand.u32 1, %s3239_s25   ;;  %p4896_p5 = scmp.ne.s32.totalorder %s4886_s10, 0 }
  0xb8   : > { %s2409_s28 = sshll.u32 %s382_s27, 4 }
  0xb9   : > { %s384_s4 = scalar_lea.vmem [#allocation7], %s2409_s28 }
  0xba   : > { %3226 = dma.done.wait (%p4896_p5), %s372_s1, 256  }
  0xbb   : > { %3228 = vsyncadd (%p4896_p5), %s372_s1, 4294967040  ;;  %v3294_v0 = vmov 0.0   ;;  %vm3295_vm0 = vmmov 0   ;;  %s4897_s24 = sld [smem:[#allocation47_spill]]  ;;  %v439_v2 = vld [vmem:[%s3699_s6] sm:$0xff]  ;;  %v440_v3 = vld [vmem:[%s3699_s6 + $0x8] sm:$0xff]  ;;  %v743_v32 = vlaneseq }
  0xbc   : > { %2536 = vmatprep.subr.bf16.mxu1 %v3294_v0  ;;  %2538 = vmatprep.mubr.msk.bf16.mxu1 %vm3295_vm0, %v3294_v0  ;;  %vm475_vm1 = vcmask 130048   ;;  %v441_v4 = vld [vmem:[%s3699_s6 + $0x10] sm:$0xff]  ;;  %v455_v5 = vpack.c.bf16 %v440_v3, %v439_v2  ;;  %v442_v6 = vld [vmem:[%s3699_s6 + $0x18] sm:$0xff]  ;;  %v443_v7 = vld [vmem:[%s3699_s6 + $0x20] sm:$0xff]  ;;  %s4898_s10 = sld [smem:[#allocation16_spill]]  ;;  %s4899_s7 = sld [smem:[#allocation48_spill]] }
  0xbd   : > { %v444_v8 = vld [vmem:[%s3699_s6 + $0x28] sm:$0xff]  ;;  %v456_v9 = vpack.c.bf16 %v442_v6, %v441_v4  ;;  %v445_v11 = vld [vmem:[%s3699_s6 + $0x30] sm:$0xff]  ;;  %v446_v12 = vld [vmem:[%s3699_s6 + $0x38] sm:$0xff]  ;;  %v3745_v33 = vshrl.u32 %v743_v32, 7  ;;  %s3296_s18 = smov 8   ;;  %s3297_s8 = smov 16  }
  0xbe   : > { %v457_v10 = vpack.c.bf16 %v444_v8, %v443_v7  ;;  %2514 = vmatprep.mubr.msk.bf16.mxu0 %vm475_vm1, %v455_v5  ;;  %v687_v13 = vld [vmem:[%s384_s4] sm:$0xff]  ;;  %v688_v14 = vld [vmem:[%s384_s4 + $0x8] sm:$0xff]  ;;  %v458_v18 = vpack.c.bf16 %v446_v12, %v445_v11  ;;  %s4929_s1 = sld [smem:[#allocation49_spill]]  ;;  %s4987_s5 = sld [smem:[#allocation50_spill]] }
  0xbf   : > { %v447_v15 = vld [vmem:[%s3699_s6 + $0x40] sm:$0xff]  ;;  %v448_v16 = vld [vmem:[%s3699_s6 + $0x48] sm:$0xff]  ;;  %v689_v17 = vpack.c.bf16 %v688_v14, %v687_v13  ;;  %v449_v20 = vld [vmem:[%s3699_s6 + $0x50] sm:$0xff]  ;;  %v748_v34 = vadd.s32 32, %v3745_v33  ;;  %v747_v35 = vadd.s32 24, %v3745_v33  ;;  %v750_v38 = vadd.s32 48, %v3745_v33 }
  0xc0   : > { %v459_v19 = vpack.c.bf16 %v448_v16, %v447_v15  ;;  %v450_v21 = vld [vmem:[%s3699_s6 + $0x58] sm:$0xff]  ;;  %v451_v22 = vld [vmem:[%s3699_s6 + $0x60] sm:$0xff]  ;;  %v452_v23 = vld [vmem:[%s3699_s6 + $0x68] sm:$0xff]  ;;  %v3757_v39 = vadd.s32 64, %v3745_v33  ;;  %v3760_v40 = vadd.s32 80, %v3745_v33  ;;  %vm1044_vm2 = vcmp.lt.s32.totalorder %v3745_v33, 1 }
  0xc1   : > { %v3020_v1 = vld [vmem:[%s4897_s24] sm:$0xff]   ;;  %v460_v24 = vpack.c.bf16 %v450_v21, %v449_v20  ;;  %v461_v25 = vpack.c.bf16 %v452_v23, %v451_v22  ;;  %v453_v26 = vld [vmem:[%s3699_s6 + $0x70] sm:$0xff]  ;;  %v454_v27 = vld [vmem:[%s3699_s6 + $0x78] sm:$0xff]  ;;  %v796_v37 = vand.u32 15, %v748_v34  ;;  %v789_v42 = vand.u32 15, %v747_v35  ;;  %s4629_s21 = scalar_lea.vmem [#allocation8], %s3696_s3 }
  0xc2   : > { %2512 = vmatprep.subr.bf16.mxu0 %v3020_v1  ;;  %2537 = vmatpush3.bf16.msra.mxu1 %v3020_v1  ;;  %v462_v28 = vpack.c.bf16 %v454_v27, %v453_v26  ;;  %v630_v29 = vld [vmem:[%s366_s17] sm:$0xff]  ;;  %v631_v30 = vld [vmem:[%s366_s17 + $0x8] sm:$0xff]  ;;  %p686_p2 = scmp.lt.s32.totalorder %s4898_s10, 1  ;;  %v3767_v45 = vadd.s32 96, %v3745_v33  ;;  %v3770_v46 = vadd.s32 40, %v3745_v33  ;;  %vm1165_vm4 = vcmp.lt.s32.totalorder %v3745_v33, 7 }
  0xc3   : > { %2513 = vmatpush3.bf16.msra.mxu0 %v3020_v1  ;;  %v632_v31 = vpack.c.bf16 %v631_v30, %v630_v29  ;;  %v3753_v36 = vld [vmem:[%s4899_s7] ss:$0 sm:$0xff]  ;;  %vm3773_vm3 = vcmp.ge.s32.totalorder %v796_v37, 1  ;;  %v810_v50 = vand.u32 15, %v750_v38  ;;  %v824_v55 = vand.u32 15, %v3757_v39  ;;  %p629_p1 = scmp.gt.s32.totalorder %s4898_s10, 0 }
  0xc4   : > { %2530 = vmatprep.subr.bf16.mxu0 %v3294_v0  ;;  %s3762_s20 = scalar_select %p686_p2, 1, 0  ;;  %v838_v56 = vand.u32 15, %v3760_v40  ;;  %vm3782_vm5 = vcmp.lt.s32.totalorder %v789_v42, 15  ;;  %v852_v2 = vand.u32 15, %v3767_v45  ;;  %v803_v3 = vand.u32 15, %v3770_v46 }
  0xc5   : > { %2539 = vmatmul.mubr.msk.bf16.vlgmr.msra.gmra.mrb[0].mxu1 %vm475_vm1, %v689_v17  ;;  %v3804_v11 = vadd.s32 112, %v3745_v33  ;;  %v3807_v12 = vadd.s32 144, %v3745_v33  ;;  %vm3813_vm7 = vcmp.ge.s32.totalorder %v810_v50, 1  ;;  %vm3845_vm8 = vcmp.ge.s32.totalorder %v824_v55, 1  ;;  %s3923_s17 = scalar_select %p629_p1, 1, 0 }
  0xc6   : > { %2515 = vmatmul.mubr.msk.bf16.vlgmr.msra.gmra.mrb[0].mxu0 %vm475_vm1, %v456_v9  ;;  %v739_v61 = vstv %s3762_s20  ;;  %vm3884_vm9 = vcmp.ge.s32.totalorder %v838_v56, 1  ;;  %vm3910_vm10 = vcmp.ge.s32.totalorder %v852_v2, 1  ;;  %vm4082_vm15 = vcmp.lt.s32.totalorder %v803_v3, 15  ;;  %s4988_s3 = sld [smem:[#allocation17_spill]]  ;;  %s2468_s27 = sshll.u32 %s4898_s10, 4 }
  0xc7   : > { %2531 = vmatpush3.bf16.msra.mxu0 %v3020_v1  ;;  %2518 = vmatprep.mubr.msk.bf16.mxu0 %vm475_vm1, %v457_v10  ;;  %vm3799_vm6 = vcmp.eq.s32.totalorder %v739_v61, 1  ;;  %v866_v49 = vand.u32 15, %v3804_v11  ;;  %s2241_s10 = sshll.u32 %s4629_s21, 4  ;;  %s4989_s23 = sld [smem:[#allocation22_spill]]  ;;  %s4685_s10 = int_to_ptr.vmem [resolvable:$true] %s2241_s10 }
  0xc8   : > { %s4990_s16 = sld [smem:[#allocation51_spill]]  ;;  %s4701_s20 = scalar_lea.sflag [#allocation4], %s373_s12 }
  0xc9   : > { %vm3961_vm11 = vcmp.ge.s32.totalorder %v866_v49, 1 }
  0xcc   : > { %s2463_s28 = sshll.u32 %s4988_s3, 5 }
  0xcd   : > { %s2238_s4 = sadd.s32 %s2468_s27, %s2463_s28  ;;  %p4991_p12 = scmp.ne.s32.totalorder %s4989_s23, 0 }
  0xce   : > { %2519 = vmatmul.mubr.msk.bf16.gmra.mrb[4].mxu0 %vm475_vm1, %v458_v18  ;;  %s2464_s15 = sshll.u32 %s2238_s4, 7 }
  0xcf   : > { %2522 = vmatprep.mubr.msk.bf16.mxu0 %vm475_vm1, %v459_v19  ;;  %s4693_s7 = scalar_lea.hbm %s4990_s16, %s2464_s15 }
  0xd6   : > { %2523 = vmatmul.mubr.msk.bf16.gmra.mrb[8].mxu0 %vm475_vm1, %v460_v24 }
  0xd7   : > { %2526 = vmatprep.mubr.msk.bf16.mxu0 %vm475_vm1, %v461_v25 }
  0xde   : > { %2527 = vmatmul.mubr.msk.bf16.gmra.mrb[12].mxu0 %vm475_vm1, %v462_v28 }
  0xdf   : > { %2532 = vmatprep.mubr.msk.bf16.mxu0 %vm3295_vm0, %v3294_v0 }
  0xe6   : > { %2533 = vmatmul.mubr.msk.bf16.vlgmr.msra.gmra.mrb[16].mxu0 %vm475_vm1, %v632_v31 }
 0x198   : > { %v727_v54 = vpop.f32.mrb[0].mxu1 }
 0x199   : > { %v2516_v41 = vpop.f32.mrb[0].mxu0  ;;  %v728_v60 = vadd.f32 %v3753_v36, %v727_v54  ;;  %v2540_v62 = vpop.f32.mrb[1].mxu1  ;;  %v894_v54 = vand.u32 15, %v3807_v12 }
 0x19a   : > { %v543_v43 = vadd.f32 %v2516_v41, %v3753_v36  ;;  %v534_v44 = vpop.f32.mrb[1].mxu0  ;;  %v730_v1 = vpop.f32.mrb[2].mxu1 }
 0x19b   : > { %v535_v47 = vadd.f32 %v3753_v36, %v534_v44  ;;  %v2517_v48 = vpop.f32.mrb[2].mxu0  ;;  %v734_v6 = vmul.f32 0.1, %v728_v60  ;;  %v3795_v7 = vadd.f32 %v3753_v36, %v730_v1  ;;  %v2541_v8 = vpop.f32.mrb[3].mxu1  ;;  %vm4003_vm12 = vcmp.ge.s32.totalorder %v894_v54, 1 }
 0x19c   : > { %v599_v51 = vmul.f32 0.1, %v543_v43  ;;  %v546_v52 = vadd.f32 %v2517_v48, %v3753_v36  ;;  %v537_v53 = vpop.f32.mrb[3].mxu0 }
 0x19d   : > { %v597_v57 = vmul.f32 0.1, %v535_v47  ;;  %v538_v58 = vadd.f32 %v3753_v36, %v537_v53  ;;  %v736_v18 = vmax.f32 %v728_v60, %v734_v6  ;;  %v735_v23 = vmul.f32 0.1, %v3795_v7 }
 0x19e   : > { %v3788_v63 = vmax.f32 %v543_v43, %v599_v51  ;;  %v600_v0 = vmul.f32 0.1, %v546_v52  ;;  %v3871_v53 = vadd.s32 128, %v3745_v33 }
 0x19f   : > { %v3792_v4 = vmax.f32 %v535_v47, %v597_v57  ;;  %v598_v5 = vmul.f32 0.1, %v538_v58  ;;  %v3833_v34 = vsel %vm3799_vm6, %v736_v18, 0.0  ;;  %v737_v60 = vmax.f32 %v3795_v7, %v735_v23 }
 0x1a0   : > { %v3797_v9 = vmax.f32 %v546_v52, %v600_v0  ;;  %v1028_v15 = vrot.slane %v3788_v63, 7  ;;  %v4818_v16 = vrot.slane %v3788_v63, 1 }
 0x1a1   : > { %v3809_v13 = vmax.f32 %v538_v58, %v598_v5  ;;  %v2520_v14 = vpop.f32.mrb[4].mxu0  ;;  %v4817_v22 = vrot.slane %v3792_v4, 1  ;;  %v1042_v5 = vrot.slane %v3833_v34, 7  ;;  %v3900_v11 = vsel %vm3799_vm6, %v737_v60, 0.0 }
 0x1a2   : > { %v559_v19 = vadd.f32 %v2520_v14, %v3753_v36  ;;  %v550_v20 = vpop.f32.mrb[5].mxu0  ;;  %v1029_v21 = vrot.slane %v3797_v9, 7 }
 0x1a3   : > { %v551_v24 = vadd.f32 %v3753_v36, %v550_v20  ;;  %v2521_v25 = vpop.f32.mrb[6].mxu0  ;;  %v2780_v26 = vpack.i.bf16 %v3809_v13, %v3792_v4  ;;  %v1027_v27 = vrot.slane %v3809_v13, 7  ;;  %v1148_v28 = vrot.slane %v3809_v13, 1 }
 0x1a4   : > { %v603_v29 = vmul.f32 0.1, %v559_v19  ;;  %v562_v30 = vadd.f32 %v2521_v25, %v3753_v36  ;;  %v553_v31 = vpop.f32.mrb[7].mxu0  ;;  %v3829_v32 = vsel %vm1044_vm2, %v1028_v15, %v1029_v21  ;;  %v4816_v20 = vrot.slane %v3900_v11, 7 }
 0x1a5   : > { %v601_v35 = vmul.f32 0.1, %v551_v24  ;;  %v554_v37 = vadd.f32 %v3753_v36, %v553_v31  ;;  %2781 = vrot.lane.b32.xlu0 %v2780_v26, %s3296_s18  ;;  %v1060_v38 = vsel %vm1044_vm2, %v1027_v27, %v1028_v15  ;;  %v1181_v39 = vsel %vm1165_vm4, %v1148_v28, %v4818_v16 }
 0x1a6   : > { %v3849_v42 = vmax.f32 %v559_v19, %v603_v29  ;;  %v604_v43 = vmul.f32 0.1, %v562_v30  ;;  %v3853_v44 = vsel %vm3773_vm3, %v1060_v38, 0.0  ;;  %v3859_v47 = vsel %vm1165_vm4, %v4817_v22, %v1148_v28 }
 0x1a7   : > { %v3861_v48 = vmax.f32 %v551_v24, %v601_v35  ;;  %v602_v50 = vmul.f32 0.1, %v554_v37  ;;  %v2790_v51 = vpack.i.bf16 %v3829_v32, %v3853_v44  ;;  %v3867_v52 = vsel %vm3782_vm5, %v1181_v39, 0.0 }
 0x1a8   : > { %4910 = vst [vmem:[#allocation27_spill] sm:$0xff] %v3849_v42  ;;  %v3874_v55 = vmax.f32 %v562_v30, %v604_v43  ;;  %v2795_v1 = vpack.i.bf16 %v3867_v52, %v3859_v47  ;;  %v1032_v6 = vrot.slane %v3849_v42, 7  ;;  %v880_v30 = vand.u32 15, %v3871_v53 }
 0x1a9   : > { %v3876_v57 = vmax.f32 %v554_v37, %v602_v50  ;;  %v2524_v58 = vpop.f32.mrb[8].mxu0  ;;  %2791 = vrot.lane.b32.xlu1 %v2790_v51, %s3297_s8  ;;  %2786 = vrot.lane.b32.xlu0 %v2790_v51, %s3296_s18  ;;  %v1030_v59 = vrot.slane %v3861_v48, 7  ;;  %v3947_v37 = vsel %vm1044_vm2, %v1042_v5, %v4816_v20  ;;  %v3950_v38 = vadd.s32 56, %v3745_v33 }
 0x1aa   : > { %v575_v62 = vadd.f32 %v2524_v58, %v3753_v36  ;;  %v566_v0 = vpop.f32.mrb[9].mxu0  ;;  %v1033_v17 = vrot.slane %v3874_v55, 7  ;;  %v682_v51 = vstv %s3923_s17  ;;  %vm4010_vm13 = vcmp.ge.s32.totalorder %v880_v30, 1  ;;  %s3298_s17 = smov [#allocation8]  }
 0x1ab   : > { %v567_v8 = vadd.f32 %v3753_v36, %v566_v0  ;;  %v2525_v7 = vpop.f32.mrb[10].mxu0  ;;  %v1031_v40 = vrot.slane %v3876_v57, 7  ;;  %v1058_v56 = vsel %vm1044_vm2, %v1029_v21, %v1030_v59  ;;  %v3970_v0 = vadd.s32 16, %v3745_v33 }
 0x1ac   : > { %v607_v14 = vmul.f32 0.1, %v575_v62  ;;  %v578_v15 = vadd.f32 %v2525_v7, %v3753_v36  ;;  %v569_v18 = vpop.f32.mrb[11].mxu0  ;;  %v3905_v19 = vsel %vm3813_vm7, %v1058_v56, 0.0  ;;  %v3957_v41 = vsel %vm1044_vm2, %v1032_v6, %v1033_v17 }
 0x1ad   : > { %v605_v21 = vmul.f32 0.1, %v567_v8  ;;  %v570_v10 = vadd.f32 %v3753_v36, %v569_v18  ;;  %2796 = vrot.lane.b32.xlu1 %v2795_v1, %s3296_s18  ;;  %v3918_v24 = vsel %vm1044_vm2, %v1030_v59, %v1031_v40  ;;  %v1056_v29 = vsel %vm1044_vm2, %v1031_v40, %v1032_v6 }
 0x1ae   : > { %v3925_v25 = vmax.f32 %v575_v62, %v607_v14  ;;  %v608_v45 = vmul.f32 0.1, %v578_v15  ;;  %v2805_v2 = vpack.i.bf16 %v3918_v24, %v3905_v19  ;;  %v3939_v35 = vsel %vm3845_vm8, %v1056_v29, 0.0 }
 0x1af   : > { %v3929_v26 = vmax.f32 %v567_v8, %v605_v21  ;;  %v606_v28 = vmul.f32 0.1, %v570_v10  ;;  %v2815_v60 = vpack.i.bf16 %v3957_v41, %v3939_v35  ;;  %v817_v23 = vand.u32 15, %v3950_v38 }
 0x1b0   : > { %4915 = vst [vmem:[#allocation28_spill] sm:$0xff] %v3925_v25  ;;  %v3934_v31 = vmax.f32 %v578_v15, %v608_v45  ;;  %2806 = vrot.lane.b32.xlu0 %v2805_v2, %s3296_s18  ;;  %v1036_v62 = vrot.slane %v3925_v25, 7  ;;  %vm4018_vm14 = vcmp.eq.s32.totalorder %v682_v51, 1 }
 0x1b1   : > { %4916 = vst [vmem:[#allocation29_spill] sm:$0xff] %v3929_v26  ;;  %v3952_v39 = vmax.f32 %v570_v10, %v606_v28  ;;  %v2528_v43 = vpop.f32.mrb[12].mxu0  ;;  %2801 = vrot.lane.b32.xlu1 %v2805_v2, %s3297_s8  ;;  %v1034_v50 = vrot.slane %v3929_v26, 7  ;;  %vm4089_vm3 = vcmp.lt.s32.totalorder %v817_v23, 15 }
 0x1b2   : > { %4917 = vst [vmem:[#allocation30_spill] sm:$0xff] %v3934_v31  ;;  %v591_v58 = vadd.f32 %v2528_v43, %v3753_v36  ;;  %v582_v59 = vpop.f32.mrb[13].mxu0  ;;  %v1037_v15 = vrot.slane %v3934_v31, 7 }
 0x1b3   : > { %4918 = vst [vmem:[#allocation31_spill] sm:$0xff] %v3952_v39  ;;  %v583_v1 = vadd.f32 %v3753_v36, %v582_v59  ;;  %v2529_v6 = vpop.f32.mrb[14].mxu0  ;;  %v1035_v8 = vrot.slane %v3952_v39, 7  ;;  %v1054_v49 = vsel %vm1044_vm2, %v1033_v17, %v1034_v50 }
 0x1b4   : > { %v611_v7 = vmul.f32 0.1, %v591_v58  ;;  %v594_v40 = vadd.f32 %v2529_v6, %v3753_v36  ;;  %v585_v56 = vpop.f32.mrb[15].mxu0  ;;  %2816 = vrot.lane.b32.xlu0 %v2815_v60, %s3297_s8  ;;  %v3980_v14 = vsel %vm3884_vm9, %v1054_v49, 0.0  ;;  %v4025_v54 = vsel %vm1044_vm2, %v1036_v62, %v1037_v15 }
 0x1b5   : > { %v609_v18 = vmul.f32 0.1, %v583_v1  ;;  %v586_v21 = vadd.f32 %v3753_v36, %v585_v56  ;;  %2811 = vrot.lane.b32.xlu1 %v2815_v60, %s3296_s18  ;;  %v3987_v10 = vsel %vm1044_vm2, %v1034_v50, %v1035_v8  ;;  %v1052_v17 = vsel %vm1044_vm2, %v1035_v8, %v1036_v62  ;;  %v3021_v62 = vld [vmem:[%s4929_s1] sm:$0xff]  }
 0x1b6   : > { %v3991_v45 = vmax.f32 %v591_v58, %v611_v7  ;;  %v612_v2 = vmul.f32 0.1, %v594_v40  ;;  %v2825_v61 = vpack.i.bf16 %v3987_v10, %v3980_v14  ;;  %v3999_v43 = vsel %vm3910_vm10, %v1052_v17, 0.0  ;;  %2562 = vmatprep.subr.bf16.mxu1 %v3021_v62 }
 0x1b7   : > { %v3995_v28 = vmax.f32 %v583_v1, %v609_v18  ;;  %v610_v29 = vmul.f32 0.1, %v586_v21  ;;  %v782_v60 = vand.u32 15, %v3970_v0  ;;  %v757_v8 = vadd.s32 104, %v3745_v33  ;;  %2563 = vmatpush3.bf16.msra.mxu1 %v3021_v62 }
 0x1b8   : > { %v4007_v59 = vmax.f32 %v594_v40, %v612_v2  ;;  %2826 = vrot.lane.b32.xlu0 %v2825_v61, %s3296_s18  ;;  %v2835_v51 = vpack.i.bf16 %v4025_v54, %v3999_v43  ;;  %v1040_v49 = vrot.slane %v3991_v45, 7 }
 0x1b9   : > { %4921 = vst [vmem:[#allocation32_spill] sm:$0xff] %v3995_v28  ;;  %v4016_v1 = vmax.f32 %v586_v21, %v610_v29  ;;  %v670_v6 = vpop.f32.mrb[16].mxu0  ;;  %2821 = vrot.lane.b32.xlu1 %v2825_v61, %s3297_s8  ;;  %v1038_v30 = vrot.slane %v3995_v28, 7  ;;  %v761_v21 = vadd.s32 136, %v3745_v33  ;;  %vm1006_vm0 = vcmp.ge.s32.totalorder %v782_v60, 1 }
 0x1ba   : > { %v4030_v0 = vadd.f32 %v3753_v36, %v670_v6  ;;  %v2534_v38 = vpop.f32.mrb[17].mxu0  ;;  %v1041_v7 = vrot.slane %v4007_v59, 7  ;;  %v759_v6 = vadd.s32 120, %v3745_v33  ;;  %v4824_v12 = vrot.slane %v3995_v28, 1 }
 0x1bb   : > { %4926 = vst [vmem:[#allocation33_spill] sm:$0xff] %v4016_v1  ;;  %v673_v40 = vpop.f32.mrb[18].mxu0  ;;  %v1039_v56 = vrot.slane %v4016_v1, 7  ;;  %v1050_v18 = vsel %vm1044_vm2, %v1037_v15, %v1038_v30  ;;  %v763_v38 = vadd.s32 152, %v3745_v33  ;;  %v887_v16 = vand.u32 15, %v761_v21 }
 0x1bc   : > { %v674_v17 = vadd.f32 %v3753_v36, %v673_v40  ;;  %v2535_v2 = vpop.f32.mrb[19].mxu0  ;;  %2836 = vrot.lane.b32.xlu0 %v2835_v51, %s3297_s8  ;;  %v4047_v61 = vsel %vm3961_vm11, %v1050_v18, 0.0  ;;  %v1047_v29 = vsel %vm1044_vm2, %v1040_v49, %v1041_v7  ;;  %v1046_v53 = vsel %vm1044_vm2, %v1041_v7, %v1042_v5 }
 0x1bd   : > { %2831 = vrot.lane.b32.xlu1 %v2835_v51, %s3296_s18  ;;  %v4055_v15 = vsel %vm1044_vm2, %v1038_v30, %v1039_v56  ;;  %v1048_v36 = vsel %vm1044_vm2, %v1039_v56, %v1040_v49  ;;  %v745_v51 = vadd.s32 8, %v3745_v33  ;;  %v1123_v49 = vsel %vm4003_vm12, %v1046_v53, 0.0 }
 0x1be   : > { %v678_v40 = vmul.f32 0.1, %v674_v17  ;;  %v2845_v18 = vpack.i.bf16 %v4055_v15, %v4047_v61  ;;  %v1121_v30 = vsel %vm4010_vm13, %v1048_v36, 0.0  ;;  %v4821_v56 = vrot.slane %v3861_v48, 1 }
 0x1bf   : > { %v859_v2 = vand.u32 15, %v757_v8  ;;  %v677_v5 = vmul.f32 0.1, %v4030_v0  ;;  %v2860_v62 = vpack.i.bf16 %v1047_v29, %v1121_v30  ;;  %v2850_v20 = vpack.i.bf16 %v3947_v37, %v1123_v49 }
 0x1c0   : > { %v680_v7 = vmax.f32 %v674_v17, %v678_v40  ;;  %2846 = vrot.lane.b32.xlu0 %v2845_v18, %s3296_s18  ;;  %v873_v22 = vand.u32 15, %v759_v6  ;;  %v901_v58 = vand.u32 15, %v763_v38  ;;  %v1150_v17 = vrot.slane %v3797_v9, 1  ;;  %v4256_v40 = vld [vmem:[%s4929_s1 + $0x18] sm:$0xff]  }
 0x1c1   : > { %2841 = vrot.lane.b32.xlu1 %v2845_v18, %s3297_s8  ;;  %v775_v29 = vand.u32 15, %v745_v51  ;;  %v1026_v6 = vrot.slane %v3792_v4, 7  ;;  %v768_v36 = vand.u32 15, %v3745_v33  ;;  %v679_v46 = vmax.f32 %v4030_v0, %v677_v5  ;;  %v3023_v5 = vld [vmem:[%s4929_s1 + $0xc] sm:$0xff]  }
 0x1c2   : > { %v4078_v50 = vsel %vm4018_vm14, %v680_v7, 0.0  ;;  %v1179_v3 = vsel %vm1165_vm4, %v1150_v17, %v4821_v56  ;;  %v4101_v53 = vadd.s32 72, %v3745_v33  ;;  %vm4103_vm5 = vcmp.lt.s32.totalorder %v859_v2, 15  ;;  %2542 = vmatprep.subr.bf16.mxu0 %v3023_v5 }
 0x1c3   : > { %v4819_v37 = vrot.slane %v4078_v50, 7  ;;  %vm4112_vm6 = vcmp.lt.s32.totalorder %v873_v22, 15  ;;  %vm4116_vm7 = vcmp.lt.s32.totalorder %v887_v16, 15  ;;  %vm4120_vm8 = vcmp.lt.s32.totalorder %v901_v58, 15  ;;  %2543 = vmatpush3.bf16.msra.mxu0 %v3023_v5 }
 0x1c4   : > { %2861 = vrot.lane.b32.xlu0 %v2860_v62, %s3297_s8  ;;  %v1152_v22 = vrot.slane %v3876_v57, 1  ;;  %vm4133_vm9 = vcmp.lt.s32.totalorder %v775_v29, 15  ;;  %v1163_v16 = vrot.slane %v3833_v34, 1  ;;  %v2875_v49 = vpack.i.bf16 %v3797_v9, %v3788_v63 }
 0x1c5   : > { %2851 = vrot.lane.b32.xlu1 %v2850_v20, %s3297_s8  ;;  %v1062_v23 = vsel %vm1044_vm2, %v4819_v37, %v1026_v6  ;;  %v4128_v20 = vsel %vm1044_vm2, %v1026_v6, %v1027_v27  ;;  %v4144_v27 = vsel %vm4082_vm15, %v1179_v3, 0.0  ;;  %vm4146_vm10 = vcmp.ge.s32.totalorder %v768_v36, 1 }
 0x1c6   : > { %v4130_v18 = vsel %vm1006_vm0, %v1062_v23, 0.0  ;;  %4944 = vst [vmem:[#allocation34_spill] sm:$0xff] %v4144_v27  ;;  %v1164_v7 = vrot.slane %v3900_v11, 1  ;;  %v4156_v58 = vsel %vm4018_vm14, %v679_v46, 0.0  ;;  %v4820_v29 = vrot.slane %v3849_v42, 1 }
 0x1c7   : > { %v2865_v30 = vpack.i.bf16 %v4128_v20, %v4130_v18  ;;  %v1161_v8 = vrot.slane %v3991_v45, 1  ;;  %v4947_v6 = vrot.slane %v3788_v63, 1  ;;  %v1158_v3 = vrot.slane %v3934_v31, 1 }
 0x1c8   : > { %v1160_v23 = vrot.slane %v4016_v1, 1  ;;  %v1162_v37 = vrot.slane %v4007_v59, 1  ;;  %v4951_v5 = vrot.slane %v3861_v48, 1  ;;  %v4954_v38 = vrot.slane %v3792_v4, 1 }
 0x1c9   : > { %2856 = vrot.lane.b32.xlu1 %v2860_v62, %s3296_s18  ;;  %2866 = vrot.lane.b32.xlu0 %v2865_v30, %s3296_s18  ;;  %v4166_v36 = vsel %vm1165_vm4, %v4947_v6, %v1150_v17  ;;  %v1177_v62 = vsel %vm1165_vm4, %v1152_v22, %v4820_v29  ;;  %v4179_v30 = vpack.i.bf16 %v4007_v59, %v3991_v45  ;;  %v1145_v17 = vrot.slane %v4156_v58, 1 }
 0x1ca   : > { %4948 = vst [vmem:[#allocation35_spill] sm:$0xff] %v4166_v36  ;;  %v2885_v46 = vpack.i.bf16 %v4144_v27, %v4166_v36  ;;  %v1171_v6 = vsel %vm1165_vm4, %v1158_v3, %v4824_v12  ;;  %v1146_v29 = vrot.slane %v4078_v50, 1  ;;  %v1169_v45 = vsel %vm1165_vm4, %v1160_v23, %v1161_v8 }
 0x1cb   : > { %v4192_v56 = vsel %vm4103_vm5, %v1171_v6, 0.0  ;;  %v1166_v36 = vsel %vm1165_vm4, %v1163_v16, %v1164_v7  ;;  %v1024_v27 = vrot.slane %v4156_v58, 7  ;;  %v4205_v59 = vsel %vm4112_vm6, %v1169_v45, 0.0  ;;  %v3025_v45 = vld [vmem:[%s4929_s1 + $0x14] ss:$0 sps:$4 sm:$0xff]  }
 0x1cc   : > { %4949 = vst [vmem:[#allocation36_spill] sm:$0xff] %v4192_v56  ;;  %4950 = vst [vmem:[#allocation37_spill] sm:$0xff] %v4205_v59  ;;  %v1167_v60 = vsel %vm1165_vm4, %v1162_v37, %v1163_v16  ;;  %v4213_v6 = vsel %vm1165_vm4, %v4951_v5, %v1152_v22  ;;  %v4217_v12 = vsel %vm4089_vm3, %v1177_v62, 0.0  ;;  %v3022_v16 = vld [vmem:[%s4929_s1 + $0x8] ss:$0 sps:$4 sm:$0xff]   ;;  %v1185_v21 = vsel %vm1165_vm4, %v1164_v7, %v1145_v17 }
 0x1cd   : > { %2876 = vrot.lane.b32.xlu1 %v2875_v49, %s3297_s8  ;;  %2871 = vrot.lane.b32.xlu0 %v2875_v49, %s3296_s18  ;;  %4952 = vst [vmem:[#allocation38_spill] sm:$0xff] %v4213_v6  ;;  %4953 = vst [vmem:[#allocation39_spill] sm:$0xff] %v4217_v12  ;;  %v1168_v49 = vsel %vm1165_vm4, %v1161_v8, %v1162_v37  ;;  %v1243_v0 = vsel %vm4116_vm7, %v1167_v60, 0.0  ;;  %v1245_v37 = vsel %vm4120_vm8, %v1185_v21, 0.0  ;;  %v4955_v5 = vrot.slane %v4078_v50, 7 }
 0x1ce   : > { %v4229_v22 = vpack.i.bf16 %v1243_v0, %v1168_v49  ;;  %v4241_v8 = vsel %vm1165_vm4, %v1146_v29, %v4954_v38  ;;  %v4245_v60 = vsel %vm1165_vm4, %v1145_v17, %v1146_v29  ;;  %v3015_v49 = vpack.i.bf16 %v1245_v37, %v1166_v36 }
 0x1cf   : > { %v4251_v7 = vsel %vm1044_vm2, %v1024_v27, %v4955_v5  ;;  %v4956_v17 = vrot.slane %v3900_v11, 7  ;;  %vm1596_vm11 = vcmask 1043456   ;;  %v2895_v37 = vpack.i.bf16 %v4217_v12, %v4213_v6 }
 0x1d0   : > { %2635 = vmatprep.subr.msk.bf16.mxu1 %vm1596_vm11, %v3022_v16  ;;  %2634 = vmatprep.subr.msk.bf16.mxu0 %vm1596_vm11, %v3025_v45  ;;  %v1598_v36 = vsel %vm1596_vm11, %v3025_v45, 0  ;;  %v1155_v38 = vrot.slane %v3929_v26, 1  ;;  %v755_v45 = vadd.s32 88, %v3745_v33  ;;  %v1154_v5 = vrot.slane %v3874_v55, 1 }
 0x1d1   : > { %2886 = vrot.lane.b32.xlu1 %v2885_v46, %s3297_s8  ;;  %2881 = vrot.lane.b32.xlu0 %v2885_v46, %s3296_s18  ;;  %v4267_v0 = vsel %vm1044_vm2, %v4956_v17, %v1024_v27  ;;  %v1731_v46 = vsel %vm1596_vm11, %v3022_v16, 0  ;;  %v2890_v27 = vpack.i.bf16 %v3876_v57, %v3861_v48  ;;  %v831_v16 = vand.u32 15, %v4101_v53 }
 0x1d2   : > { %2565 = vmatpush3.bf16.msra.mxu1 %v1731_v46  ;;  %2545 = vmatpush3.bf16.msra.mxu0 %v1598_v36  ;;  %v1175_v17 = vsel %vm1165_vm4, %v1154_v5, %v1155_v38  ;;  %v845_v46 = vand.u32 15, %v755_v45  ;;  %v1156_v36 = vrot.slane %v3952_v39, 1  ;;  %v2915_v53 = vpack.i.bf16 %v3874_v55, %v3849_v42 }
 0x1d3   : > { %2582 = vmatprep.subr.bf16.mxu1 %v4256_v40  ;;  %vm1134_vm2 = vcmp.lt.s32.totalorder %v831_v16, 15  ;;  %v1157_v21 = vrot.slane %v3925_v25, 1  ;;  %v4965_v33 = vpack.i.bf16 %v3900_v11, %v3833_v34  ;;  %vm1571_vm13 = vcmask 195584  }
 0x1d4   : > { %v4295_v29 = vsel %vm1134_vm2, %v1175_v17, 0.0  ;;  %vm1136_vm12 = vcmp.lt.s32.totalorder %v845_v46, 15  ;;  %v4311_v17 = vsel %vm1165_vm4, %v1155_v38, %v1156_v36  ;;  %v2955_v38 = vpack.i.bf16 %v3934_v31, %v3925_v25 }
 0x1d5   : > { %2896 = vrot.lane.b32.xlu1 %v2895_v37, %s3297_s8  ;;  %2891 = vrot.lane.b32.xlu0 %v2890_v27, %s3297_s8  ;;  %4957 = vst [vmem:[#allocation40_spill] sm:$0xff] %v4295_v29  ;;  %4960 = vst [vmem:[#allocation42_spill] sm:$0xff] %v4311_v17 }
 0x1d9   : > { %2906 = vrot.lane.b32.xlu1 %v2895_v37, %s3296_s18  ;;  %2901 = vrot.lane.b32.xlu0 %v2890_v27, %s3296_s18  ;;  %v1173_v37 = vsel %vm1165_vm4, %v1156_v36, %v1157_v21  ;;  %v4958_v27 = vrot.slane %v3849_v42, 1  ;;  %v4333_v36 = vsel %vm1165_vm4, %v1157_v21, %v1158_v3  ;;  %v2970_v3 = vpack.i.bf16 %v4016_v1, %v3995_v28 }
 0x1da   : > { %v4313_v62 = vsel %vm1136_vm12, %v1173_v37, 0.0  ;;  %4962 = vst [vmem:[#allocation44_spill] sm:$0xff] %v4333_v36  ;;  %v4963_v37 = vrot.slane %v3995_v28, 1 }
 0x1db   : > { %v4305_v16 = vsel %vm1165_vm4, %v4958_v27, %v1154_v5  ;;  %4961 = vst [vmem:[#allocation43_spill] sm:$0xff] %v4313_v62  ;;  %v2935_v46 = vpack.i.bf16 %v4313_v62, %v4311_v17  ;;  %v2930_v5 = vpack.i.bf16 %v3952_v39, %v3929_v26 }
 0x1dc   : > { %4959 = vst [vmem:[#allocation41_spill] sm:$0xff] %v4305_v16  ;;  %v2925_v45 = vpack.i.bf16 %v4295_v29, %v4305_v16  ;;  %v4343_v27 = vsel %vm1165_vm4, %v4963_v37, %v1160_v23  ;;  %vm1360_vm4 = vcmask 64512  }
 0x1dd   : > { %2916 = vrot.lane.b32.xlu1 %v2915_v53, %s3297_s8  ;;  %2911 = vrot.lane.b32.xlu0 %v2915_v53, %s3296_s18  ;;  %v2965_v53 = vpack.i.bf16 %v4192_v56, %v4333_v36  ;;  %4964 = vst [vmem:[#allocation45_spill] sm:$0xff] %v4343_v27 }
 0x1e1   : > { %2926 = vrot.lane.b32.xlu1 %v2925_v45, %s3297_s8  ;;  %2921 = vrot.lane.b32.xlu0 %v2925_v45, %s3296_s18  ;;  %v2975_v45 = vpack.i.bf16 %v4205_v59, %v4343_v27 }
 0x1e5   : > { %2936 = vrot.lane.b32.xlu1 %v2935_v46, %s3297_s8  ;;  %2931 = vrot.lane.b32.xlu0 %v2930_v5, %s3297_s8 }
 0x1e9   : > { %2946 = vrot.lane.b32.xlu1 %v2935_v46, %s3296_s18  ;;  %2941 = vrot.lane.b32.xlu0 %v2930_v5, %s3296_s18 }
 0x1ed   : > { %2956 = vrot.lane.b32.xlu1 %v2955_v38, %s3297_s8  ;;  %2951 = vrot.lane.b32.xlu0 %v2955_v38, %s3296_s18 }
 0x1f1   : > { %2966 = vrot.lane.b32.xlu1 %v2965_v53, %s3297_s8  ;;  %2961 = vrot.lane.b32.xlu0 %v2965_v53, %s3296_s18 }
 0x1f5   : > { %2976 = vrot.lane.b32.xlu1 %v2975_v45, %s3297_s8  ;;  %2971 = vrot.lane.b32.xlu0 %v2970_v3, %s3297_s8 }
 0x1f9   : > { %2986 = vrot.lane.b32.xlu1 %v2975_v45, %s3296_s18  ;;  %2981 = vrot.lane.b32.xlu0 %v2970_v3, %s3296_s18 }
 0x1fd   : > { %2996 = vrot.lane.b32.xlu1 %v4179_v30, %s3297_s8  ;;  %2991 = vrot.lane.b32.xlu0 %v4179_v30, %s3296_s18 }
 0x201   : > { %3006 = vrot.lane.b32.xlu1 %v4229_v22, %s3297_s8  ;;  %3001 = vrot.lane.b32.xlu0 %v4229_v22, %s3296_s18 }
 0x205   : > { %3016 = vrot.lane.b32.xlu1 %v3015_v49, %s3297_s8  ;;  %3011 = vrot.lane.b32.xlu0 %v4965_v33, %s3297_s8  ;;  %s3133_s8 = scalar_lea.vmem %s4685_s10, 2048 }
 0x206   : > { %p3134_p11 = scmp.ne.s32.totalorder %s4685_s10, %s3133_s8 }
 0x208   : > { %p3135_p4 = pnand %p3134_p11, %p4991_p12 }
 0x20a   : > { %p3136_p0 = pneg %p3135_p4 }
 0x217   : > { %v2782_v23 = vpop.permute.xlu0 %2781 }
 0x218   : > { %v2784_v11 = vunpack.i.h.bf16 %v2782_v23  ;;  %v2783_v33 = vunpack.i.l.bf16 %v2782_v23 }
 0x21a   : > { %v1519_v39 = vsel %vm1360_vm4, %v4078_v50, %v2784_v11  ;;  %v1518_v23 = vsel %vm1360_vm4, %v4156_v58, %v2783_v33  ;;  %v4966_v50 = vsel %vm4133_vm9, %v4241_v8, 0.0 }
 0x21b   : > { %v2792_v21 = vpop.permute.xlu1 %2791  ;;  %v2787_v46 = vpop.permute.xlu0 %2786 }
 0x21c   : > { %v2789_v28 = vunpack.i.h.bf16 %v2787_v46  ;;  %v2788_v1 = vunpack.i.l.bf16 %v2787_v46  ;;  %v2794_v16 = vunpack.i.h.bf16 %v2792_v21  ;;  %v2793_v29 = vunpack.i.l.bf16 %v2792_v21 }
 0x21e   : > { %v1363_v46 = vsel %vm1360_vm4, %v4130_v18, %v2788_v1  ;;  %v1364_v6 = vsel %vm1360_vm4, %v4128_v20, %v2789_v28 }
 0x21f   : > { %v2797_v5 = vpop.permute.xlu1 %2796 }
 0x220   : > { %v2799_v56 = vunpack.i.h.bf16 %v2797_v5  ;;  %v2798_v25 = vunpack.i.l.bf16 %v2797_v5 }
 0x222   : > { %v2807_v38 = vpop.permute.xlu0 %2806  ;;  %v1944_v58 = vsel %vm1360_vm4, %v4245_v60, %v2798_v25  ;;  %v4967_v25 = vsel %vm4146_vm10, %v4267_v0, 0.0 }
 0x223   : > { %v2802_v53 = vpop.permute.xlu1 %2801  ;;  %v2809_v31 = vunpack.i.h.bf16 %v2807_v38  ;;  %v2808_v17 = vunpack.i.l.bf16 %v2807_v38 }
 0x224   : > { %v2804_v62 = vunpack.i.h.bf16 %v2802_v53  ;;  %v2803_v26 = vunpack.i.l.bf16 %v2802_v53  ;;  %v1945_v53 = vsel %vm1360_vm4, %v4966_v50, %v2799_v56 }
 0x225   : > { %v1366_v1 = vsel %vm1360_vm4, %v3829_v32, %v2809_v31  ;;  %v1365_v28 = vsel %vm1360_vm4, %v3853_v44, %v2808_v17 }
 0x226   : > { %v2817_v30 = vpop.permute.xlu0 %2816  ;;  %v1379_v20 = vsel %vm475_vm1, %v1363_v46, %v2803_v26  ;;  %v1380_v18 = vsel %vm475_vm1, %v1364_v6, %v2804_v62 }
 0x227   : > { %v4368_v37 = vpop.permute.xlu1 %2811  ;;  %v2819_v5 = vunpack.i.h.bf16 %v2817_v30  ;;  %v2818_v12 = vunpack.i.l.bf16 %v2817_v30 }
 0x228   : > { %v2814_v51 = vunpack.i.h.bf16 %v4368_v37  ;;  %v2813_v8 = vunpack.i.l.bf16 %v4368_v37  ;;  %v1394_v37 = vpack.c.bf16 %v1380_v18, %v1379_v20 }
 0x229   : > { %v1381_v31 = vsel %vm475_vm1, %v1365_v28, %v2818_v12  ;;  %v1382_v44 = vsel %vm475_vm1, %v1366_v1, %v2819_v5 }
 0x22a   : > { %v4370_v45 = vpop.permute.xlu0 %2826  ;;  %v1367_v50 = vsel %vm1360_vm4, %v3905_v19, %v2813_v8 }
 0x22b   : > { %v4372_v3 = vpop.permute.xlu1 %2821  ;;  %v2829_v0 = vunpack.i.h.bf16 %v4370_v45  ;;  %v2828_v33 = vunpack.i.l.bf16 %v4370_v45 }
 0x22c   : > { %v2824_v17 = vunpack.i.h.bf16 %v4372_v3 }
 0x22d   : > { %v1370_v19 = vsel %vm1360_vm4, %v3957_v41, %v2829_v0 }
 0x22e   : > { %v4374_v22 = vpop.permute.xlu0 %2836 }
 0x22f   : > { %v4376_v49 = vpop.permute.xlu1 %2831  ;;  %v2839_v46 = vunpack.i.h.bf16 %v4374_v22  ;;  %v2838_v5 = vunpack.i.l.bf16 %v4374_v22  ;;  %v3026_v22 = vld [vmem:[%s4929_s1 + $0x20] ss:$0 sps:$4 sm:$0xff]  }
 0x231   : > { %v1386_v8 = vsel %vm475_vm1, %v1370_v19, %v2839_v46 }
 0x232   : > { %v4378_v27 = vpop.permute.xlu0 %2846 }
 0x233   : > { %v4380_v34 = vpop.permute.xlu1 %2841 }
 0x236   : > { %v4382_v59 = vpop.permute.xlu0 %2861 }
 0x237   : > { %v4384_v36 = vpop.permute.xlu1 %2851  ;;  %v2864_v0 = vunpack.i.h.bf16 %v4382_v59 }
 0x23b   : > { %v4394_v42 = vpop.permute.xlu1 %2856  ;;  %v2867_v38 = vpop.permute.xlu0 %2866 }
 0x23c   : > { %v2869_v21 = vunpack.i.h.bf16 %v2867_v38  ;;  %v2868_v11 = vunpack.i.l.bf16 %v2867_v38  ;;  %v1395_v38 = vpack.c.bf16 %v1382_v44, %v1381_v31  ;;  %v2022_v44 = vsel %vm1596_vm11, %v3026_v22, 0 }
 0x23e   : > { %v1362_v56 = vsel %vm1360_vm4, %v4251_v7, %v2869_v21  ;;  %v1361_v32 = vsel %vm1360_vm4, %v4967_v25, %v2868_v11  ;;  %v2823_v7 = vunpack.i.l.bf16 %v4372_v3  ;;  %v1368_v3 = vsel %vm1360_vm4, %v3918_v24, %v2814_v51 }
 0x23f   : > { %v2877_v26 = vpop.permute.xlu1 %2876  ;;  %v2872_v60 = vpop.permute.xlu0 %2871  ;;  %v1377_v6 = vsel %vm475_vm1, %v1361_v32, %v2793_v29  ;;  %v1378_v62 = vsel %vm475_vm1, %v1362_v56, %v2794_v16  ;;  %v1369_v24 = vsel %vm1360_vm4, %v3939_v35, %v2828_v33  ;;  %v2863_v33 = vunpack.i.l.bf16 %v4382_v59 }
 0x240   : > { %v2879_v30 = vunpack.i.h.bf16 %v2877_v26  ;;  %v2878_v2 = vunpack.i.l.bf16 %v2877_v26  ;;  %v1393_v12 = vpack.c.bf16 %v1378_v62, %v1377_v6  ;;  %v2874_v20 = vunpack.i.h.bf16 %v2872_v60 }
 0x241   : > { %v2873_v18 = vunpack.i.l.bf16 %v2872_v60  ;;  %v1385_v51 = vsel %vm475_vm1, %v1369_v24, %v2838_v5  ;;  %v2834_v26 = vunpack.i.h.bf16 %v4376_v49 }
 0x242   : > { %v1535_v29 = vsel %vm475_vm1, %v1519_v39, %v2879_v30  ;;  %v1534_v16 = vsel %vm475_vm1, %v1518_v23, %v2878_v2  ;;  %2566 = vmatprep.mubr.msk.bf16.mxu1 %vm1571_vm13, %v1393_v12  ;;  %v1383_v39 = vsel %vm475_vm1, %v1367_v50, %v2823_v7  ;;  %v1384_v23 = vsel %vm475_vm1, %v1368_v3, %v2824_v17 }
 0x243   : > { %v1550_v21 = vpack.c.bf16 %v1535_v29, %v1534_v16  ;;  %v2887_v45 = vpop.permute.xlu1 %2886  ;;  %v4435_v11 = vpop.permute.xlu0 %2881  ;;  %2567 = vmatmul.mubr.msk.bf16.vlgmr.msra.gmra.mrb[4].mxu1 %vm1571_vm13, %v1394_v37  ;;  %v1396_v41 = vpack.c.bf16 %v1384_v23, %v1383_v39  ;;  %v1397_v6 = vpack.c.bf16 %v1386_v8, %v1385_v51  ;;  %v1521_v62 = vsel %vm1360_vm4, %v3809_v13, %v2874_v20 }
 0x244   : > { %v2889_v1 = vunpack.i.h.bf16 %v2887_v45  ;;  %v2888_v28 = vunpack.i.l.bf16 %v2887_v45  ;;  %2570 = vmatprep.mubr.msk.bf16.mxu1 %vm1571_vm13, %v1395_v38  ;;  %2583 = vmatpush3.bf16.msra.mxu1 %v4256_v40  ;;  %v2849_v40 = vunpack.i.h.bf16 %v4378_v27  ;;  %v1520_v17 = vsel %vm1360_vm4, %v3792_v4, %v2873_v18 }
 0x245   : > { %2546 = vmatprep.mubr.msk.bf16.mxu0 %vm1571_vm13, %v1550_v21  ;;  %2636 = vmatprep.subr.msk.bf16.mxu1 %vm1596_vm11, %v3026_v22  ;;  %v2848_v7 = vunpack.i.l.bf16 %v4378_v27  ;;  %v2844_v30 = vunpack.i.h.bf16 %v4380_v34  ;;  %v1372_v5 = vsel %vm1360_vm4, %v3987_v10, %v2834_v26  ;;  %v2859_v10 = vunpack.i.h.bf16 %v4394_v42 }
 0x246   : > { %v4452_v56 = vsel %vm475_vm1, %v1944_v58, %v2888_v28  ;;  %v4455_v25 = vsel %vm475_vm1, %v1945_v53, %v2889_v1  ;;  %v2833_v58 = vunpack.i.l.bf16 %v4376_v49  ;;  %v2843_v49 = vunpack.i.l.bf16 %v4380_v34 }
 0x247   : > { %v1976_v35 = vpack.c.bf16 %v4455_v25, %v4452_v56  ;;  %v4460_v32 = vpop.permute.xlu1 %2896  ;;  %v2892_v31 = vpop.permute.xlu0 %2891  ;;  %v1374_v59 = vsel %vm1360_vm4, %v4025_v54, %v2849_v40  ;;  %v1373_v29 = vsel %vm1360_vm4, %v3999_v43, %v2848_v7  ;;  %v1388_v38 = vsel %vm475_vm1, %v1372_v5, %v2844_v30  ;;  %v4969_v5 = vld [vmem:[#allocation35_spill] sm:$0xff] }
 0x248   : > { %v2894_v60 = vunpack.i.h.bf16 %v2892_v31  ;;  %v2893_v53 = vunpack.i.l.bf16 %v2892_v31  ;;  %2585 = vmatpush3.bf16.msra.mxu1 %v2022_v44  ;;  %v1371_v34 = vsel %vm1360_vm4, %v3980_v14, %v2833_v58  ;;  %v1389_v3 = vsel %vm475_vm1, %v1373_v29, %v2863_v33 }
 0x249   : > { %v1387_v16 = vsel %vm475_vm1, %v1371_v34, %v2843_v49  ;;  %v1390_v50 = vsel %vm475_vm1, %v1374_v59, %v2864_v0  ;;  %v2858_v14 = vunpack.i.l.bf16 %v4394_v42  ;;  %v1376_v42 = vsel %vm1360_vm4, %v4055_v15, %v2859_v10 }
 0x24a   : > { %v1536_v2 = vsel %vm475_vm1, %v1520_v17, %v2893_v53  ;;  %v1537_v37 = vsel %vm475_vm1, %v1521_v62, %v2894_v60  ;;  %v1398_v23 = vpack.c.bf16 %v1388_v38, %v1387_v16  ;;  %v1399_v19 = vpack.c.bf16 %v1390_v50, %v1389_v3 }
 0x24b   : > { %v1551_v12 = vpack.c.bf16 %v1537_v37, %v1536_v2  ;;  %v4478_v13 = vpop.permute.xlu1 %2906  ;;  %v2902_v46 = vpop.permute.xlu0 %2901  ;;  %2571 = vmatmul.mubr.msk.bf16.gmra.mrb[8].mxu1 %vm1571_vm13, %v1396_v41  ;;  %v1375_v51 = vsel %vm1360_vm4, %v4047_v61, %v2858_v14  ;;  %v2884_v31 = vunpack.i.h.bf16 %v4435_v11  ;;  %v2883_v44 = vunpack.i.l.bf16 %v4435_v11 }
 0x24c   : > { %v2904_v4 = vunpack.i.h.bf16 %v2902_v46  ;;  %v2903_v27 = vunpack.i.l.bf16 %v2902_v46  ;;  %2574 = vmatprep.mubr.msk.bf16.mxu1 %vm1571_vm13, %v1397_v6  ;;  %v2899_v60 = vunpack.i.h.bf16 %v4460_v32  ;;  %v2908_v37 = vunpack.i.l.bf16 %v4478_v13 }
 0x24d   : > { %2547 = vmatmul.mubr.msk.bf16.vlgmr.msra.gmra.mrb[20].mxu0 %vm1571_vm13, %v1551_v12  ;;  %v1947_v11 = vsel %vm1360_vm4, %v3867_v52, %v2884_v31  ;;  %v1946_v2 = vsel %vm1360_vm4, %v3859_v47, %v2883_v44  ;;  %v4973_v31 = vld [vmem:[#allocation40_spill] sm:$0xff] }
 0x24e   : > { %v1523_v54 = vsel %vm1360_vm4, %v3797_v9, %v2904_v4  ;;  %v1522_v43 = vsel %vm1360_vm4, %v3788_v63, %v2903_v27  ;;  %v2854_v63 = vunpack.i.h.bf16 %v4384_v36  ;;  %v2853_v9 = vunpack.i.l.bf16 %v4384_v36 }
 0x24f   : > { %v2917_v21 = vpop.permute.xlu1 %2916  ;;  %v2912_v45 = vpop.permute.xlu0 %2911  ;;  %v2898_v36 = vunpack.i.l.bf16 %v4460_v32  ;;  %v2909_v32 = vunpack.i.h.bf16 %v4478_v13  ;;  %v1963_v33 = vsel %vm475_vm1, %v1947_v11, %v2899_v60  ;;  %v4968_v13 = vld [vmem:[#allocation34_spill] sm:$0xff]  ;;  %v1948_v34 = vsel %vm1360_vm4, %v4969_v5, %v2908_v37 }
 0x250   : > { %v2919_v22 = vunpack.i.h.bf16 %v2917_v21  ;;  %v2918_v39 = vunpack.i.l.bf16 %v2917_v21  ;;  %v2914_v8 = vunpack.i.h.bf16 %v2912_v45  ;;  %v2913_v41 = vunpack.i.l.bf16 %v2912_v45  ;;  %v4970_v21 = vld [vmem:[#allocation27_spill] sm:$0xff] }
 0x251   : > { %v1391_v61 = vsel %vm475_vm1, %v1375_v51, %v2853_v9  ;;  %v1392_v58 = vsel %vm475_vm1, %v1376_v42, %v2854_v63  ;;  %v1949_v27 = vsel %vm1360_vm4, %v4968_v13, %v2909_v32  ;;  %v4972_v42 = vld [vmem:[#allocation38_spill] sm:$0xff] }
 0x252   : > { %v1538_v1 = vsel %vm475_vm1, %v1522_v43, %v2918_v39  ;;  %v1539_v28 = vsel %vm475_vm1, %v1523_v54, %v2919_v22  ;;  %v1525_v40 = vsel %vm1360_vm4, %v3876_v57, %v2914_v8  ;;  %v1524_v62 = vsel %vm1360_vm4, %v3861_v48, %v2913_v41  ;;  %v4978_v13 = vld [vmem:[#allocation42_spill] sm:$0xff] }
 0x253   : > { %v1552_v24 = vpack.c.bf16 %v1539_v28, %v1538_v1  ;;  %v2927_v20 = vpop.permute.xlu1 %2926  ;;  %v4503_v18 = vpop.permute.xlu0 %2921  ;;  %2575 = vmatmul.mubr.msk.bf16.gmra.mrb[12].mxu1 %vm1571_vm13, %v1398_v23  ;;  %v1400_v30 = vpack.c.bf16 %v1392_v58, %v1391_v61  ;;  %v1962_v48 = vsel %vm475_vm1, %v1946_v2, %v2898_v36 }
 0x254   : > { %2578 = vmatprep.mubr.msk.bf16.mxu1 %vm1571_vm13, %v1399_v19  ;;  %v2929_v52 = vunpack.i.h.bf16 %v2927_v20  ;;  %v2928_v12 = vunpack.i.l.bf16 %v2927_v20  ;;  %v1977_v47 = vpack.c.bf16 %v1963_v33, %v1962_v48  ;;  %v2924_v56 = vunpack.i.h.bf16 %v4503_v18 }
 0x255   : > { %2550 = vmatprep.mubr.msk.bf16.mxu0 %vm1571_vm13, %v1552_v24  ;;  %v2923_v25 = vunpack.i.l.bf16 %v4503_v18 }
 0x256   : > { %v1964_v16 = vsel %vm475_vm1, %v1948_v34, %v2928_v12  ;;  %v1965_v38 = vsel %vm475_vm1, %v1949_v27, %v2929_v52 }
 0x257   : > { %v4516_v15 = vpop.permute.xlu1 %2936  ;;  %v2932_v26 = vpop.permute.xlu0 %2931  ;;  %v1978_v54 = vpack.c.bf16 %v1965_v38, %v1964_v16  ;;  %v1950_v51 = vsel %vm1360_vm4, %v4972_v42, %v2923_v25 }
 0x258   : > { %v2934_v53 = vunpack.i.h.bf16 %v2932_v26  ;;  %v2933_v6 = vunpack.i.l.bf16 %v2932_v26  ;;  %v2939_v10 = vunpack.i.h.bf16 %v4516_v15  ;;  %v2938_v14 = vunpack.i.l.bf16 %v4516_v15  ;;  %v4974_v15 = vld [vmem:[#allocation41_spill] sm:$0xff] }
 0x25a   : > { %v1540_v17 = vsel %vm475_vm1, %v1524_v62, %v2933_v6  ;;  %v1541_v7 = vsel %vm475_vm1, %v1525_v40, %v2934_v53  ;;  %v1966_v8 = vsel %vm475_vm1, %v1950_v51, %v2938_v14  ;;  %v4975_v62 = vld [vmem:[#allocation31_spill] sm:$0xff] }
 0x25b   : > { %v1553_v49 = vpack.c.bf16 %v1541_v7, %v1540_v17  ;;  %v2947_v57 = vpop.permute.xlu1 %2946  ;;  %v2942_v0 = vpop.permute.xlu0 %2941  ;;  %2579 = vmatmul.mubr.msk.bf16.gmra.mrb[16].mxu1 %vm1571_vm13, %v1400_v30  ;;  %v4976_v17 = vld [vmem:[#allocation29_spill] sm:$0xff] }
 0x25c   : > { %v2944_v46 = vunpack.i.h.bf16 %v2942_v0  ;;  %v2943_v4 = vunpack.i.l.bf16 %v2942_v0  ;;  %2586 = vmatprep.mubr.msk.bf16.mxu1 %vm1571_vm13, %v1976_v35  ;;  %v2949_v43 = vunpack.i.h.bf16 %v2947_v57  ;;  %v2948_v23 = vunpack.i.l.bf16 %v2947_v57 }
 0x25d   : > { %2551 = vmatmul.mubr.msk.bf16.gmra.mrb[24].mxu0 %vm1571_vm13, %v1553_v49 }
 0x25e   : > { %v1527_v35 = vsel %vm1360_vm4, %v3874_v55, %v2944_v46  ;;  %v1526_v45 = vsel %vm1360_vm4, %v4970_v21, %v2943_v4  ;;  %v4971_v55 = vld [vmem:[#allocation39_spill] sm:$0xff]  ;;  %v1953_v44 = vsel %vm1360_vm4, %v4973_v31, %v2949_v43  ;;  %v1952_v26 = vsel %vm1360_vm4, %v4974_v15, %v2948_v23  ;;  %v4981_v43 = vld [vmem:[#allocation36_spill] sm:$0xff] }
 0x25f   : > { %v2957_v59 = vpop.permute.xlu1 %2956  ;;  %v2952_v29 = vpop.permute.xlu0 %2951  ;;  %v1951_v18 = vsel %vm1360_vm4, %v4971_v55, %v2924_v56  ;;  %v4977_v4 = vld [vmem:[#allocation43_spill] sm:$0xff]  ;;  %v4979_v56 = vld [vmem:[#allocation30_spill] sm:$0xff] }
 0x260   : > { %v2959_v3 = vunpack.i.h.bf16 %v2957_v59  ;;  %v2958_v50 = vunpack.i.l.bf16 %v2957_v59  ;;  %v2954_v63 = vunpack.i.h.bf16 %v2952_v29  ;;  %v2953_v9 = vunpack.i.l.bf16 %v2952_v29 }
 0x261   : > { %v1967_v41 = vsel %vm475_vm1, %v1951_v18, %v2939_v10 }
 0x262   : > { %v1542_v22 = vsel %vm475_vm1, %v1526_v45, %v2958_v50  ;;  %v1543_v39 = vsel %vm475_vm1, %v1527_v35, %v2959_v3  ;;  %v1979_v40 = vpack.c.bf16 %v1967_v41, %v1966_v8  ;;  %v1529_v11 = vsel %vm1360_vm4, %v4975_v62, %v2954_v63  ;;  %v4980_v35 = vld [vmem:[#allocation28_spill] sm:$0xff] }
 0x263   : > { %v1554_v1 = vpack.c.bf16 %v1543_v39, %v1542_v22  ;;  %v2967_v28 = vpop.permute.xlu1 %2966  ;;  %v2962_v19 = vpop.permute.xlu0 %2961  ;;  %2587 = vmatmul.mubr.msk.bf16.vlgmr.msra.gmra.mrb[4].mxu1 %vm1571_vm13, %v1977_v47  ;;  %v1528_v7 = vsel %vm1360_vm4, %v4976_v17, %v2953_v9 }
 0x264   : > { %v2969_v24 = vunpack.i.h.bf16 %v2967_v28  ;;  %v2968_v20 = vunpack.i.l.bf16 %v2967_v28  ;;  %2590 = vmatprep.mubr.msk.bf16.mxu1 %vm1571_vm13, %v1978_v54  ;;  %v2964_v30 = vunpack.i.h.bf16 %v2962_v19  ;;  %v2963_v2 = vunpack.i.l.bf16 %v2962_v19 }
 0x265   : > { %2554 = vmatprep.mubr.msk.bf16.mxu0 %vm1571_vm13, %v1554_v1  ;;  %v4982_v1 = vld [vmem:[#allocation44_spill] sm:$0xff] }
 0x266   : > { %v1968_v60 = vsel %vm475_vm1, %v1952_v26, %v2968_v20  ;;  %v1969_v36 = vsel %vm475_vm1, %v1953_v44, %v2969_v24  ;;  %v1955_v47 = vsel %vm1360_vm4, %v4977_v4, %v2964_v30  ;;  %v1954_v27 = vsel %vm1360_vm4, %v4978_v13, %v2963_v2  ;;  %v4620_v4 = vld [vmem:[%s4987_s5] ss:$0 sm:$0xff] }
 0x267   : > { %v2977_v61 = vpop.permute.xlu1 %2976  ;;  %v2972_v58 = vpop.permute.xlu0 %2971  ;;  %v1980_v49 = vpack.c.bf16 %v1969_v36, %v1968_v60  ;;  %v4984_v60 = vld [vmem:[#allocation32_spill] sm:$0xff] }
 0x268   : > { %v2974_v53 = vunpack.i.h.bf16 %v2972_v58  ;;  %v2973_v6 = vunpack.i.l.bf16 %v2972_v58  ;;  %v2979_v57 = vunpack.i.h.bf16 %v2977_v61  ;;  %v2978_v0 = vunpack.i.l.bf16 %v2977_v61  ;;  %v4983_v61 = vld [vmem:[#allocation33_spill] sm:$0xff] }
 0x26a   : > { %v1544_v32 = vsel %vm475_vm1, %v1528_v7, %v2973_v6  ;;  %v1545_v37 = vsel %vm475_vm1, %v1529_v11, %v2974_v53  ;;  %v1970_v5 = vsel %vm475_vm1, %v1954_v27, %v2978_v0  ;;  %v1971_v34 = vsel %vm475_vm1, %v1955_v47, %v2979_v57  ;;  %v4985_v53 = vld [vmem:[#allocation37_spill] sm:$0xff] }
 0x26b   : > { %v1555_v48 = vpack.c.bf16 %v1545_v37, %v1544_v32  ;;  %v2987_v33 = vpop.permute.xlu1 %2986  ;;  %v2982_v52 = vpop.permute.xlu0 %2981  ;;  %2591 = vmatmul.mubr.msk.bf16.gmra.mrb[8].mxu1 %vm1571_vm13, %v1979_v40  ;;  %v1981_v45 = vpack.c.bf16 %v1971_v34, %v1970_v5  ;;  %v4986_v40 = vld [vmem:[#allocation45_spill] sm:$0xff] }
 0x26c   : > { %v2984_v12 = vunpack.i.h.bf16 %v2982_v52  ;;  %v2983_v46 = vunpack.i.l.bf16 %v2982_v52  ;;  %2594 = vmatprep.mubr.msk.bf16.mxu1 %vm1571_vm13, %v1980_v49  ;;  %v2989_v16 = vunpack.i.h.bf16 %v2987_v33  ;;  %v2988_v38 = vunpack.i.l.bf16 %v2987_v33 }
 0x26d   : > { %2555 = vmatmul.mubr.msk.bf16.gmra.mrb[28].mxu0 %vm1571_vm13, %v1555_v48 }
 0x26e   : > { %v1531_v25 = vsel %vm1360_vm4, %v4979_v56, %v2984_v12  ;;  %v1530_v21 = vsel %vm1360_vm4, %v4980_v35, %v2983_v46  ;;  %v1957_v23 = vsel %vm1360_vm4, %v4981_v43, %v2989_v16  ;;  %v1956_v28 = vsel %vm1360_vm4, %v4982_v1, %v2988_v38 }
 0x26f   : > { %v2997_v59 = vpop.permute.xlu1 %2996  ;;  %v2992_v29 = vpop.permute.xlu0 %2991 }
 0x270   : > { %v2999_v3 = vunpack.i.h.bf16 %v2997_v59  ;;  %v2998_v50 = vunpack.i.l.bf16 %v2997_v59  ;;  %v2994_v20 = vunpack.i.h.bf16 %v2992_v29  ;;  %v2993_v55 = vunpack.i.l.bf16 %v2992_v29 }
 0x272   : > { %v1546_v10 = vsel %vm475_vm1, %v1530_v21, %v2998_v50  ;;  %v1547_v14 = vsel %vm475_vm1, %v1531_v25, %v2999_v3  ;;  %v1533_v58 = vsel %vm1360_vm4, %v4983_v61, %v2994_v20  ;;  %v1532_v36 = vsel %vm1360_vm4, %v4984_v60, %v2993_v55 }
 0x273   : > { %v1556_v22 = vpack.c.bf16 %v1547_v14, %v1546_v10  ;;  %v3007_v39 = vpop.permute.xlu1 %3006  ;;  %v3002_v54 = vpop.permute.xlu0 %3001  ;;  %2595 = vmatmul.mubr.msk.bf16.gmra.mrb[12].mxu1 %vm1571_vm13, %v1981_v45 }
 0x274   : > { %v3009_v19 = vunpack.i.h.bf16 %v3007_v39  ;;  %v3008_v24 = vunpack.i.l.bf16 %v3007_v39  ;;  %v3004_v18 = vunpack.i.h.bf16 %v3002_v54  ;;  %v3003_v42 = vunpack.i.l.bf16 %v3002_v54 }
 0x275   : > { %2558 = vmatprep.mubr.msk.bf16.mxu0 %vm1571_vm13, %v1556_v22  ;;  %v3027_v22 = vld [vmem:[%s3699_s6 + $0x10] sm:$0xff] }
 0x276   : > { %v1972_v51 = vsel %vm475_vm1, %v1956_v28, %v3008_v24  ;;  %v1973_v63 = vsel %vm475_vm1, %v1957_v23, %v3009_v19  ;;  %v1959_v6 = vsel %vm1360_vm4, %v4985_v53, %v3004_v18  ;;  %v1958_v62 = vsel %vm1360_vm4, %v4986_v40, %v3003_v42  ;;  %v3028_v28 = vld [vmem:[%s3699_s6] sm:$0xff]  ;;  %v3029_v42 = vld [vmem:[%s3699_s6 + $0x18] sm:$0xff] }
 0x277   : > { %v1982_v9 = vpack.c.bf16 %v1973_v63, %v1972_v51  ;;  %v3017_v8 = vpop.permute.xlu1 %3016  ;;  %v3012_v41 = vpop.permute.xlu0 %3011 }
 0x278   : > { %v3019_v31 = vunpack.i.h.bf16 %v3017_v8  ;;  %v3018_v44 = vunpack.i.l.bf16 %v3017_v8  ;;  %v3014_v15 = vunpack.i.h.bf16 %v3012_v41  ;;  %v3013_v26 = vunpack.i.l.bf16 %v3012_v41 }
 0x279   : > { %2598 = vmatprep.mubr.msk.bf16.mxu1 %vm1571_vm13, %v1982_v9 }
 0x27a   : > { %v1974_v11 = vsel %vm475_vm1, %v1958_v62, %v3018_v44  ;;  %v1975_v17 = vsel %vm475_vm1, %v1959_v6, %v3019_v31  ;;  %v1548_v7 = vsel %vm475_vm1, %v1532_v36, %v3013_v26  ;;  %v1549_v30 = vsel %vm475_vm1, %v1533_v58, %v3014_v15  ;;  %v3030_v31 = vld [vmem:[%s3699_s6 + $0x8] sm:$0xff] }
 0x27b   : > { %v1983_v2 = vpack.c.bf16 %v1975_v17, %v1974_v11  ;;  %v1557_v32 = vpack.c.bf16 %v1549_v30, %v1548_v7  ;;  %v3031_v7 = vld [vmem:[%s3699_s6 + $0x30] sm:$0xff] }
 0x27d   : > { %2559 = vmatmul.mubr.msk.bf16.gmra.mrb[32].mxu0 %vm1571_vm13, %v1557_v32  ;;  %2599 = vmatmul.mubr.msk.bf16.gmra.mrb[16].mxu1 %vm1571_vm13, %v1983_v2 }
 0x320   : > { %v2548_v37 = vpop.f32.mrb[20].mxu0 }
 0x321   : > { %v1634_v49 = vpop.f32.mrb[21].mxu0 }
 0x322   : > { %v2549_v57 = vpop.f32.mrb[22].mxu0 }
 0x323   : > { %v1637_v0 = vpop.f32.mrb[23].mxu0 }
 0x330   : > { %v2552_v48 = vpop.f32.mrb[24].mxu0 }
 0x331   : > { %v1650_v33 = vpop.f32.mrb[25].mxu0 }
 0x332   : > { %v2553_v52 = vpop.f32.mrb[26].mxu0 }
 0x333   : > { %v1653_v12 = vpop.f32.mrb[27].mxu0 }
 0x336   : > { %v2588_v46 = vpop.f32.mrb[4].mxu1 }
 0x337   : > { %v2602_v47 = vadd.f32 %v2588_v46, %v2548_v37  ;;  %v2058_v13 = vpop.f32.mrb[5].mxu1 }
 0x338   : > { %v2603_v27 = vadd.f32 %v2058_v13, %v1634_v49  ;;  %v2589_v5 = vpop.f32.mrb[6].mxu1  ;;  %v3032_v49 = vld [vmem:[%s3699_s6 + $0x20] sm:$0xff] }
 0x339   : > { %v2146_v34 = vadd.f32 %v2602_v47, %v4620_v4  ;;  %v2604_v59 = vadd.f32 %v2589_v5, %v2549_v57  ;;  %v2061_v29 = vpop.f32.mrb[7].mxu1 }
 0x33a   : > { %v2144_v16 = vadd.f32 %v2603_v27, %v4620_v4  ;;  %v2605_v38 = vadd.f32 %v2061_v29, %v1637_v0  ;;  %v3034_v27 = vld [vmem:[%s3699_s6 + $0x28] sm:$0xff] }
 0x33b   : > { %v2162_v3 = vmul.f32 0.1, %v2146_v34  ;;  %v2147_v50 = vadd.f32 %v2604_v59, %v4620_v4 }
 0x33c   : > { %v2160_v56 = vmul.f32 0.1, %v2144_v16  ;;  %v2145_v25 = vadd.f32 %v2605_v38, %v4620_v4 }
 0x33d   : > { %v2178_v35 = vmax.f32 %v2146_v34, %v2162_v3  ;;  %v2163_v21 = vmul.f32 0.1, %v2147_v50 }
 0x33e   : > { %v2176_v45 = vmax.f32 %v2144_v16, %v2160_v56  ;;  %v2161_v10 = vmul.f32 0.1, %v2145_v25  ;;  %v2592_v14 = vpop.f32.mrb[8].mxu1 }
 0x33f   : > { %v2194_v39 = vadd.f32 %v3027_v22, %v2178_v35  ;;  %v2179_v54 = vmax.f32 %v2147_v50, %v2163_v21  ;;  %v2606_v43 = vadd.f32 %v2592_v14, %v2552_v48  ;;  %v2074_v23 = vpop.f32.mrb[9].mxu1  ;;  %v3035_v21 = vld [vmem:[%s3699_s6 + $0x50] sm:$0xff] }
 0x340   : > { %v2556_v1 = vpop.f32.mrb[28].mxu0  ;;  %v2192_v19 = vadd.f32 %v3028_v28, %v2176_v45  ;;  %v2177_v24 = vmax.f32 %v2145_v25, %v2161_v10  ;;  %v2607_v20 = vadd.f32 %v2074_v23, %v1650_v33  ;;  %v2593_v55 = vpop.f32.mrb[10].mxu1 }
 0x341   : > { %v1666_v18 = vpop.f32.mrb[29].mxu0  ;;  %2210 = vst.msk [vmem:[%s4629_s21 + $0x10] sm:$0xff] %vm475_vm1, %v2194_v39  ;;  %v2195_v51 = vadd.f32 %v3029_v42, %v2179_v54  ;;  %v2150_v63 = vadd.f32 %v2606_v43, %v4620_v4  ;;  %v2608_v9 = vadd.f32 %v2593_v55, %v2553_v52  ;;  %v2077_v8 = vpop.f32.mrb[11].mxu1  ;;  %v3033_v52 = vld [vmem:[%s3699_s6 + $0x38] sm:$0xff]  ;;  %v3036_v39 = vld [vmem:[%s3699_s6 + $0x40] sm:$0xff]  ;;  %v3038_v42 = vld [vmem:[%s3699_s6 + $0x48] sm:$0xff] }
 0x342   : > { %v2557_v41 = vpop.f32.mrb[30].mxu0  ;;  %2208 = vst.msk [vmem:[%s4629_s21] sm:$0xff] %vm475_vm1, %v2192_v19  ;;  %v2193_v44 = vadd.f32 %v3030_v31, %v2177_v24  ;;  %v2148_v15 = vadd.f32 %v2607_v20, %v4620_v4  ;;  %v2609_v26 = vadd.f32 %v2077_v8, %v1653_v12  ;;  %v3037_v19 = vld [vmem:[%s3699_s6 + $0x58] sm:$0xff] }
 0x343   : > { %v1669_v61 = vpop.f32.mrb[31].mxu0  ;;  %2211 = vst.msk [vmem:[%s4629_s21 + $0x18] sm:$0xff] %vm475_vm1, %v2195_v51  ;;  %v2166_v58 = vmul.f32 0.1, %v2150_v63  ;;  %v2151_v60 = vadd.f32 %v2608_v9, %v4620_v4 }
 0x344   : > { %2209 = vst.msk [vmem:[%s4629_s21 + $0x8] sm:$0xff] %vm475_vm1, %v2193_v44  ;;  %v2164_v36 = vmul.f32 0.1, %v2148_v15  ;;  %v2149_v53 = vadd.f32 %v2609_v26, %v4620_v4 }
 0x345   : > { %v2182_v6 = vmax.f32 %v2150_v63, %v2166_v58  ;;  %v2167_v40 = vmul.f32 0.1, %v2151_v60 }
 0x346   : > { %v2180_v62 = vmax.f32 %v2148_v15, %v2164_v36  ;;  %v2165_v11 = vmul.f32 0.1, %v2149_v53  ;;  %v2596_v17 = vpop.f32.mrb[12].mxu1 }
 0x347   : > { %v2198_v30 = vadd.f32 %v3031_v7, %v2182_v6  ;;  %v2183_v2 = vmax.f32 %v2151_v60, %v2167_v40  ;;  %v2610_v32 = vadd.f32 %v2596_v17, %v2556_v1  ;;  %v2090_v37 = vpop.f32.mrb[13].mxu1  ;;  %v3039_v40 = vld [vmem:[%s3699_s6 + $0x70] sm:$0xff]  ;;  %v3040_v17 = vld [vmem:[%s3699_s6 + $0x60] sm:$0xff] }
 0x348   : > { %v2196_v57 = vadd.f32 %v3032_v49, %v2180_v62  ;;  %v2181_v0 = vmax.f32 %v2149_v53, %v2165_v11  ;;  %v2611_v48 = vadd.f32 %v2090_v37, %v1666_v18  ;;  %v2597_v33 = vpop.f32.mrb[14].mxu1 }
 0x349   : > { %2214 = vst.msk [vmem:[%s4629_s21 + $0x30] sm:$0xff] %vm475_vm1, %v2198_v30  ;;  %v2199_v12 = vadd.f32 %v3033_v52, %v2183_v2  ;;  %v2154_v46 = vadd.f32 %v2610_v32, %v4620_v4  ;;  %v2612_v47 = vadd.f32 %v2597_v33, %v2557_v41  ;;  %v2093_v13 = vpop.f32.mrb[15].mxu1  ;;  %v3042_v32 = vld [vmem:[%s3699_s6 + $0x68] sm:$0xff] }
 0x34a   : > { %2212 = vst.msk [vmem:[%s4629_s21 + $0x20] sm:$0xff] %vm475_vm1, %v2196_v57  ;;  %v2197_v5 = vadd.f32 %v3034_v27, %v2181_v0  ;;  %v2152_v34 = vadd.f32 %v2611_v48, %v4620_v4  ;;  %v2613_v59 = vadd.f32 %v2093_v13, %v1669_v61 }
 0x34b   : > { %2215 = vst.msk [vmem:[%s4629_s21 + $0x38] sm:$0xff] %vm475_vm1, %v2199_v12  ;;  %v2170_v29 = vmul.f32 0.1, %v2154_v46  ;;  %v2155_v16 = vadd.f32 %v2612_v47, %v4620_v4 }
 0x34c   : > { %2213 = vst.msk [vmem:[%s4629_s21 + $0x28] sm:$0xff] %vm475_vm1, %v2197_v5  ;;  %v2168_v38 = vmul.f32 0.1, %v2152_v34  ;;  %v2153_v3 = vadd.f32 %v2613_v59, %v4620_v4 }
 0x34d   : > { %v2186_v50 = vmax.f32 %v2154_v46, %v2170_v29  ;;  %v2171_v56 = vmul.f32 0.1, %v2155_v16 }
 0x34e   : > { %v2184_v25 = vmax.f32 %v2152_v34, %v2168_v38  ;;  %v2169_v35 = vmul.f32 0.1, %v2153_v3 }
 0x34f   : > { %v2202_v45 = vadd.f32 %v3035_v21, %v2186_v50  ;;  %v2187_v10 = vmax.f32 %v2155_v16, %v2171_v56 }
 0x350   : > { %v2560_v14 = vpop.f32.mrb[32].mxu0  ;;  %v2600_v22 = vpop.f32.mrb[16].mxu1  ;;  %v2200_v54 = vadd.f32 %v3036_v39, %v2184_v25  ;;  %v2185_v43 = vmax.f32 %v2153_v3, %v2169_v35 }
 0x351   : > { %v2614_v23 = vadd.f32 %v2600_v22, %v2560_v14  ;;  %v1682_v1 = vpop.f32.mrb[33].mxu0  ;;  %v2106_v28 = vpop.f32.mrb[17].mxu1  ;;  %2218 = vst.msk [vmem:[%s4629_s21 + $0x50] sm:$0xff] %vm475_vm1, %v2202_v45  ;;  %v2203_v24 = vadd.f32 %v3037_v19, %v2187_v10 }
 0x352   : > { %v2615_v20 = vadd.f32 %v2106_v28, %v1682_v1  ;;  %v2561_v55 = vpop.f32.mrb[34].mxu0  ;;  %v2601_v18 = vpop.f32.mrb[18].mxu1  ;;  %2216 = vst.msk [vmem:[%s4629_s21 + $0x40] sm:$0xff] %vm475_vm1, %v2200_v54  ;;  %v2201_v51 = vadd.f32 %v3038_v42, %v2185_v43 }
 0x353   : > { %v2158_v63 = vadd.f32 %v2614_v23, %v4620_v4  ;;  %v2616_v9 = vadd.f32 %v2601_v18, %v2561_v55  ;;  %v1685_v8 = vpop.f32.mrb[35].mxu0  ;;  %v2109_v41 = vpop.f32.mrb[19].mxu1  ;;  %2219 = vst.msk [vmem:[%s4629_s21 + $0x58] sm:$0xff] %vm475_vm1, %v2203_v24 }
 0x354   : > { %v2156_v31 = vadd.f32 %v2615_v20, %v4620_v4  ;;  %v2617_v44 = vadd.f32 %v2109_v41, %v1685_v8  ;;  %2217 = vst.msk [vmem:[%s4629_s21 + $0x48] sm:$0xff] %vm475_vm1, %v2201_v51 }
 0x355   : > { %v2174_v15 = vmul.f32 0.1, %v2158_v63  ;;  %v2159_v26 = vadd.f32 %v2616_v9, %v4620_v4 }
 0x356   : > { %v2172_v61 = vmul.f32 0.1, %v2156_v31  ;;  %v2157_v58 = vadd.f32 %v2617_v44, %v4620_v4  ;;  %v3041_v4 = vld [vmem:[%s3699_s6 + $0x78] sm:$0xff]  ;;  %s3137_s6 = sshll.u32 %s3298_s17, 4  ;;  %s3138_s6 = int_to_ptr.vmem [resolvable:$false] %s3137_s6 }
 0x357   : > { %v2190_v60 = vmax.f32 %v2158_v63, %v2174_v15  ;;  %v2175_v36 = vmul.f32 0.1, %v2159_v26  ;;  %s3139_s5 = scalar_lea.vmem %s3138_s6, 4096  ;;  %p3140_p6 = scmp.lt.s32.totalorder %s4685_s10, %s3138_s6 }
 0x358   : > { %v2188_v53 = vmax.f32 %v2156_v31, %v2172_v61  ;;  %v2173_v6 = vmul.f32 0.1, %v2157_v58  ;;  %p3141_p8 = scmp.lt.s32.totalorder %s3139_s5, %s3133_s8 }
 0x359   : > { %v2206_v62 = vadd.f32 %v3039_v40, %v2190_v60  ;;  %v2191_v11 = vmax.f32 %v2159_v26, %v2175_v36 }
 0x35a   : > { %v2204_v7 = vadd.f32 %v3040_v17, %v2188_v53  ;;  %v2189_v30 = vmax.f32 %v2157_v58, %v2173_v6  ;;  %p3142_p9 = por %p3141_p8, %p3140_p6 }
 0x35b   : > { %2222 = vst.msk [vmem:[%s4629_s21 + $0x70] sm:$0xff] %vm475_vm1, %v2206_v62  ;;  %v2207_v2 = vadd.f32 %v3041_v4, %v2191_v11 }
 0x35c   : > { %2220 = vst.msk [vmem:[%s4629_s21 + $0x60] sm:$0xff] %vm475_vm1, %v2204_v7  ;;  %v2205_v37 = vadd.f32 %v3042_v32, %v2189_v30  ;;  %p3143_p13 = pnand %p3142_p9, %p3136_p0 }
 0x35d   : > { %2223 = vst.msk [vmem:[%s4629_s21 + $0x78] sm:$0xff] %vm475_vm1, %v2207_v2 }
 0x35e   : > { %2221 = vst.msk [vmem:[%s4629_s21 + $0x68] sm:$0xff] %vm475_vm1, %v2205_v37 }
 0x35f   : > { %3146 = shalt.err (!%p3143_p13)
}
 0x360   : > { %s3147_s13 = scalar_lea.hbm %s4693_s7, 2048  ;;  %s3151_s3 = scalar_lea.hbm %s4990_s16, 8192 }
 0x361   : > { %p3148_p7 = scmp.ne.s32.totalorder %s4693_s7, %s3147_s13  ;;  %p3152_p5 = scmp.lt.u32.totalorder %s4693_s7, %s4990_s16 }
 0x362   : > { %p3153_p2 = scmp.lt.u32.totalorder %s3151_s3, %s3147_s13  ;;  %p3155_p11 = scmp.lt.u32.totalorder %s3147_s13, %s4693_s7 }
 0x363   : > { %p3149_p3 = pnand %p3148_p7, %p4991_p12 }
 0x364   : > { %p3154_p1 = por %p3153_p2, %p3152_p5 }
 0x365   : > { %p3150_p10 = pneg %p3149_p3 }
 0x366   : > { %p3156_p4 = por %p3155_p11, %p3154_p1 }
 0x368   : > { %p3157_p0 = pnand %p3156_p4, %p3150_p10 }
 0x36a   : > { %3160 = shalt.err (!%p3157_p0)
}
 0x36b   : > { %s3299_s4 = smov 128  }
 0x36c   : > { %2643 = dma.vmem_to_hbm [thread:$0]  (%p4991_p12), %s4685_s10, 2048, %s4693_s7, %s4701_s20, %s3299_s4, %s3299_s4, %s3296_s18  }
 0x36d PF: > { %s4992_s15 = sld [smem:[#allocation13_spill]]  ;;  %s4993_s24 = sld [smem:[#allocation23_spill]] }
 0x36e   : > { %p2660_p6 = scmp.ge.s32.totalorder %s3287_s14, 2 }
 0x373   : > { %s2256_s22 = sand.u32 1, %s4992_s15   ;;  %p4994_p8 = scmp.ne.s32.totalorder %s4993_s24, 0 }
 0x374   : > { %s2257_s8 = scalar_lea.sflag [#allocation4], %s2256_s22 }
 0x375   : > { %p2656_p9 = pnand %p2660_p6, %p4994_p8 }
 0x377   : > { %3230 = dma.done.wait (!%p2656_p9), %s2257_s8, 2048  }
 0x378   : > { %3232 = vsyncadd (!%p2656_p9), %s2257_s8, 4294965248  ;;  %s26_s14 = sadd.s32 1, %s3287_s14   ;;  %s4996_s27 = sld [smem:[#allocation14_spill]] }
 0x379   : > { %p4731_p13 = scmp.ge.s32.totalorder %s26_s14, 6   ;;  %s4997_s18 = sld [smem:[#allocation15_spill]] }
 0x37a   : > { %s4998_s10 = smov %s3550_s30  ;;  %s4999_s7 = sld [smem:[#allocation18_spill]] }
 0x37b   : > { %s5000_s20 = sld [smem:[#allocation19_spill]]  ;;  %s5001_s12 = sld [smem:[#allocation20_spill]] }
 0x37c   : > { %s5002_s13 = sld [smem:[#allocation25_spill]]  ;;  %s5003_s24 = smov %s3239_s25 }
 0x37d   : > { %s5004_s25 = smov %s3243_s26  ;;  %s5005_s26 = smov %s3635_s11 }
 0x37e   : > { %s5006_s28 = smov %s3255_s29  ;;  %s5007_s29 = smov %s3559_s19 }
 0x37f   : > { %s5008_s30 = smov %s4997_s18  ;;  %s5009_s8 = smov %s3267_s9 }
 0x380   : > { %s5010_s9 = smov %s4998_s10  ;;  %s5011_s10 = smov %s4999_s7 }
 0x381   : > { %s5012_s11 = smov %s5000_s20  ;;  %25 = sbr.rel (!%p4731_p13) target bundleno = 19 (0x13), region = 119 }
 0x388   :  { %2262 = vsyncpa [#allocation3], 1 }
 0x389   :  { %2264 = vsyncpa [#allocation3 + $0x1], 1 }
 0x38a   :  { %2265 = vsyncpa [#allocation6], 1 }
 0x38b   :  { %2267 = vsyncpa [#allocation6 + $0x1], 1 }
 0x38c   :  { %2268 = vsyncpa [#allocation4], 1 }
 0x38d   :  { %2270 = vsyncpa [#allocation4 + $0x1], 1 }

</bundles_post_ra>
